<compile_context>
chip_gen: v5e
topology: v5e:2x2
jax: 0.10.0
libtpu: 0.0.40
codegen_flags: <defaults>
</compile_context>

<pallas_src>
import functools

import jax
import jax.numpy as jnp
from jax import lax
from jax.experimental import pallas as pl
from jax.experimental.pallas import tpu as pltpu


def _round_up(x, m):
    return (x + m - 1) // m * m


# Small enough for v7x's 64 MiB physical VMEM, fine on v5e/v6e.
_VMEM_LIMIT = 32 * 1024 * 1024


# ----------------------------------------------------------------------------
# Kernel 1: out = relu?(x @ w + b), tiled over M, weights/bias resident.
# ----------------------------------------------------------------------------
def _mm_bias_kernel(x_ref, w_ref, b_ref, o_ref, *, apply_relu):
    acc = jnp.dot(x_ref[...], w_ref[...], preferred_element_type=jnp.float32)
    acc = acc + b_ref[...]                       # (1, Np) broadcasts over rows
    if apply_relu:
        acc = jnp.maximum(acc, 0.0)
    o_ref[...] = acc.astype(o_ref.dtype)


def matmul_bias(x, w, b, *, apply_relu, tm=256):
    """x: (M, K), w: (K, N), b: (N,) -> (M, N) f32.  Grid over M tiles."""
    M, K = x.shape
    Kw, N = w.shape
    assert K == Kw and b.shape == (N,)
    Kp = _round_up(K, 128)
    Np = _round_up(N, 128)
    Mp = _round_up(M, tm)

    xp = jnp.pad(x, ((0, Mp - M), (0, Kp - K)))
    wp = jnp.pad(w, ((0, Kp - K), (0, Np - N)))
    bp = jnp.pad(b, ((0, Np - N),)).reshape(1, Np)

    out = pl.pallas_call(
        functools.partial(_mm_bias_kernel, apply_relu=apply_relu),
        out_shape=jax.ShapeDtypeStruct((Mp, Np), jnp.float32),
        grid=(Mp // tm,),
        in_specs=[
            pl.BlockSpec((tm, Kp), lambda i: (i, 0)),   # x streamed over M
            pl.BlockSpec((Kp, Np), lambda i: (0, 0)),   # w resident
            pl.BlockSpec((1, Np), lambda i: (0, 0)),    # b resident
        ],
        out_specs=pl.BlockSpec((tm, Np), lambda i: (i, 0)),
        compiler_params=pltpu.CompilerParams(
            dimension_semantics=("parallel",),
            vmem_limit_bytes=_VMEM_LIMIT,
        ),
    )(xp, wp, bp)
    return out[:M, :N]


# ----------------------------------------------------------------------------
# Kernel 2: conv2 matmul + bias  ->  'hint' (pre-relu)  and  relu + 2x2 maxpool
# fused in one pass.  One grid step per image (parallel across TCs).
# ----------------------------------------------------------------------------
def _conv2_hint_relu_pool_kernel(x_ref, w_ref, b_ref, hint_ref, pool_ref, *, ho, wo):
    c = w_ref.shape[-1]
    acc = jnp.dot(x_ref[...], w_ref[...], preferred_element_type=jnp.float32)
    acc = acc + b_ref[...]                                  # (ho*wo, c)
    hint_ref[...] = acc.astype(hint_ref.dtype)              # pre-relu 'hint'
    r = jnp.maximum(acc, 0.0)
    # 2x2 max-pool.  Channels stay in the minor (lane) dim; all reshapes only
    # split/merge leading dims, so they are layout no-ops.
    r = r.reshape(ho * (wo // 2), 2, c)
    r = jnp.maximum(r[:, 0, :], r[:, 1, :])                 # pool along W
    r = r.reshape(ho // 2, 2, wo // 2, c)
    r = jnp.maximum(r[:, 0, :, :], r[:, 1, :, :])           # pool along H
    pool_ref[...] = r.reshape((ho // 2) * (wo // 2), c).astype(pool_ref.dtype)


def conv2_hint_relu_pool(patches, wmat, bias, *, batch, ho, wo):
    M, K = patches.shape
    Kw, C = wmat.shape
    assert M == batch * ho * wo and K == Kw and bias.shape == (C,)
    Kp = _round_up(K, 128)
    pp = jnp.pad(patches, ((0, 0), (0, Kp - K)))
    wp = jnp.pad(wmat, ((0, Kp - K), (0, 0)))
    b2 = bias.reshape(1, C)
    n_pool = (ho // 2) * (wo // 2)

    hint, pool = pl.pallas_call(
        functools.partial(_conv2_hint_relu_pool_kernel, ho=ho, wo=wo),
        out_shape=(
            jax.ShapeDtypeStruct((batch * ho * wo, C), jnp.float32),
            jax.ShapeDtypeStruct((batch * n_pool, C), jnp.float32),
        ),
        grid=(batch,),
        in_specs=[
            pl.BlockSpec((ho * wo, Kp), lambda b: (b, 0)),  # one image's patches
            pl.BlockSpec((Kp, C), lambda b: (0, 0)),        # w resident
            pl.BlockSpec((1, C), lambda b: (0, 0)),         # b resident
        ],
        out_specs=(
            pl.BlockSpec((ho * wo, C), lambda b: (b, 0)),
            pl.BlockSpec((n_pool, C), lambda b: (b, 0)),
        ),
        compiler_params=pltpu.CompilerParams(
            dimension_semantics=("parallel",),
            vmem_limit_bytes=_VMEM_LIMIT,
        ),
    )(pp, wp, b2)
    return hint, pool


# ----------------------------------------------------------------------------
# Kernel 3: fused fc1(+relu) -> 'crd'  and  fc2 -> logits.
# fc1's K=9216 contraction is streamed over the grid (reduction axis,
# 'arbitrary') with an f32 accumulator; fc2's weight is resident.
# ----------------------------------------------------------------------------
def _fc1_fc2_kernel(x_ref, w1_ref, b1_ref, w2_ref, b2_ref, crd_ref, logit_ref, acc_ref):
    k = pl.program_id(0)

    @pl.when(k == 0)
    def _():
        acc_ref[...] = jnp.zeros_like(acc_ref)

    acc_ref[...] += jnp.dot(x_ref[...], w1_ref[...], preferred_element_type=jnp.float32)

    @pl.when(k == pl.num_programs(0) - 1)
    def _():
        h = jnp.maximum(acc_ref[...] + b1_ref[...], 0.0)        # fc1 + relu
        crd_ref[...] = h.astype(crd_ref.dtype)
        logit_ref[...] = (
            jnp.dot(h, w2_ref[...], preferred_element_type=jnp.float32) + b2_ref[...]
        ).astype(logit_ref.dtype)


def fc1_fc2(x, w1, b1, w2, b2, *, tk=512):
    B, K = x.shape
    Kw, H = w1.shape
    Hw, N = w2.shape
    assert K == Kw and H == Hw and b1.shape == (H,) and b2.shape == (N,)
    Bp = _round_up(max(B, 8), 8)
    Kp = _round_up(K, tk)
    Hp = _round_up(H, 128)
    Np = _round_up(N, 128)

    xp = jnp.pad(x, ((0, Bp - B), (0, Kp - K)))
    w1p = jnp.pad(w1, ((0, Kp - K), (0, Hp - H)))
    b1p = jnp.pad(b1, ((0, Hp - H),)).reshape(1, Hp)
    w2p = jnp.pad(w2, ((0, Hp - H), (0, Np - N)))
    b2p = jnp.pad(b2, ((0, Np - N),)).reshape(1, Np)

    crd, logits = pl.pallas_call(
        _fc1_fc2_kernel,
        out_shape=(jax.ShapeDtypeStruct((Bp, Hp), jnp.float32),
                   jax.ShapeDtypeStruct((Bp, Np), jnp.float32)),
        grid=(Kp // tk,),
        in_specs=[
            pl.BlockSpec((Bp, tk), lambda k: (0, k)),   # activations, K-streamed
            pl.BlockSpec((tk, Hp), lambda k: (k, 0)),   # fc1 weight, K-streamed
            pl.BlockSpec((1, Hp), lambda k: (0, 0)),    # fc1 bias resident
            pl.BlockSpec((Hp, Np), lambda k: (0, 0)),   # fc2 weight resident
            pl.BlockSpec((1, Np), lambda k: (0, 0)),    # fc2 bias resident
        ],
        out_specs=(pl.BlockSpec((Bp, Hp), lambda k: (0, 0)),
                   pl.BlockSpec((Bp, Np), lambda k: (0, 0))),
        scratch_shapes=[pltpu.VMEM((Bp, Hp), jnp.float32)],
        compiler_params=pltpu.CompilerParams(
            dimension_semantics=("arbitrary",),         # reduction axis
            vmem_limit_bytes=_VMEM_LIMIT,
        ),
    )(xp, w1p, b1p, w2p, b2p)
    return crd[:B, :H], logits[:B, :N]


# ----------------------------------------------------------------------------
# Glue: NHWC im2col, one-time weight repacking, forward pass.
# ----------------------------------------------------------------------------
def _im2col_nhwc(x, kh, kw):
    """x: (B, H, W, C) -> (B*Ho*Wo, kh*kw*C) with (kh, kw, C) feature order."""
    # TODO(synk): for very large batches (dbViz decision-boundary grids), replace
    # this XLA im2col with in-kernel halo loads + 9 shifted matmuls to cut HBM
    # traffic; at small batch the materialization is negligible.
    B, H, W, C = x.shape
    Ho, Wo = H - kh + 1, W - kw + 1
    cols = [x[:, i:i + Ho, j:j + Wo, :] for i in range(kh) for j in range(kw)]
    p = jnp.stack(cols, axis=3)                       # (B, Ho, Wo, kh*kw, C)
    return p.reshape(B * Ho * Wo, kh * kw * C), Ho, Wo


def prepare_params(params):
    """One-time repack of PyTorch-layout weights into kernel-friendly layouts."""
    conv1_w = params["conv1_w"]            # (32, 3, 3, 3)   OIHW
    conv2_w = params["conv2_w"]            # (64, 32, 3, 3)  OIHW
    fc1_w = params["fc1_w"]                # (128, 9216), columns in NCHW (c,h,w) order
    fc2_w = params["fc2_w"]                # (10, 128)
    co1, ci1, kh1, kw1 = conv1_w.shape
    co2, ci2, kh2, kw2 = conv2_w.shape
    return {
        "conv1_wmat": conv1_w.transpose(2, 3, 1, 0).reshape(kh1 * kw1 * ci1, co1),
        "conv1_b": params["conv1_b"],
        "conv2_wmat": conv2_w.transpose(2, 3, 1, 0).reshape(kh2 * kw2 * ci2, co2),
        "conv2_b": params["conv2_b"],
        # Permute fc1 columns from NCHW flatten (c, h, w) to our NHWC flatten (h, w, c).
        "fc1_wmat": fc1_w.reshape(fc1_w.shape[0], co2, 12, 12)
                         .transpose(2, 3, 1, 0).reshape(co2 * 12 * 12, fc1_w.shape[0]),
        "fc1_b": params["fc1_b"],
        "fc2_wmat": fc2_w.T,               # (128, 10)
        "fc2_b": params["fc2_b"],
    }


def net_forward(prep, x_nchw):
    """Matches dbViz Net.forward; input is NCHW like PyTorch."""
    out = {}
    B = x_nchw.shape[0]
    x = jnp.transpose(x_nchw, (0, 2, 3, 1))                  # NCHW -> NHWC, once

    # conv1 + relu
    p1, ho1, wo1 = _im2col_nhwc(x, 3, 3)
    c1 = prep["conv1_wmat"].shape[1]
    y1 = matmul_bias(p1, prep["conv1_wmat"], prep["conv1_b"], apply_relu=True)
    y1 = y1.reshape(B, ho1, wo1, c1)

    # conv2 (pre-relu 'hint') + relu + 2x2 max-pool, fused in one kernel
    p2, ho2, wo2 = _im2col_nhwc(y1, 3, 3)
    hint_flat, pool_flat = conv2_hint_relu_pool(
        p2, prep["conv2_wmat"], prep["conv2_b"], batch=B, ho=ho2, wo=wo2)
    c2 = prep["conv2_wmat"].shape[1]
    out["hint"] = hint_flat.reshape(B, ho2, wo2, c2).transpose(0, 3, 1, 2)  # NCHW, PyTorch parity

    # dropout1: identity (eval mode)
    # TODO(synk): training-mode dropout would need pltpu.prng_* and cannot match
    #             PyTorch's RNG stream; intentionally identity (model.eval()).
    xf = pool_flat.reshape(B, (ho2 // 2) * (wo2 // 2) * c2)  # NHWC flatten (h, w, c)

    # fc1 + relu (-> 'crd') and fc2 (-> logits), fused; dropout2 identity (eval)
    crd, logits = fc1_fc2(xf, prep["fc1_wmat"], prep["fc1_b"],
                          prep["fc2_wmat"], prep["fc2_b"])
    out["crd"] = crd
    out["logits"] = logits
    return out


# ----------------------------------------------------------------------------
# Pure-JAX reference (f32-exact) and parameter init.
# ----------------------------------------------------------------------------
def net_forward_reference(params, x):
    dn = ("NCHW", "OIHW", "NCHW")
    hi = lax.Precision.HIGHEST
    out = {}
    x = lax.conv_general_dilated(x, params["conv1_w"], (1, 1), "VALID",
                                 dimension_numbers=dn, precision=hi)
    x = jnp.maximum(x + params["conv1_b"].reshape(1, -1, 1, 1), 0.0)
    x = lax.conv_general_dilated(x, params["conv2_w"], (1, 1), "VALID",
                                 dimension_numbers=dn, precision=hi)
    x = x + params["conv2_b"].reshape(1, -1, 1, 1)
    out["hint"] = x
    x = jnp.maximum(x, 0.0)
    B, C, H, W = x.shape
    x = x.reshape(B, C, H // 2, 2, W // 2, 2).max(axis=(3, 5))
    x = x.reshape(B, -1)
    x = jnp.maximum(jnp.dot(x, params["fc1_w"].T, precision=hi) + params["fc1_b"], 0.0)
    out["crd"] = x
    out["logits"] = jnp.dot(x, params["fc2_w"].T, precision=hi) + params["fc2_b"]
    return out


def init_params(key):
    ks = jax.random.split(key, 8)

    def u(k, shape, fan_in):
        bound = 1.0 / jnp.sqrt(fan_in)
        return jax.random.uniform(k, shape, jnp.float32, -bound, bound)

    return {
        "conv1_w": u(ks[0], (32, 3, 3, 3), 3 * 3 * 3),
        "conv1_b": u(ks[1], (32,), 3 * 3 * 3),
        "conv2_w": u(ks[2], (64, 32, 3, 3), 32 * 3 * 3),
        "conv2_b": u(ks[3], (64,), 32 * 3 * 3),
        "fc1_w": u(ks[4], (128, 9216), 9216),
        "fc1_b": u(ks[5], (128,), 9216),
        "fc2_w": u(ks[6], (10, 128), 128),
        "fc2_b": u(ks[7], (10,), 128),
    }


if __name__ == "__main__":
    key = jax.random.PRNGKey(0)
    pkey, xkey = jax.random.split(key)
    params = init_params(pkey)
    prep = prepare_params(params)        # one-time weight repack (NOT per forward)

    # fc1 expects 9216 = 64 * 12 * 12 features => input spatial size fixed at 28x28.
    x = jax.random.normal(xkey, (2, 3, 28, 28), dtype=jnp.float32)

    fwd = jax.jit(net_forward)
    out = fwd(prep, x)
    jax.block_until_ready(out)

    assert out["hint"].shape == (2, 64, 24, 24)
    assert out["crd"].shape == (2, 128)
    assert out["logits"].shape == (2, 10)

    ref = jax.jit(net_forward_reference)(params, x)
    for name in ("hint", "crd", "logits"):
        assert jnp.allclose(out[name], ref[name], rtol=1e-3, atol=1e-3), f"mismatch in {name}"

    print("KERNEL_OK")
</pallas_src>

<mosaic_0001>
module attributes {stable_mosaic.version = 11 : i64} {
  func.func @_mm_bias_kernel(%arg0: i32, %arg1: memref<256x128xf32, #tpu.memory_space<vmem>>, %arg2: memref<128x128xf32, #tpu.memory_space<vmem>>, %arg3: memref<1x128xf32, #tpu.memory_space<vmem>>, %arg4: memref<256x128xf32, #tpu.memory_space<vmem>>) attributes {dimension_semantics = [#tpu.dimension_semantics<parallel>], iteration_bounds = array<i64: 6>, scalar_prefetch = 0 : i64, scratch_operands = 0 : i64, tpu.core_type = #tpu.core_type<tc>, window_params = [{transform_indices = @transform_0, window_bounds = array<i64: 256, 128>}, {pipeline_mode = #tpu.pipeline_mode<synchronous>, transform_indices = @transform_1, window_bounds = array<i64: 128, 128>}, {pipeline_mode = #tpu.pipeline_mode<synchronous>, transform_indices = @transform_2, window_bounds = array<i64: 1, 128>}, {transform_indices = @transform_3, window_bounds = array<i64: 256, 128>}]} {
    %c0 = arith.constant 0 : index
    %c0_0 = arith.constant 0 : index
    %0 = vector.load %arg1[%c0, %c0_0] : memref<256x128xf32, #tpu.memory_space<vmem>>, vector<256x128xf32>
    %c0_1 = arith.constant 0 : index
    %c0_2 = arith.constant 0 : index
    %1 = vector.load %arg2[%c0_1, %c0_2] : memref<128x128xf32, #tpu.memory_space<vmem>>, vector<128x128xf32>
    %cst = arith.constant dense<0.000000e+00> : vector<256x128xf32>
    %2 = tpu.matmul %0, %1, %cst {dimension_numbers = #tpu.dot_dimension_numbers<[1], [0], [0], [1], [0, 0, 1, 1], [], []>} : vector<256x128xf32>, vector<128x128xf32>, vector<256x128xf32> -> vector<256x128xf32>
    %c0_3 = arith.constant 0 : index
    %c0_4 = arith.constant 0 : index
    %3 = vector.load %arg3[%c0_3, %c0_4] : memref<1x128xf32, #tpu.memory_space<vmem>>, vector<1x128xf32>
    %4 = vector.broadcast %3 : vector<1x128xf32> to vector<256x128xf32>
    %5 = arith.addf %2, %4 : vector<256x128xf32>
    %cst_5 = arith.constant 0.000000e+00 : f32
    %6 = vector.broadcast %cst_5 : f32 to vector<256x128xf32>
    %7 = arith.maximumf %5, %6 : vector<256x128xf32>
    %c0_6 = arith.constant 0 : index
    %c0_7 = arith.constant 0 : index
    %8 = vector.load %arg4[%c0_6, %c0_7] : memref<256x128xf32, #tpu.memory_space<vmem>>, vector<256x128xf32>
    tpu.vector_store %arg4[%c0_6, %c0_7], %7 {strides = array<i32>} : memref<256x128xf32, #tpu.memory_space<vmem>>, vector<256x128xf32>,
    return
  }
  func.func @transform_0(%arg0: i32) -> (i32, i32) {
    %c0_i32 = arith.constant 0 : i32
    %c0_i32_0 = arith.constant 0 : i32
    return %arg0, %c0_i32 : i32, i32
  }
  func.func @transform_1(%arg0: i32) -> (i32, i32) {
    %c0_i32 = arith.constant 0 : i32
    %c0_i32_0 = arith.constant 0 : i32
    %c0_i32_1 = arith.constant 0 : i32
    return %c0_i32, %c0_i32_0 : i32, i32
  }
  func.func @transform_2(%arg0: i32) -> (i32, i32) {
    %c0_i32 = arith.constant 0 : i32
    %c0_i32_0 = arith.constant 0 : i32
    %c0_i32_1 = arith.constant 0 : i32
    return %c0_i32, %c0_i32_0 : i32, i32
  }
  func.func @transform_3(%arg0: i32) -> (i32, i32) {
    %c0_i32 = arith.constant 0 : i32
    %c0_i32_0 = arith.constant 0 : i32
    return %arg0, %c0_i32 : i32, i32
  }
}

module attributes {stable_mosaic.version = 11 : i64} {
  func.func @_conv2_hint_relu_pool_kernel(%arg0: i32, %arg1: memref<576x384xf32, #tpu.memory_space<vmem>>, %arg2: memref<384x64xf32, #tpu.memory_space<vmem>>, %arg3: memref<1x64xf32, #tpu.memory_space<vmem>>, %arg4: memref<576x64xf32, #tpu.memory_space<vmem>>, %arg5: memref<144x64xf32, #tpu.memory_space<vmem>>) attributes {dimension_semantics = [#tpu.dimension_semantics<parallel>], iteration_bounds = array<i64: 2>, scalar_prefetch = 0 : i64, scratch_operands = 0 : i64, tpu.core_type = #tpu.core_type<tc>, window_params = [{transform_indices = @transform_0, window_bounds = array<i64: 576, 384>}, {pipeline_mode = #tpu.pipeline_mode<synchronous>, transform_indices = @transform_1, window_bounds = array<i64: 384, 64>}, {pipeline_mode = #tpu.pipeline_mode<synchronous>, transform_indices = @transform_2, window_bounds = array<i64: 1, 64>}, {transform_indices = @transform_3, window_bounds = array<i64: 576, 64>}, {transform_indices = @transform_4, window_bounds = array<i64: 144, 64>}]} {
    %c0 = arith.constant 0 : index
    %c0_0 = arith.constant 0 : index
    %0 = vector.load %arg1[%c0, %c0_0] : memref<576x384xf32, #tpu.memory_space<vmem>>, vector<576x384xf32>
    %c0_1 = arith.constant 0 : index
    %c0_2 = arith.constant 0 : index
    %1 = vector.load %arg2[%c0_1, %c0_2] : memref<384x64xf32, #tpu.memory_space<vmem>>, vector<384x64xf32>
    %cst = arith.constant dense<0.000000e+00> : vector<576x64xf32>
    %2 = tpu.matmul %0, %1, %cst {dimension_numbers = #tpu.dot_dimension_numbers<[1], [0], [0], [1], [0, 0, 1, 1], [], []>} : vector<576x384xf32>, vector<384x64xf32>, vector<576x64xf32> -> vector<576x64xf32>
    %c0_3 = arith.constant 0 : index
    %c0_4 = arith.constant 0 : index
    %3 = vector.load %arg3[%c0_3, %c0_4] : memref<1x64xf32, #tpu.memory_space<vmem>>, vector<1x64xf32>
    %4 = vector.broadcast %3 : vector<1x64xf32> to vector<576x64xf32>
    %5 = arith.addf %2, %4 : vector<576x64xf32>
    %c0_5 = arith.constant 0 : index
    %c0_6 = arith.constant 0 : index
    %6 = vector.load %arg4[%c0_5, %c0_6] : memref<576x64xf32, #tpu.memory_space<vmem>>, vector<576x64xf32>
    tpu.vector_store %arg4[%c0_5, %c0_6], %5 {strides = array<i32>} : memref<576x64xf32, #tpu.memory_space<vmem>>, vector<576x64xf32>,
    %cst_7 = arith.constant 0.000000e+00 : f32
    %7 = vector.broadcast %cst_7 : f32 to vector<576x64xf32>
    %8 = arith.maximumf %5, %7 : vector<576x64xf32>
    %9 = vector.shape_cast %8 : vector<576x64xf32> to vector<288x2x64xf32>
    %10 = vector.extract_strided_slice %9 {offsets = [0, 0, 0], sizes = [288, 1, 64], strides = [1, 1, 1]} : vector<288x2x64xf32> to vector<288x1x64xf32>
    %11 = vector.shape_cast %10 : vector<288x1x64xf32> to vector<288x64xf32>
    %12 = vector.extract_strided_slice %9 {offsets = [0, 1, 0], sizes = [288, 1, 64], strides = [1, 1, 1]} : vector<288x2x64xf32> to vector<288x1x64xf32>
    %13 = vector.shape_cast %12 : vector<288x1x64xf32> to vector<288x64xf32>
    %14 = arith.maximumf %11, %13 : vector<288x64xf32>
    %15 = vector.shape_cast %14 : vector<288x64xf32> to vector<12x2x12x64xf32>
    %16 = vector.extract_strided_slice %15 {offsets = [0, 0, 0, 0], sizes = [12, 1, 12, 64], strides = [1, 1, 1, 1]} : vector<12x2x12x64xf32> to vector<12x1x12x64xf32>
    %17 = vector.shape_cast %16 : vector<12x1x12x64xf32> to vector<12x12x64xf32>
    %18 = vector.extract_strided_slice %15 {offsets = [0, 1, 0, 0], sizes = [12, 1, 12, 64], strides = [1, 1, 1, 1]} : vector<12x2x12x64xf32> to vector<12x1x12x64xf32>
    %19 = vector.shape_cast %18 : vector<12x1x12x64xf32> to vector<12x12x64xf32>
    %20 = arith.maximumf %17, %19 : vector<12x12x64xf32>
    %21 = vector.shape_cast %20 : vector<12x12x64xf32> to vector<144x64xf32>
    %c0_8 = arith.constant 0 : index
    %c0_9 = arith.constant 0 : index
    %22 = vector.load %arg5[%c0_8, %c0_9] : memref<144x64xf32, #tpu.memory_space<vmem>>, vector<144x64xf32>
    tpu.vector_store %arg5[%c0_8, %c0_9], %21 {strides = array<i32>} : memref<144x64xf32, #tpu.memory_space<vmem>>, vector<144x64xf32>,
    return
  }
  func.func @transform_0(%arg0: i32) -> (i32, i32) {
    %c0_i32 = arith.constant 0 : i32
    %c0_i32_0 = arith.constant 0 : i32
    return %arg0, %c0_i32 : i32, i32
  }
  func.func @transform_1(%arg0: i32) -> (i32, i32) {
    %c0_i32 = arith.constant 0 : i32
    %c0_i32_0 = arith.constant 0 : i32
    %c0_i32_1 = arith.constant 0 : i32
    return %c0_i32, %c0_i32_0 : i32, i32
  }
  func.func @transform_2(%arg0: i32) -> (i32, i32) {
    %c0_i32 = arith.constant 0 : i32
    %c0_i32_0 = arith.constant 0 : i32
    %c0_i32_1 = arith.constant 0 : i32
    return %c0_i32, %c0_i32_0 : i32, i32
  }
  func.func @transform_3(%arg0: i32) -> (i32, i32) {
    %c0_i32 = arith.constant 0 : i32
    %c0_i32_0 = arith.constant 0 : i32
    return %arg0, %c0_i32 : i32, i32
  }
  func.func @transform_4(%arg0: i32) -> (i32, i32) {
    %c0_i32 = arith.constant 0 : i32
    %c0_i32_0 = arith.constant 0 : i32
    return %arg0, %c0_i32 : i32, i32
  }
}

module attributes {stable_mosaic.version = 11 : i64} {
  func.func @_fc1_fc2_kernel(%arg0: i32, %arg1: memref<8x512xf32, #tpu.memory_space<vmem>>, %arg2: memref<512x128xf32, #tpu.memory_space<vmem>>, %arg3: memref<1x128xf32, #tpu.memory_space<vmem>>, %arg4: memref<128x128xf32, #tpu.memory_space<vmem>>, %arg5: memref<1x128xf32, #tpu.memory_space<vmem>>, %arg6: memref<8x128xf32, #tpu.memory_space<vmem>>, %arg7: memref<8x128xf32, #tpu.memory_space<vmem>>, %arg8: memref<8x128xf32, #tpu.memory_space<vmem>>) attributes {dimension_semantics = [#tpu.dimension_semantics<arbitrary>], iteration_bounds = array<i64: 18>, scalar_prefetch = 0 : i64, scratch_operands = 1 : i64, tpu.core_type = #tpu.core_type<tc>, window_params = [{transform_indices = @transform_0, window_bounds = array<i64: 8, 512>}, {transform_indices = @transform_1, window_bounds = array<i64: 512, 128>}, {pipeline_mode = #tpu.pipeline_mode<synchronous>, transform_indices = @transform_2, window_bounds = array<i64: 1, 128>}, {pipeline_mode = #tpu.pipeline_mode<synchronous>, transform_indices = @transform_3, window_bounds = array<i64: 128, 128>}, {pipeline_mode = #tpu.pipeline_mode<synchronous>, transform_indices = @transform_4, window_bounds = array<i64: 1, 128>}, {pipeline_mode = #tpu.pipeline_mode<synchronous>, transform_indices = @transform_5, window_bounds = array<i64: 8, 128>}, {pipeline_mode = #tpu.pipeline_mode<synchronous>, transform_indices = @transform_6, window_bounds = array<i64: 8, 128>}]} {
    %c0_i32 = arith.constant 0 : i32
    %0 = arith.cmpi eq, %arg0, %c0_i32 : i32
    %1 = arith.extui %0 : i1 to i32
    %c0_i32_0 = arith.constant 0 : i32
    %2 = arith.cmpi ne, %1, %c0_i32_0 : i32
    scf.if %2 {
      %cst_9 = arith.constant 0.000000e+00 : f32
      %12 = vector.broadcast %cst_9 : f32 to vector<8x128xf32>
      %c0_10 = arith.constant 0 : index
      %c0_11 = arith.constant 0 : index
      %13 = vector.load %arg8[%c0_10, %c0_11] : memref<8x128xf32, #tpu.memory_space<vmem>>, vector<8x128xf32>
      tpu.vector_store %arg8[%c0_10, %c0_11], %12 {strides = array<i32>} : memref<8x128xf32, #tpu.memory_space<vmem>>, vector<8x128xf32>,
    } else {
    }
    %c0 = arith.constant 0 : index
    %c0_1 = arith.constant 0 : index
    %3 = vector.load %arg8[%c0, %c0_1] : memref<8x128xf32, #tpu.memory_space<vmem>>, vector<8x128xf32>
    %c0_2 = arith.constant 0 : index
    %c0_3 = arith.constant 0 : index
    %4 = vector.load %arg1[%c0_2, %c0_3] : memref<8x512xf32, #tpu.memory_space<vmem>>, vector<8x512xf32>
    %c0_4 = arith.constant 0 : index
    %c0_5 = arith.constant 0 : index
    %5 = vector.load %arg2[%c0_4, %c0_5] : memref<512x128xf32, #tpu.memory_space<vmem>>, vector<512x128xf32>
    %cst = arith.constant dense<0.000000e+00> : vector<8x128xf32>
    %6 = tpu.matmul %4, %5, %cst {dimension_numbers = #tpu.dot_dimension_numbers<[1], [0], [0], [1], [0, 0, 1, 1], [], []>} : vector<8x512xf32>, vector<512x128xf32>, vector<8x128xf32> -> vector<8x128xf32>
    %7 = arith.addf %3, %6 : vector<8x128xf32>
    %c0_6 = arith.constant 0 : index
    %c0_7 = arith.constant 0 : index
    %8 = vector.load %arg8[%c0_6, %c0_7] : memref<8x128xf32, #tpu.memory_space<vmem>>, vector<8x128xf32>
    tpu.vector_store %arg8[%c0_6, %c0_7], %7 {strides = array<i32>} : memref<8x128xf32, #tpu.memory_space<vmem>>, vector<8x128xf32>,
    %c17_i32 = arith.constant 17 : i32
    %9 = arith.cmpi eq, %arg0, %c17_i32 : i32
    %10 = arith.extui %9 : i1 to i32
    %c0_i32_8 = arith.constant 0 : i32
    %11 = arith.cmpi ne, %10, %c0_i32_8 : i32
    scf.if %11 {
      %c0_9 = arith.constant 0 : index
      %c0_10 = arith.constant 0 : index
      %12 = vector.load %arg8[%c0_9, %c0_10] : memref<8x128xf32, #tpu.memory_space<vmem>>, vector<8x128xf32>
      %c0_11 = arith.constant 0 : index
      %c0_12 = arith.constant 0 : index
      %13 = vector.load %arg3[%c0_11, %c0_12] : memref<1x128xf32, #tpu.memory_space<vmem>>, vector<1x128xf32>
      %14 = vector.broadcast %13 : vector<1x128xf32> to vector<8x128xf32>
      %15 = arith.addf %12, %14 : vector<8x128xf32>
      %cst_13 = arith.constant 0.000000e+00 : f32
      %16 = vector.broadcast %cst_13 : f32 to vector<8x128xf32>
      %17 = arith.maximumf %15, %16 : vector<8x128xf32>
      %c0_14 = arith.constant 0 : index
      %c0_15 = arith.constant 0 : index
      %18 = vector.load %arg6[%c0_14, %c0_15] : memref<8x128xf32, #tpu.memory_space<vmem>>, vector<8x128xf32>
      tpu.vector_store %arg6[%c0_14, %c0_15], %17 {strides = array<i32>} : memref<8x128xf32, #tpu.memory_space<vmem>>, vector<8x128xf32>,
      %c0_16 = arith.constant 0 : index
      %c0_17 = arith.constant 0 : index
      %19 = vector.load %arg4[%c0_16, %c0_17] : memref<128x128xf32, #tpu.memory_space<vmem>>, vector<128x128xf32>
      %cst_18 = arith.constant dense<0.000000e+00> : vector<8x128xf32>
      %20 = tpu.matmul %17, %19, %cst_18 {dimension_numbers = #tpu.dot_dimension_numbers<[1], [0], [0], [1], [0, 0, 1, 1], [], []>} : vector<8x128xf32>, vector<128x128xf32>, vector<8x128xf32> -> vector<8x128xf32>
      %c0_19 = arith.constant 0 : index
      %c0_20 = arith.constant 0 : index
      %21 = vector.load %arg5[%c0_19, %c0_20] : memref<1x128xf32, #tpu.memory_space<vmem>>, vector<1x128xf32>
      %22 = vector.broadcast %21 : vector<1x128xf32> to vector<8x128xf32>
      %23 = arith.addf %20, %22 : vector<8x128xf32>
      %c0_21 = arith.constant 0 : index
      %c0_22 = arith.constant 0 : index
      %24 = vector.load %arg7[%c0_21, %c0_22] : memref<8x128xf32, #tpu.memory_space<vmem>>, vector<8x128xf32>
      tpu.vector_store %arg7[%c0_21, %c0_22], %23 {strides = array<i32>} : memref<8x128xf32, #tpu.memory_space<vmem>>, vector<8x128xf32>,
    } else {
    }
    return
  }
  func.func @transform_0(%arg0: i32) -> (i32, i32) {
    %c0_i32 = arith.constant 0 : i32
    %c0_i32_0 = arith.constant 0 : i32
    return %c0_i32, %arg0 : i32, i32
  }
  func.func @transform_1(%arg0: i32) -> (i32, i32) {
    %c0_i32 = arith.constant 0 : i32
    %c0_i32_0 = arith.constant 0 : i32
    return %arg0, %c0_i32 : i32, i32
  }
  func.func @transform_2(%arg0: i32) -> (i32, i32) {
    %c0_i32 = arith.constant 0 : i32
    %c0_i32_0 = arith.constant 0 : i32
    %c0_i32_1 = arith.constant 0 : i32
    return %c0_i32, %c0_i32_0 : i32, i32
  }
  func.func @transform_3(%arg0: i32) -> (i32, i32) {
    %c0_i32 = arith.constant 0 : i32
    %c0_i32_0 = arith.constant 0 : i32
    %c0_i32_1 = arith.constant 0 : i32
    return %c0_i32, %c0_i32_0 : i32, i32
  }
  func.func @transform_4(%arg0: i32) -> (i32, i32) {
    %c0_i32 = arith.constant 0 : i32
    %c0_i32_0 = arith.constant 0 : i32
    %c0_i32_1 = arith.constant 0 : i32
    return %c0_i32, %c0_i32_0 : i32, i32
  }
  func.func @transform_5(%arg0: i32) -> (i32, i32) {
    %c0_i32 = arith.constant 0 : i32
    %c0_i32_0 = arith.constant 0 : i32
    %c0_i32_1 = arith.constant 0 : i32
    return %c0_i32, %c0_i32_0 : i32, i32
  }
  func.func @transform_6(%arg0: i32) -> (i32, i32) {
    %c0_i32 = arith.constant 0 : i32
    %c0_i32_0 = arith.constant 0 : i32
    %c0_i32_1 = arith.constant 0 : i32
    return %c0_i32, %c0_i32_0 : i32, i32
  }
}

</mosaic_0001>

<bundles_post_ra>
// kernel: net_forward.3
= control target key start
LH: loop header
LB: loop body
LE: loop exit
PB: predicated region body
PF: predicated region fallthrough
CT: control target
= control target key end

     0   :  { %s555_s12 = smov 0   ;;  %s734_s0 = inlined_call_operand.vmem [shape: f32[1536,128], index: 0, kind: input, shape index: {}]   ;;  %s735_s1 = inlined_call_operand.vmem [shape: f32[128,128], index: 1, kind: input, shape index: {}]   ;;  %s736_s2 = inlined_call_operand.vmem [shape: f32[1,128], index: 2, kind: input, shape index: {}]   ;;  %s737_s3 = inlined_call_operand.vmem [shape: f32[1536,128], index: 3, kind: output, shape index: {}]  }
   0x1 LB: > { %s459_s13 = sadd.s32 4294967295, %s533_s12   ;;  %p463_p0 = scmp.ge.s32.totalorder %s533_s12, 1  ;;  %s533_s12 = sphi %s555_s12, %s13_s12  }
   0x2   : > { %p138_p1 = scmp.lt.s32.totalorder %s533_s12, 7 }
   0x4   : > { %p139_p2 = pnand %p463_p0, %p138_p1 }
   0x5   : > { %s464_s30 = sshll.u32 (!%p139_p2), %s459_s13, 5 }
   0x6   : > { %142 = sbr.rel (%p139_p2) target bundleno = 237 (0xed), region = 32  ;;  %p163_p3 = scmp.lt.s32.totalorder (!%p139_p2), %s464_s30, 191 }
   0xb   : > { %v221_v0 = vld [vmem:[%s735_s1 + $0x78] sm:$0xff]  ;;  %v220_v1 = vld [vmem:[%s735_s1 + $0x70] sm:$0xff]  ;;  %v219_v2 = vld [vmem:[%s735_s1 + $0x68] sm:$0xff]  ;;  %s739_s30 = smov (!%p163_p3, %s464_s30), 191 }
   0xc   : > { %471 = vmatpush.msra.mxu2 %v221_v0  ;;  %472 = vmatpush.msra.mxu3 %v221_v0  ;;  %v218_v3 = vld [vmem:[%s735_s1 + $0x60] sm:$0xff]  ;;  %v217_v4 = vld [vmem:[%s735_s1 + $0x58] sm:$0xff]  ;;  %v216_v5 = vld [vmem:[%s735_s1 + $0x50] sm:$0xff]  ;;  %s465_s15 = sshll.u32 %s739_s30, 3 }
   0xd   : > { %226 = vmatpush.msra.mxu0 %v221_v0  ;;  %470 = vmatpush.msra.mxu1 %v221_v0  ;;  %v215_v6 = vld [vmem:[%s735_s1 + $0x48] sm:$0xff]  ;;  %v214_v7 = vld [vmem:[%s735_s1 + $0x40] sm:$0xff]  ;;  %v213_v8 = vld [vmem:[%s735_s1 + $0x38] sm:$0xff]  ;;  %s618_s22 = scalar_lea.vmem %s734_s0, %s465_s15  ;;  %s667_s29 = scalar_lea.vmem %s737_s3, %s465_s15 }
   0xe   : > { %474 = vmatpush.msra.mxu2 %v220_v1  ;;  %475 = vmatpush.msra.mxu3 %v220_v1  ;;  %v212_v9 = vld [vmem:[%s735_s1 + $0x30] sm:$0xff]  ;;  %v211_v10 = vld [vmem:[%s735_s1 + $0x28] sm:$0xff]  ;;  %v210_v11 = vld [vmem:[%s735_s1 + $0x20] sm:$0xff] }
   0xf   : > { %227 = vmatpush.msra.mxu0 %v220_v1  ;;  %473 = vmatpush.msra.mxu1 %v220_v1  ;;  %v209_v12 = vld [vmem:[%s735_s1 + $0x18] sm:$0xff]  ;;  %v208_v13 = vld [vmem:[%s735_s1 + $0x10] sm:$0xff]  ;;  %v207_v14 = vld [vmem:[%s735_s1 + $0x8] sm:$0xff] }
  0x10   : > { %477 = vmatpush.msra.mxu2 %v219_v2  ;;  %478 = vmatpush.msra.mxu3 %v219_v2  ;;  %v206_v15 = vld [vmem:[%s735_s1] sm:$0xff]  ;;  %v191_v20 = vld [vmem:[%s618_s22 + $0x88] sm:$0xff]  ;;  %v192_v24 = vld [vmem:[%s618_s22 + $0x90] sm:$0xff] }
  0x11   : > { %228 = vmatpush.msra.mxu0 %v219_v2  ;;  %476 = vmatpush.msra.mxu1 %v219_v2  ;;  %v190_v16 = vld [vmem:[%s618_s22 + $0x80] sm:$0xff]  ;;  %v199_v21 = vld [vmem:[%s618_s22 + $0xc8] sm:$0xff]  ;;  %v200_v25 = vld [vmem:[%s618_s22 + $0xd0] sm:$0xff] }
  0x12   : > { %480 = vmatpush.msra.mxu2 %v218_v3  ;;  %481 = vmatpush.msra.mxu3 %v218_v3  ;;  %v198_v17 = vld [vmem:[%s618_s22 + $0xc0] sm:$0xff]  ;;  %v175_v22 = vld [vmem:[%s618_s22 + $0x8] sm:$0xff]  ;;  %v176_v26 = vld [vmem:[%s618_s22 + $0x10] sm:$0xff] }
  0x13   : > { %229 = vmatpush.msra.mxu0 %v218_v3  ;;  %479 = vmatpush.msra.mxu1 %v218_v3  ;;  %v174_v18 = vld [vmem:[%s618_s22] sm:$0xff]  ;;  %v183_v23 = vld [vmem:[%s618_s22 + $0x48] sm:$0xff]  ;;  %v184_v27 = vld [vmem:[%s618_s22 + $0x50] sm:$0xff] }
  0x14   : > { %483 = vmatpush.msra.mxu2 %v217_v4  ;;  %484 = vmatpush.msra.mxu3 %v217_v4  ;;  %v182_v19 = vld [vmem:[%s618_s22 + $0x40] sm:$0xff]  ;;  %v193_v28 = vld [vmem:[%s618_s22 + $0x98] sm:$0xff]  ;;  %v195_v36 = vld [vmem:[%s618_s22 + $0xa8] sm:$0xff] }
  0x15   : > { %230 = vmatpush.msra.mxu0 %v217_v4  ;;  %482 = vmatpush.msra.mxu1 %v217_v4  ;;  %v201_v29 = vld [vmem:[%s618_s22 + $0xd8] sm:$0xff]  ;;  %v194_v32 = vld [vmem:[%s618_s22 + $0xa0] sm:$0xff]  ;;  %v203_v37 = vld [vmem:[%s618_s22 + $0xe8] sm:$0xff] }
  0x16   : > { %486 = vmatpush.msra.mxu2 %v216_v5  ;;  %487 = vmatpush.msra.mxu3 %v216_v5  ;;  %v177_v30 = vld [vmem:[%s618_s22 + $0x18] sm:$0xff]  ;;  %v202_v33 = vld [vmem:[%s618_s22 + $0xe0] sm:$0xff]  ;;  %v179_v38 = vld [vmem:[%s618_s22 + $0x28] sm:$0xff] }
  0x17   : > { %231 = vmatpush.msra.mxu0 %v216_v5  ;;  %485 = vmatpush.msra.mxu1 %v216_v5  ;;  %v185_v31 = vld [vmem:[%s618_s22 + $0x58] sm:$0xff]  ;;  %v178_v34 = vld [vmem:[%s618_s22 + $0x20] sm:$0xff]  ;;  %v187_v39 = vld [vmem:[%s618_s22 + $0x68] sm:$0xff] }
  0x18   : > { %489 = vmatpush.msra.mxu2 %v215_v6  ;;  %490 = vmatpush.msra.mxu3 %v215_v6  ;;  %v186_v35 = vld [vmem:[%s618_s22 + $0x60] sm:$0xff]  ;;  %v196_v40 = vld [vmem:[%s618_s22 + $0xb0] sm:$0xff]  ;;  %v197_v44 = vld [vmem:[%s618_s22 + $0xb8] sm:$0xff] }
  0x19   : > { %232 = vmatpush.msra.mxu0 %v215_v6  ;;  %488 = vmatpush.msra.mxu1 %v215_v6  ;;  %v204_v41 = vld [vmem:[%s618_s22 + $0xf0] sm:$0xff]  ;;  %v205_v45 = vld [vmem:[%s618_s22 + $0xf8] sm:$0xff]  ;;  %v658_v48 = vld [vmem:[%s736_s2] ss:$0 sm:$0xff] }
  0x1a   : > { %492 = vmatpush.msra.mxu2 %v214_v7  ;;  %493 = vmatpush.msra.mxu3 %v214_v7  ;;  %v180_v42 = vld [vmem:[%s618_s22 + $0x30] sm:$0xff]  ;;  %v181_v46 = vld [vmem:[%s618_s22 + $0x38] sm:$0xff] }
  0x1b   : > { %233 = vmatpush.msra.mxu0 %v214_v7  ;;  %491 = vmatpush.msra.mxu1 %v214_v7  ;;  %v188_v43 = vld [vmem:[%s618_s22 + $0x70] sm:$0xff]  ;;  %v189_v47 = vld [vmem:[%s618_s22 + $0x78] sm:$0xff] }
  0x1c   : > { %495 = vmatpush.msra.mxu2 %v213_v8  ;;  %496 = vmatpush.msra.mxu3 %v213_v8 }
  0x1d   : > { %234 = vmatpush.msra.mxu0 %v213_v8  ;;  %494 = vmatpush.msra.mxu1 %v213_v8 }
  0x1e   : > { %498 = vmatpush.msra.mxu2 %v212_v9  ;;  %499 = vmatpush.msra.mxu3 %v212_v9 }
  0x1f   : > { %235 = vmatpush.msra.mxu0 %v212_v9  ;;  %497 = vmatpush.msra.mxu1 %v212_v9 }
  0x20   : > { %501 = vmatpush.msra.mxu2 %v211_v10  ;;  %502 = vmatpush.msra.mxu3 %v211_v10 }
  0x21   : > { %236 = vmatpush.msra.mxu0 %v211_v10  ;;  %500 = vmatpush.msra.mxu1 %v211_v10 }
  0x22   : > { %504 = vmatpush.msra.mxu2 %v210_v11  ;;  %505 = vmatpush.msra.mxu3 %v210_v11 }
  0x23   : > { %237 = vmatpush.msra.mxu0 %v210_v11  ;;  %503 = vmatpush.msra.mxu1 %v210_v11 }
  0x24   : > { %507 = vmatpush.msra.mxu2 %v209_v12  ;;  %508 = vmatpush.msra.mxu3 %v209_v12 }
  0x25   : > { %238 = vmatpush.msra.mxu0 %v209_v12  ;;  %506 = vmatpush.msra.mxu1 %v209_v12 }
  0x26   : > { %510 = vmatpush.msra.mxu2 %v208_v13  ;;  %511 = vmatpush.msra.mxu3 %v208_v13 }
  0x27   : > { %239 = vmatpush.msra.mxu0 %v208_v13  ;;  %509 = vmatpush.msra.mxu1 %v208_v13 }
  0x28   : > { %513 = vmatpush.msra.mxu2 %v207_v14  ;;  %514 = vmatpush.msra.mxu3 %v207_v14 }
  0x29   : > { %240 = vmatpush.msra.mxu0 %v207_v14  ;;  %512 = vmatpush.msra.mxu1 %v207_v14 }
  0x2a   : > { %516 = vmatpush.msra.mxu2 %v206_v15  ;;  %517 = vmatpush.msra.mxu3 %v206_v15 }
  0x2b   : > { %290 = vmatmul.f32.vlgmr.msra.gmra.mxu2 %v190_v16  ;;  %314 = vmatmul.f32.vlgmr.msra.gmra.mxu3 %v198_v17 }
  0x2c   : > { %241 = vmatpush.msra.mxu0 %v206_v15  ;;  %515 = vmatpush.msra.mxu1 %v206_v15 }
  0x2d   : > { %242 = vmatmul.f32.vlgmr.msra.gmra.mxu0 %v174_v18  ;;  %266 = vmatmul.f32.vlgmr.msra.gmra.mxu1 %v182_v19 }
  0x33   : > { %293 = vmatmul.f32.gmra.mxu2 %v191_v20  ;;  %317 = vmatmul.f32.gmra.mxu3 %v199_v21 }
  0x35   : > { %245 = vmatmul.f32.gmra.mxu0 %v175_v22  ;;  %269 = vmatmul.f32.gmra.mxu1 %v183_v23 }
  0x3b   : > { %296 = vmatmul.f32.gmra.mxu2 %v192_v24  ;;  %320 = vmatmul.f32.gmra.mxu3 %v200_v25 }
  0x3d   : > { %248 = vmatmul.f32.gmra.mxu0 %v176_v26  ;;  %272 = vmatmul.f32.gmra.mxu1 %v184_v27 }
  0x43   : > { %299 = vmatmul.f32.gmra.mxu2 %v193_v28  ;;  %323 = vmatmul.f32.gmra.mxu3 %v201_v29 }
  0x45   : > { %251 = vmatmul.f32.gmra.mxu0 %v177_v30  ;;  %275 = vmatmul.f32.gmra.mxu1 %v185_v31 }
  0x4b   : > { %302 = vmatmul.f32.gmra.mxu2 %v194_v32  ;;  %326 = vmatmul.f32.gmra.mxu3 %v202_v33 }
  0x4d   : > { %254 = vmatmul.f32.gmra.mxu0 %v178_v34  ;;  %278 = vmatmul.f32.gmra.mxu1 %v186_v35 }
  0x53   : > { %305 = vmatmul.f32.gmra.mxu2 %v195_v36  ;;  %329 = vmatmul.f32.gmra.mxu3 %v203_v37 }
  0x55   : > { %257 = vmatmul.f32.gmra.mxu0 %v179_v38  ;;  %281 = vmatmul.f32.gmra.mxu1 %v187_v39 }
  0x5b   : > { %308 = vmatmul.f32.gmra.mxu2 %v196_v40  ;;  %332 = vmatmul.f32.gmra.mxu3 %v204_v41 }
  0x5d   : > { %260 = vmatmul.f32.gmra.mxu0 %v180_v42  ;;  %284 = vmatmul.f32.gmra.mxu1 %v188_v43 }
  0x63   : > { %311 = vmatmul.f32.gmra.mxu2 %v197_v44  ;;  %335 = vmatmul.f32.gmra.mxu3 %v205_v45 }
  0x65   : > { %263 = vmatmul.f32.gmra.mxu0 %v181_v46  ;;  %287 = vmatmul.f32.gmra.mxu1 %v189_v47 }
  0xaa   : > { %v243_v49 = vpop.f32.mrf.mxu0  ;;  %v267_v50 = vpop.f32.mrf.mxu1 }
  0xab   : > { %v244_v51 = vadd.f32 %v658_v48, %v243_v49  ;;  %v268_v52 = vadd.f32 %v658_v48, %v267_v50 }
  0xad   : > { %v339_v53 = vmax.f32 %v244_v51, 0.0  ;;  %v347_v54 = vmax.f32 %v268_v52, 0.0 }
  0xae   : > { %v291_v55 = vpop.f32.mrf.mxu2  ;;  %v315_v56 = vpop.f32.mrf.mxu3 }
  0xaf   : > { %371 = vst [vmem:[%s667_s29] sm:$0xff] %v339_v53  ;;  %v292_v57 = vadd.f32 %v658_v48, %v291_v55  ;;  %v316_v58 = vadd.f32 %v658_v48, %v315_v56 }
  0xb0   : > { %379 = vst [vmem:[%s667_s29 + $0x40] sm:$0xff] %v347_v54 }
  0xb1   : > { %v355_v59 = vmax.f32 %v292_v57, 0.0  ;;  %v363_v60 = vmax.f32 %v316_v58, 0.0 }
  0xb2   : > { %v246_v61 = vpop.f32.mrf.mxu0  ;;  %v270_v62 = vpop.f32.mrf.mxu1 }
  0xb3   : > { %387 = vst [vmem:[%s667_s29 + $0x80] sm:$0xff] %v355_v59  ;;  %v247_v63 = vadd.f32 %v658_v48, %v246_v61  ;;  %v271_v0 = vadd.f32 %v658_v48, %v270_v62 }
  0xb4   : > { %395 = vst [vmem:[%s667_s29 + $0xc0] sm:$0xff] %v363_v60 }
  0xb5   : > { %v340_v1 = vmax.f32 %v247_v63, 0.0  ;;  %v348_v2 = vmax.f32 %v271_v0, 0.0 }
  0xb6   : > { %v294_v3 = vpop.f32.mrf.mxu2  ;;  %v318_v4 = vpop.f32.mrf.mxu3 }
  0xb7   : > { %372 = vst [vmem:[%s667_s29 + $0x8] sm:$0xff] %v340_v1  ;;  %v295_v5 = vadd.f32 %v658_v48, %v294_v3  ;;  %v319_v6 = vadd.f32 %v658_v48, %v318_v4 }
  0xb8   : > { %380 = vst [vmem:[%s667_s29 + $0x48] sm:$0xff] %v348_v2 }
  0xb9   : > { %v356_v7 = vmax.f32 %v295_v5, 0.0  ;;  %v364_v8 = vmax.f32 %v319_v6, 0.0 }
  0xba   : > { %v249_v9 = vpop.f32.mrf.mxu0  ;;  %v273_v10 = vpop.f32.mrf.mxu1 }
  0xbb   : > { %388 = vst [vmem:[%s667_s29 + $0x88] sm:$0xff] %v356_v7  ;;  %v250_v11 = vadd.f32 %v658_v48, %v249_v9  ;;  %v274_v12 = vadd.f32 %v658_v48, %v273_v10 }
  0xbc   : > { %396 = vst [vmem:[%s667_s29 + $0xc8] sm:$0xff] %v364_v8 }
  0xbd   : > { %v341_v13 = vmax.f32 %v250_v11, 0.0  ;;  %v349_v14 = vmax.f32 %v274_v12, 0.0 }
  0xbe   : > { %v297_v15 = vpop.f32.mrf.mxu2  ;;  %v321_v16 = vpop.f32.mrf.mxu3 }
  0xbf   : > { %373 = vst [vmem:[%s667_s29 + $0x10] sm:$0xff] %v341_v13  ;;  %v298_v17 = vadd.f32 %v658_v48, %v297_v15  ;;  %v322_v18 = vadd.f32 %v658_v48, %v321_v16 }
  0xc0   : > { %381 = vst [vmem:[%s667_s29 + $0x50] sm:$0xff] %v349_v14 }
  0xc1   : > { %v357_v19 = vmax.f32 %v298_v17, 0.0  ;;  %v365_v20 = vmax.f32 %v322_v18, 0.0 }
  0xc2   : > { %v252_v21 = vpop.f32.mrf.mxu0  ;;  %v276_v22 = vpop.f32.mrf.mxu1 }
  0xc3   : > { %389 = vst [vmem:[%s667_s29 + $0x90] sm:$0xff] %v357_v19  ;;  %v253_v23 = vadd.f32 %v658_v48, %v252_v21  ;;  %v277_v24 = vadd.f32 %v658_v48, %v276_v22 }
  0xc4   : > { %397 = vst [vmem:[%s667_s29 + $0xd0] sm:$0xff] %v365_v20 }
  0xc5   : > { %v342_v25 = vmax.f32 %v253_v23, 0.0  ;;  %v350_v26 = vmax.f32 %v277_v24, 0.0 }
  0xc6   : > { %v300_v27 = vpop.f32.mrf.mxu2  ;;  %v324_v28 = vpop.f32.mrf.mxu3 }
  0xc7   : > { %374 = vst [vmem:[%s667_s29 + $0x18] sm:$0xff] %v342_v25  ;;  %v301_v29 = vadd.f32 %v658_v48, %v300_v27  ;;  %v325_v30 = vadd.f32 %v658_v48, %v324_v28 }
  0xc8   : > { %382 = vst [vmem:[%s667_s29 + $0x58] sm:$0xff] %v350_v26 }
  0xc9   : > { %v358_v31 = vmax.f32 %v301_v29, 0.0  ;;  %v366_v32 = vmax.f32 %v325_v30, 0.0 }
  0xca   : > { %v255_v33 = vpop.f32.mrf.mxu0  ;;  %v279_v34 = vpop.f32.mrf.mxu1 }
  0xcb   : > { %390 = vst [vmem:[%s667_s29 + $0x98] sm:$0xff] %v358_v31  ;;  %v256_v35 = vadd.f32 %v658_v48, %v255_v33  ;;  %v280_v36 = vadd.f32 %v658_v48, %v279_v34 }
  0xcc   : > { %398 = vst [vmem:[%s667_s29 + $0xd8] sm:$0xff] %v366_v32 }
  0xcd   : > { %v343_v37 = vmax.f32 %v256_v35, 0.0  ;;  %v351_v38 = vmax.f32 %v280_v36, 0.0 }
  0xce   : > { %v303_v39 = vpop.f32.mrf.mxu2  ;;  %v327_v40 = vpop.f32.mrf.mxu3 }
  0xcf   : > { %375 = vst [vmem:[%s667_s29 + $0x20] sm:$0xff] %v343_v37  ;;  %v304_v41 = vadd.f32 %v658_v48, %v303_v39  ;;  %v328_v42 = vadd.f32 %v658_v48, %v327_v40 }
  0xd0   : > { %383 = vst [vmem:[%s667_s29 + $0x60] sm:$0xff] %v351_v38 }
  0xd1   : > { %v359_v43 = vmax.f32 %v304_v41, 0.0  ;;  %v367_v44 = vmax.f32 %v328_v42, 0.0 }
  0xd2   : > { %v258_v45 = vpop.f32.mrf.mxu0  ;;  %v282_v46 = vpop.f32.mrf.mxu1 }
  0xd3   : > { %391 = vst [vmem:[%s667_s29 + $0xa0] sm:$0xff] %v359_v43  ;;  %v259_v47 = vadd.f32 %v658_v48, %v258_v45  ;;  %v283_v49 = vadd.f32 %v658_v48, %v282_v46 }
  0xd4   : > { %399 = vst [vmem:[%s667_s29 + $0xe0] sm:$0xff] %v367_v44 }
  0xd5   : > { %v344_v50 = vmax.f32 %v259_v47, 0.0  ;;  %v352_v51 = vmax.f32 %v283_v49, 0.0 }
  0xd6   : > { %v306_v52 = vpop.f32.mrf.mxu2  ;;  %v330_v53 = vpop.f32.mrf.mxu3 }
  0xd7   : > { %376 = vst [vmem:[%s667_s29 + $0x28] sm:$0xff] %v344_v50  ;;  %v307_v54 = vadd.f32 %v658_v48, %v306_v52  ;;  %v331_v55 = vadd.f32 %v658_v48, %v330_v53 }
  0xd8   : > { %384 = vst [vmem:[%s667_s29 + $0x68] sm:$0xff] %v352_v51 }
  0xd9   : > { %v360_v56 = vmax.f32 %v307_v54, 0.0  ;;  %v368_v57 = vmax.f32 %v331_v55, 0.0 }
  0xda   : > { %v261_v58 = vpop.f32.mrf.mxu0  ;;  %v285_v59 = vpop.f32.mrf.mxu1 }
  0xdb   : > { %392 = vst [vmem:[%s667_s29 + $0xa8] sm:$0xff] %v360_v56  ;;  %v262_v60 = vadd.f32 %v658_v48, %v261_v58  ;;  %v286_v61 = vadd.f32 %v658_v48, %v285_v59 }
  0xdc   : > { %400 = vst [vmem:[%s667_s29 + $0xe8] sm:$0xff] %v368_v57 }
  0xdd   : > { %v345_v62 = vmax.f32 %v262_v60, 0.0  ;;  %v353_v63 = vmax.f32 %v286_v61, 0.0 }
  0xde   : > { %v309_v0 = vpop.f32.mrf.mxu2  ;;  %v333_v1 = vpop.f32.mrf.mxu3 }
  0xdf   : > { %377 = vst [vmem:[%s667_s29 + $0x30] sm:$0xff] %v345_v62  ;;  %v310_v2 = vadd.f32 %v658_v48, %v309_v0  ;;  %v334_v3 = vadd.f32 %v658_v48, %v333_v1 }
  0xe0   : > { %385 = vst [vmem:[%s667_s29 + $0x70] sm:$0xff] %v353_v63 }
  0xe1   : > { %v361_v4 = vmax.f32 %v310_v2, 0.0  ;;  %v369_v5 = vmax.f32 %v334_v3, 0.0 }
  0xe2   : > { %v264_v6 = vpop.f32.mrf.mxu0  ;;  %v288_v7 = vpop.f32.mrf.mxu1 }
  0xe3   : > { %393 = vst [vmem:[%s667_s29 + $0xb0] sm:$0xff] %v361_v4  ;;  %v265_v8 = vadd.f32 %v658_v48, %v264_v6  ;;  %v289_v9 = vadd.f32 %v658_v48, %v288_v7 }
  0xe4   : > { %401 = vst [vmem:[%s667_s29 + $0xf0] sm:$0xff] %v369_v5 }
  0xe5   : > { %v346_v10 = vmax.f32 %v265_v8, 0.0  ;;  %v354_v11 = vmax.f32 %v289_v9, 0.0 }
  0xe6   : > { %v312_v12 = vpop.f32.mrf.mxu2  ;;  %v336_v13 = vpop.f32.mrf.mxu3 }
  0xe7   : > { %378 = vst [vmem:[%s667_s29 + $0x38] sm:$0xff] %v346_v10  ;;  %v313_v14 = vadd.f32 %v658_v48, %v312_v12  ;;  %v337_v15 = vadd.f32 %v658_v48, %v336_v13 }
  0xe8   : > { %386 = vst [vmem:[%s667_s29 + $0x78] sm:$0xff] %v354_v11 }
  0xe9   : > { %v362_v16 = vmax.f32 %v313_v14, 0.0  ;;  %v370_v17 = vmax.f32 %v337_v15, 0.0 }
  0xeb   : > { %394 = vst [vmem:[%s667_s29 + $0xb8] sm:$0xff] %v362_v16 }
  0xec   : > { %402 = vst [vmem:[%s667_s29 + $0xf8] sm:$0xff] %v370_v17 }
  0xed PF: > { %s13_s12 = sadd.s32 1, %s533_s12  }
  0xee   : > { %p10_p4 = scmp.ge.s32.totalorder %s13_s12, 8  }
  0xf0   :  { %12 = sbr.rel (!%p10_p4) target bundleno = 1 (0x1), region = 62 }

// kernel: net_forward.5
= control target key start
LH: loop header
LB: loop body
LE: loop exit
PB: predicated region body
PF: predicated region fallthrough
CT: control target
= control target key end

     0   :  { %s581_s21 = smov 0   ;;  %s736_s0 = inlined_call_operand.vmem [shape: f32[8,9216], index: 0, kind: input, shape index: {}]   ;;  %s737_s1 = inlined_call_operand.vmem [shape: f32[9216,128], index: 1, kind: input, shape index: {}]   ;;  %s738_s2 = inlined_call_operand.vmem [shape: f32[1,128], index: 2, kind: input, shape index: {}]   ;;  %s739_s3 = inlined_call_operand.vmem [shape: f32[128,128], index: 3, kind: input, shape index: {}]   ;;  %s740_s4 = inlined_call_operand.vmem [shape: f32[1,128], index: 4, kind: input, shape index: {}]   ;;  %s741_s5 = inlined_call_operand.vmem [shape: f32[8,128], index: 5, kind: output, shape index: {0}]   ;;  %s742_s6 = inlined_call_operand.vmem [shape: f32[8,128], index: 6, kind: output, shape index: {1}]  }
   0x1 LB: > { %s587_s22 = sadd.s32 4294967295, %s543_s21   ;;  %p517_p0 = scmp.ge.s32.totalorder %s543_s21, 1  ;;  %s543_s21 = sphi %s581_s21, %s17_s21  }
   0x2   : > { %p217_p1 = scmp.lt.s32.totalorder %s543_s21, 19 }
   0x4   : > { %p218_p2 = pnand %p517_p0, %p217_p1 }
   0x5   : > { %s518_s23 = sshll.u32 (!%p218_p2), %s587_s22, 2  ;;  %s520_s24 = sshll.u32 (!%p218_p2), %s587_s22, 6 }
   0x6   : > { %221 = sbr.rel (%p218_p2) target bundleno = 354 (0x162), region = 40  ;;  %p248_p3 = scmp.lt.s32.totalorder (!%p218_p2), %s518_s23, 71 }
   0x7   : > { %p254_p4 = scmp.lt.s32.totalorder (!%p218_p2), %s520_s24, 1151  ;;  %p522_p5 = scmp.ne.s32.totalorder (!%p218_p2), %s587_s22, 0 }
   0xb   : > { %s744_s23 = smov (!%p248_p3, %s518_s23), 71  ;;  %s746_s24 = smov (!%p254_p4, %s520_s24), 1151 }
   0xc   : > { %s519_s25 = sshll.u32 %s744_s23, 3  ;;  %s521_s29 = sshll.u32 %s746_s24, 3 }
   0xd   : > { %s596_s28 = scalar_lea.vmem %s736_s0, %s519_s25  ;;  %s601_s8 = scalar_lea.vmem %s737_s1, %s521_s29 }
   0xe   : > { %262 = sbr.rel (%p522_p5) target bundleno = 21 (0x15), region = 44 }
  0x13   : > { %v545_v0 = vmov 0.0  }
  0x14   : > { %263 = vst [vmem:[#allocation2] sm:$0xff] %v545_v0 }
  0x15 PF: > { %v316_v1 = vld [vmem:[%s601_s8 + $0x178] sm:$0xff]  ;;  %v315_v2 = vld [vmem:[%s601_s8 + $0x170] sm:$0xff]  ;;  %v314_v6 = vld [vmem:[%s601_s8 + $0x168] sm:$0xff]  ;;  %p523_p6 = scmp.ne.s32.totalorder %s587_s22, 17 }
  0x16   : > { %v332_v3 = vld [vmem:[%s601_s8 + $0x1f8] sm:$0xff]  ;;  %373 = vmatpush.msra.mxu2 %v316_v1  ;;  %v331_v7 = vld [vmem:[%s601_s8 + $0x1f0] sm:$0xff]  ;;  %v330_v10 = vld [vmem:[%s601_s8 + $0x1e8] sm:$0xff] }
  0x17   : > { %393 = vmatpush.msra.mxu3 %v332_v3  ;;  %v284_v4 = vld [vmem:[%s601_s8 + $0x78] sm:$0xff]  ;;  %v283_v8 = vld [vmem:[%s601_s8 + $0x70] sm:$0xff]  ;;  %v282_v11 = vld [vmem:[%s601_s8 + $0x68] sm:$0xff] }
  0x18   : > { %v300_v5 = vld [vmem:[%s601_s8 + $0xf8] sm:$0xff]  ;;  %333 = vmatpush.msra.mxu0 %v284_v4  ;;  %v299_v9 = vld [vmem:[%s601_s8 + $0xf0] sm:$0xff]  ;;  %374 = vmatpush.msra.mxu2 %v315_v2  ;;  %v313_v12 = vld [vmem:[%s601_s8 + $0x160] sm:$0xff] }
  0x19   : > { %353 = vmatpush.msra.mxu1 %v300_v5  ;;  %394 = vmatpush.msra.mxu3 %v331_v7  ;;  %v298_v13 = vld [vmem:[%s601_s8 + $0xe8] sm:$0xff]  ;;  %v329_v14 = vld [vmem:[%s601_s8 + $0x1e0] sm:$0xff]  ;;  %v312_v17 = vld [vmem:[%s601_s8 + $0x158] sm:$0xff] }
  0x1a   : > { %334 = vmatpush.msra.mxu0 %v283_v8  ;;  %375 = vmatpush.msra.mxu2 %v314_v6  ;;  %v281_v15 = vld [vmem:[%s601_s8 + $0x60] sm:$0xff]  ;;  %v328_v18 = vld [vmem:[%s601_s8 + $0x1d8] sm:$0xff]  ;;  %v311_v21 = vld [vmem:[%s601_s8 + $0x150] sm:$0xff] }
  0x1b   : > { %354 = vmatpush.msra.mxu1 %v299_v9  ;;  %395 = vmatpush.msra.mxu3 %v330_v10  ;;  %v297_v16 = vld [vmem:[%s601_s8 + $0xe0] sm:$0xff]  ;;  %v280_v19 = vld [vmem:[%s601_s8 + $0x58] sm:$0xff]  ;;  %v327_v22 = vld [vmem:[%s601_s8 + $0x1d0] sm:$0xff] }
  0x1c   : > { %335 = vmatpush.msra.mxu0 %v282_v11  ;;  %376 = vmatpush.msra.mxu2 %v313_v12  ;;  %v296_v20 = vld [vmem:[%s601_s8 + $0xd8] sm:$0xff]  ;;  %v279_v23 = vld [vmem:[%s601_s8 + $0x50] sm:$0xff]  ;;  %v310_v25 = vld [vmem:[%s601_s8 + $0x148] sm:$0xff] }
  0x1d   : > { %355 = vmatpush.msra.mxu1 %v298_v13  ;;  %396 = vmatpush.msra.mxu3 %v329_v14  ;;  %v295_v24 = vld [vmem:[%s601_s8 + $0xd0] sm:$0xff]  ;;  %v326_v26 = vld [vmem:[%s601_s8 + $0x1c8] sm:$0xff]  ;;  %v309_v29 = vld [vmem:[%s601_s8 + $0x140] sm:$0xff] }
  0x1e   : > { %336 = vmatpush.msra.mxu0 %v281_v15  ;;  %377 = vmatpush.msra.mxu2 %v312_v17  ;;  %v278_v27 = vld [vmem:[%s601_s8 + $0x48] sm:$0xff]  ;;  %v325_v30 = vld [vmem:[%s601_s8 + $0x1c0] sm:$0xff]  ;;  %v308_v33 = vld [vmem:[%s601_s8 + $0x138] sm:$0xff] }
  0x1f   : > { %356 = vmatpush.msra.mxu1 %v297_v16  ;;  %397 = vmatpush.msra.mxu3 %v328_v18  ;;  %v294_v28 = vld [vmem:[%s601_s8 + $0xc8] sm:$0xff]  ;;  %v277_v31 = vld [vmem:[%s601_s8 + $0x40] sm:$0xff]  ;;  %v324_v34 = vld [vmem:[%s601_s8 + $0x1b8] sm:$0xff] }
  0x20   : > { %337 = vmatpush.msra.mxu0 %v280_v19  ;;  %378 = vmatpush.msra.mxu2 %v311_v21  ;;  %v293_v32 = vld [vmem:[%s601_s8 + $0xc0] sm:$0xff]  ;;  %v276_v35 = vld [vmem:[%s601_s8 + $0x38] sm:$0xff]  ;;  %v307_v37 = vld [vmem:[%s601_s8 + $0x130] sm:$0xff] }
  0x21   : > { %357 = vmatpush.msra.mxu1 %v296_v20  ;;  %398 = vmatpush.msra.mxu3 %v327_v22  ;;  %v292_v36 = vld [vmem:[%s601_s8 + $0xb8] sm:$0xff]  ;;  %v323_v38 = vld [vmem:[%s601_s8 + $0x1b0] sm:$0xff]  ;;  %v306_v41 = vld [vmem:[%s601_s8 + $0x128] sm:$0xff] }
  0x22   : > { %338 = vmatpush.msra.mxu0 %v279_v23  ;;  %379 = vmatpush.msra.mxu2 %v310_v25  ;;  %v275_v39 = vld [vmem:[%s601_s8 + $0x30] sm:$0xff]  ;;  %v322_v42 = vld [vmem:[%s601_s8 + $0x1a8] sm:$0xff]  ;;  %v305_v45 = vld [vmem:[%s601_s8 + $0x120] sm:$0xff] }
  0x23   : > { %358 = vmatpush.msra.mxu1 %v295_v24  ;;  %399 = vmatpush.msra.mxu3 %v326_v26  ;;  %v291_v40 = vld [vmem:[%s601_s8 + $0xb0] sm:$0xff]  ;;  %v274_v43 = vld [vmem:[%s601_s8 + $0x28] sm:$0xff]  ;;  %v321_v46 = vld [vmem:[%s601_s8 + $0x1a0] sm:$0xff] }
  0x24   : > { %339 = vmatpush.msra.mxu0 %v278_v27  ;;  %380 = vmatpush.msra.mxu2 %v309_v29  ;;  %v290_v44 = vld [vmem:[%s601_s8 + $0xa8] sm:$0xff]  ;;  %v273_v47 = vld [vmem:[%s601_s8 + $0x20] sm:$0xff]  ;;  %v304_v49 = vld [vmem:[%s601_s8 + $0x118] sm:$0xff] }
  0x25   : > { %359 = vmatpush.msra.mxu1 %v294_v28  ;;  %400 = vmatpush.msra.mxu3 %v325_v30  ;;  %v289_v48 = vld [vmem:[%s601_s8 + $0xa0] sm:$0xff]  ;;  %v320_v50 = vld [vmem:[%s601_s8 + $0x198] sm:$0xff]  ;;  %v303_v53 = vld [vmem:[%s601_s8 + $0x110] sm:$0xff] }
  0x26   : > { %340 = vmatpush.msra.mxu0 %v277_v31  ;;  %381 = vmatpush.msra.mxu2 %v308_v33  ;;  %v272_v51 = vld [vmem:[%s601_s8 + $0x18] sm:$0xff]  ;;  %v319_v54 = vld [vmem:[%s601_s8 + $0x190] sm:$0xff]  ;;  %v302_v57 = vld [vmem:[%s601_s8 + $0x108] sm:$0xff] }
  0x27   : > { %360 = vmatpush.msra.mxu1 %v293_v32  ;;  %401 = vmatpush.msra.mxu3 %v324_v34  ;;  %v288_v52 = vld [vmem:[%s601_s8 + $0x98] sm:$0xff]  ;;  %v271_v55 = vld [vmem:[%s601_s8 + $0x10] sm:$0xff]  ;;  %v318_v58 = vld [vmem:[%s601_s8 + $0x188] sm:$0xff] }
  0x28   : > { %341 = vmatpush.msra.mxu0 %v276_v35  ;;  %382 = vmatpush.msra.mxu2 %v307_v37  ;;  %v287_v56 = vld [vmem:[%s601_s8 + $0x90] sm:$0xff]  ;;  %v270_v59 = vld [vmem:[%s601_s8 + $0x8] sm:$0xff]  ;;  %v301_v61 = vld [vmem:[%s601_s8 + $0x100] sm:$0xff] }
  0x29   : > { %361 = vmatpush.msra.mxu1 %v292_v36  ;;  %402 = vmatpush.msra.mxu3 %v323_v38  ;;  %v286_v60 = vld [vmem:[%s601_s8 + $0x88] sm:$0xff]  ;;  %v317_v62 = vld [vmem:[%s601_s8 + $0x180] sm:$0xff]  ;;  %v267_v63 = vld [vmem:[%s596_s28 + $0x10] sm:$0xff] }
  0x2a   : > { %342 = vmatpush.msra.mxu0 %v275_v39  ;;  %383 = vmatpush.msra.mxu2 %v306_v41  ;;  %v268_v0 = vld [vmem:[%s596_s28 + $0x18] sm:$0xff]  ;;  %v269_v1 = vld [vmem:[%s601_s8] sm:$0xff]  ;;  %v266_v4 = vld [vmem:[%s596_s28 + $0x8] sm:$0xff] }
  0x2b   : > { %362 = vmatpush.msra.mxu1 %v291_v40  ;;  %403 = vmatpush.msra.mxu3 %v322_v42  ;;  %v285_v2 = vld [vmem:[%s601_s8 + $0x80] sm:$0xff] }
  0x2c   : > { %343 = vmatpush.msra.mxu0 %v274_v43  ;;  %384 = vmatpush.msra.mxu2 %v305_v45  ;;  %v265_v3 = vld [vmem:[%s596_s28] sm:$0xff] }
  0x2d   : > { %363 = vmatpush.msra.mxu1 %v290_v44  ;;  %404 = vmatpush.msra.mxu3 %v321_v46  ;;  %v264_v11 = vld [vmem:[#allocation2] sm:$0xff] }
  0x2e   : > { %344 = vmatpush.msra.mxu0 %v273_v47  ;;  %385 = vmatpush.msra.mxu2 %v304_v49 }
  0x2f   : > { %364 = vmatpush.msra.mxu1 %v289_v48  ;;  %405 = vmatpush.msra.mxu3 %v320_v50 }
  0x30   : > { %345 = vmatpush.msra.mxu0 %v272_v51  ;;  %386 = vmatpush.msra.mxu2 %v303_v53 }
  0x31   : > { %365 = vmatpush.msra.mxu1 %v288_v52  ;;  %406 = vmatpush.msra.mxu3 %v319_v54 }
  0x32   : > { %346 = vmatpush.msra.mxu0 %v271_v55  ;;  %387 = vmatpush.msra.mxu2 %v302_v57 }
  0x33   : > { %366 = vmatpush.msra.mxu1 %v287_v56  ;;  %407 = vmatpush.msra.mxu3 %v318_v58 }
  0x34   : > { %347 = vmatpush.msra.mxu0 %v270_v59  ;;  %388 = vmatpush.msra.mxu2 %v301_v61 }
  0x35   : > { %367 = vmatpush.msra.mxu1 %v286_v60  ;;  %408 = vmatpush.msra.mxu3 %v317_v62 }
  0x36   : > { %389 = vmatmul.f32.vlgmr.msra.gmra.mxu2 %v267_v63  ;;  %409 = vmatmul.f32.vlgmr.msra.gmra.mxu3 %v268_v0 }
  0x37   : > { %348 = vmatpush.msra.mxu0 %v269_v1  ;;  %368 = vmatpush.msra.mxu1 %v285_v2 }
  0x38   : > { %349 = vmatmul.f32.vlgmr.msra.gmra.mxu0 %v265_v3  ;;  %369 = vmatmul.f32.vlgmr.msra.gmra.mxu1 %v266_v4 }
  0xb5   : > { %v350_v5 = vpop.f32.mrf.mxu0  ;;  %v370_v6 = vpop.f32.mrf.mxu1 }
  0xb6   : > { %v371_v7 = vadd.f32 %v370_v6, %v350_v5 }
  0xb9   : > { %v390_v8 = vpop.f32.mrf.mxu2  ;;  %v410_v9 = vpop.f32.mrf.mxu3 }
  0xba   : > { %v391_v10 = vadd.f32 %v390_v8, %v371_v7 }
  0xbc   : > { %v411_v12 = vadd.f32 %v410_v9, %v391_v10  ;;  %418 = sbr.rel (%p523_p6) target bundleno = 354 (0x162), region = 48 }
  0xbe   : > { %v413_v13 = vadd.f32 %v411_v12, %v264_v11 }
  0xc0   : > { %414 = vst [vmem:[#allocation2] sm:$0xff] %v413_v13 }
  0xc1   : > { %v442_v14 = vld [vmem:[%s739_s3 + $0x78] sm:$0xff]  ;;  %v441_v15 = vld [vmem:[%s739_s3 + $0x70] sm:$0xff]  ;;  %v440_v16 = vld [vmem:[%s739_s3 + $0x68] sm:$0xff] }
  0xc2   : > { %447 = vmatpush.msra.mxu0 %v442_v14  ;;  %v439_v17 = vld [vmem:[%s739_s3 + $0x60] sm:$0xff]  ;;  %v438_v19 = vld [vmem:[%s739_s3 + $0x58] sm:$0xff]  ;;  %v437_v21 = vld [vmem:[%s739_s3 + $0x50] sm:$0xff] }
  0xc3   : > { %v535_v20 = vld [vmem:[%s738_s2] ss:$0 sm:$0xff]  ;;  %v436_v23 = vld [vmem:[%s739_s3 + $0x48] sm:$0xff]  ;;  %v434_v26 = vld [vmem:[%s739_s3 + $0x38] sm:$0xff] }
  0xc4   : > { %448 = vmatpush.msra.mxu0 %v441_v15  ;;  %v435_v25 = vld [vmem:[%s739_s3 + $0x40] sm:$0xff]  ;;  %v433_v27 = vld [vmem:[%s739_s3 + $0x30] sm:$0xff]  ;;  %v432_v28 = vld [vmem:[%s739_s3 + $0x28] sm:$0xff] }
  0xc5   : > { %v431_v29 = vld [vmem:[%s739_s3 + $0x20] sm:$0xff]  ;;  %v430_v30 = vld [vmem:[%s739_s3 + $0x18] sm:$0xff]  ;;  %v429_v31 = vld [vmem:[%s739_s3 + $0x10] sm:$0xff] }
  0xc6   : > { %449 = vmatpush.msra.mxu0 %v440_v16  ;;  %v428_v32 = vld [vmem:[%s739_s3 + $0x8] sm:$0xff]  ;;  %v427_v33 = vld [vmem:[%s739_s3] sm:$0xff] }
  0xc7   : > { %v419_v18 = vld [vmem:[#allocation2] sm:$0xff] }
  0xc8   : > { %450 = vmatpush.msra.mxu0 %v439_v17  ;;  %v424_v22 = vadd.f32 %v535_v20, %v419_v18  ;;  %v536_v34 = vld [vmem:[%s740_s4] ss:$0 sm:$0xff] }
  0xca   : > { %451 = vmatpush.msra.mxu0 %v438_v19  ;;  %v425_v24 = vmax.f32 %v424_v22, 0.0 }
  0xcc   : > { %452 = vmatpush.msra.mxu0 %v437_v21  ;;  %426 = vst [vmem:[%s741_s5] sm:$0xff] %v425_v24 }
  0xce   : > { %453 = vmatpush.msra.mxu0 %v436_v23 }
  0xd0   : > { %454 = vmatpush.msra.mxu0 %v435_v25 }
  0xd2   : > { %455 = vmatpush.msra.mxu0 %v434_v26 }
  0xd4   : > { %456 = vmatpush.msra.mxu0 %v433_v27 }
  0xd6   : > { %457 = vmatpush.msra.mxu0 %v432_v28 }
  0xd8   : > { %458 = vmatpush.msra.mxu0 %v431_v29 }
  0xda   : > { %459 = vmatpush.msra.mxu0 %v430_v30 }
  0xdc   : > { %460 = vmatpush.msra.mxu0 %v429_v31 }
  0xde   : > { %461 = vmatpush.msra.mxu0 %v428_v32 }
  0xe0   : > { %462 = vmatpush.msra.mxu0 %v427_v33 }
  0xe1   : > { %463 = vmatmul.f32.vlgmr.msra.gmra.mxu0 %v425_v24 }
 0x15e   : > { %v464_v35 = vpop.f32.mrf.mxu0 }
 0x15f   : > { %v465_v36 = vadd.f32 %v536_v34, %v464_v35 }
 0x161   : > { %467 = vst [vmem:[%s742_s6] sm:$0xff] %v465_v36 }
 0x162 PF: > { %s17_s21 = sadd.s32 1, %s543_s21  }
 0x163   : > { %p14_p7 = scmp.ge.s32.totalorder %s17_s21, 20  }
 0x165   :  { %16 = sbr.rel (!%p14_p7) target bundleno = 1 (0x1), region = 85 }

// kernel: net_forward.4
= control target key start
LH: loop header
LB: loop body
LE: loop exit
PB: predicated region body
PF: predicated region fallthrough
CT: control target
= control target key end

     0   :  { %10 = vsyncpa [#allocation3], 0  ;;  %s5843_s0 = inlined_call_operand.vmem [shape: f32[1152,384], index: 0, kind: input, shape index: {}]   ;;  %s5844_s1 = inlined_call_operand.vmem [shape: f32[384,64], index: 1, kind: input, shape index: {}]   ;;  %s5845_s2 = inlined_call_operand.vmem [shape: f32[1,64], index: 2, kind: input, shape index: {}]   ;;  %s5846_s3 = inlined_call_operand.hbm [shape: f32[1152,64], index: 3, kind: output, shape index: {0}]   ;;  %s5847_s4 = inlined_call_operand.vmem [shape: f32[288,64], index: 4, kind: output, shape index: {1}]  }
   0x1   :  { %12 = vsyncpa [#allocation3 + $0x1], 0  ;;  %s4181_s15 = smov 0   ;;  %s4183_s16 = smov 0  }
   0x2   :  { %s4185_s17 = smov 0   ;;  %s4187_s18 = smov 0  }
   0x3 LB: > { %s4202_s19 = sadd.s32 4294967295, %s4152_s18   ;;  %s3697_s20 = sadd.s32 4294967294, %s4152_s18   ;;  %s4152_s18 = sphi %s4187_s18, %s5893_s18   ;;  %s4148_s17 = sphi %s4185_s17, %s5892_s17   ;;  %s4144_s16 = sphi %s4183_s16, %s5891_s16   ;;  %s4140_s15 = sphi %s4181_s15, %s5890_s15  }
   0x4   : > { %s4206_s21 = sadd.s32 1, %s4152_s18   ;;  %s93_s22 = sadd.s32 1, %s4148_s17 }
   0x5   : > { %s90_s23 = ssub.s32 %s4152_s18, %s4206_s21  ;;  %p103_p0 = scmp.ne.s32.totalorder %s4148_s17, %s4144_s16 }
   0x6   : > { %p91_p1 = scmp.eq.s32.totalorder %s90_s23, 0  ;;  %p104_p2 = scmp.eq.s32.totalorder %s4202_s19, 1 }
   0x7   : > { %p109_p3 = scmp.ne.s32.totalorder %s4144_s16, %s4140_s15  ;;  %p110_p4 = scmp.eq.s32.totalorder %s3697_s20, 1 }
   0x8   : > { %s4217_s24 = scalar_select %p91_p1, %s4148_s17, %s93_s22  }
   0x9   : > { %p4219_p5 = por %p104_p2, %p103_p0  ;;  %p4223_p6 = por %p110_p4, %p109_p3 }
   0xa   : > { %p3700_p7 = scmp.ge.s32.totalorder %s4152_s18, 1  ;;  %p170_p8 = scmp.lt.s32.totalorder %s4152_s18, 3 }
   0xc   : > { %p171_p9 = pnand %p3700_p7, %p170_p8 }
   0xe   : > { %174 = sbr.rel (%p171_p9) target bundleno = 663 (0x297), region = 32 }
  0x13   : > { %v447_v0 = vld [vmem:[%s5844_s1 + $0x78] sm:$0xff]  ;;  %v446_v2 = vld [vmem:[%s5844_s1 + $0x70] sm:$0xff]  ;;  %v445_v5 = vld [vmem:[%s5844_s1 + $0x68] sm:$0xff]  ;;  %s202_s7 = smul.u32 72, %s4202_s19  ;;  %s192_s5 = sand.u32 1, %s4144_s16   ;;  %vm1183_vm0 = vcmask 523264  }
  0x14   : > { %v4235_v1 = vld [vmem:[%s5844_s1 + $0x178] sm:$0xff]  ;;  %3995 = vmatpush.msra.mxu3 %v447_v0  ;;  %v4244_v3 = vld [vmem:[%s5844_s1 + $0x170] sm:$0xff]  ;;  %484 = vmatpush.msra.mxu0 %v447_v0  ;;  %v4258_v6 = vld [vmem:[%s5844_s1 + $0x168] sm:$0xff]  ;;  %s4043_s29 = smul.u32 576, %s192_s5  ;;  %vm3416_vm1 = vcmask 1041409   ;;  %vm3418_vm2 = vcmask 1042434  }
  0x15   : > { %950 = vmatpush.msra.mxu2 %v4235_v1  ;;  %v4249_v4 = vld [vmem:[%s5844_s1 + $0xf8] sm:$0xff]  ;;  %v4263_v7 = vld [vmem:[%s5844_s1 + $0xf0] sm:$0xff]  ;;  %v4269_v8 = vld [vmem:[%s5844_s1 + $0xe8] sm:$0xff]  ;;  %p4358_p10 = scmp.lt.s32.totalorder %s202_s7, 143  ;;  %s210_s8 = smul.u32 18, %s4202_s19  ;;  %vm3420_vm3 = vcmask 1043459  }
  0x16   : > { %717 = vmatpush.msra.mxu1 %v4249_v4  ;;  %3996 = vmatpush.msra.mxu3 %v446_v2  ;;  %v444_v9 = vld [vmem:[%s5844_s1 + $0x60] sm:$0xff]  ;;  %v443_v12 = vld [vmem:[%s5844_s1 + $0x58] sm:$0xff]  ;;  %v442_v15 = vld [vmem:[%s5844_s1 + $0x50] sm:$0xff]  ;;  %s4593_s6 = scalar_lea.vmem [#allocation2], %s4043_s29  ;;  %vm3422_vm4 = vcmask 1044484   ;;  %vm3424_vm5 = vcmask 1045509  }
  0x17   : > { %951 = vmatpush.msra.mxu2 %v4244_v3  ;;  %485 = vmatpush.msra.mxu0 %v446_v2  ;;  %v4278_v10 = vld [vmem:[%s5844_s1 + $0x160] sm:$0xff]  ;;  %v4293_v13 = vld [vmem:[%s5844_s1 + $0x158] sm:$0xff]  ;;  %v4308_v16 = vld [vmem:[%s5844_s1 + $0x150] sm:$0xff]  ;;  %s5895_s7 = smov (!%p4358_p10, %s202_s7), 143  ;;  %p4648_p11 = scmp.lt.s32.totalorder %s210_s8, 35  ;;  %vm3426_vm6 = vcmask 1046534  }
  0x18   : > { %718 = vmatpush.msra.mxu1 %v4263_v7  ;;  %3997 = vmatpush.msra.mxu3 %v445_v5  ;;  %v4284_v11 = vld [vmem:[%s5844_s1 + $0xe0] sm:$0xff]  ;;  %v4299_v14 = vld [vmem:[%s5844_s1 + $0xd8] sm:$0xff]  ;;  %v4314_v17 = vld [vmem:[%s5844_s1 + $0xd0] sm:$0xff]  ;;  %s4044_s13 = smul.u32 24, %s5895_s7  ;;  %vm3428_vm7 = vcmask 1047559   ;;  %s4110_s23 = scalar_lea.hbm %s5846_s3, 1152 }
  0x19   : > { %952 = vmatpush.msra.mxu2 %v4258_v6  ;;  %486 = vmatpush.msra.mxu0 %v445_v5  ;;  %v441_v18 = vld [vmem:[%s5844_s1 + $0x48] sm:$0xff]  ;;  %v440_v21 = vld [vmem:[%s5844_s1 + $0x40] sm:$0xff]  ;;  %v439_v24 = vld [vmem:[%s5844_s1 + $0x38] sm:$0xff]  ;;  %s5897_s8 = smov (!%p4648_p11, %s210_s8), 35  ;;  %s3994_s7 = smul.u32 576, %s4202_s19 }
  0x1a   : > { %719 = vmatpush.msra.mxu1 %v4269_v8  ;;  %3998 = vmatpush.msra.mxu3 %v444_v9  ;;  %v4323_v19 = vld [vmem:[%s5844_s1 + $0x148] sm:$0xff]  ;;  %v4339_v22 = vld [vmem:[%s5844_s1 + $0x140] sm:$0xff]  ;;  %v4354_v25 = vld [vmem:[%s5844_s1 + $0x138] sm:$0xff]  ;;  %s4462_s11 = scalar_lea.vmem %s5843_s0, %s4044_s13  ;;  %s3702_s10 = sshll.u32 %s5897_s8, 3 }
  0x1b   : > { %953 = vmatpush.msra.mxu2 %v4278_v10  ;;  %487 = vmatpush.msra.mxu0 %v444_v9  ;;  %v4330_v20 = vld [vmem:[%s5844_s1 + $0xc8] sm:$0xff]  ;;  %v4345_v23 = vld [vmem:[%s5844_s1 + $0xc0] sm:$0xff]  ;;  %v4366_v26 = vld [vmem:[%s5844_s1 + $0xb8] sm:$0xff]  ;;  %s4680_s20 = scalar_lea.vmem %s5847_s4, %s3702_s10  ;;  %s5732_s29 = scalar_lea.hbm %s5846_s3, %s3994_s7 }
  0x1c   : > { %720 = vmatpush.msra.mxu1 %v4284_v11  ;;  %3999 = vmatpush.msra.mxu3 %v443_v12  ;;  %v438_v27 = vld [vmem:[%s5844_s1 + $0x30] sm:$0xff]  ;;  %v437_v30 = vld [vmem:[%s5844_s1 + $0x28] sm:$0xff]  ;;  %v436_v33 = vld [vmem:[%s5844_s1 + $0x20] sm:$0xff]  ;;  %s3603_s8 = sshll.u32 %s4593_s6, 4  ;;  %s3605_s9 = sshll.u32 %s5732_s29, 4  ;;  %s5755_s8 = int_to_ptr.vmem [resolvable:$true] %s3603_s8  ;;  %s5757_s9 = int_to_ptr.hbm [resolvable:$true] %s3605_s9 }
  0x1d   : > { %954 = vmatpush.msra.mxu2 %v4293_v13  ;;  %488 = vmatpush.msra.mxu0 %v443_v12  ;;  %v4375_v28 = vld [vmem:[%s5844_s1 + $0x130] sm:$0xff]  ;;  %v4390_v31 = vld [vmem:[%s5844_s1 + $0x128] sm:$0xff]  ;;  %v4411_v34 = vld [vmem:[%s5844_s1 + $0x120] sm:$0xff]  ;;  %s3586_s10 = scalar_lea.sflag [#allocation3], %s192_s5  ;;  %s4104_s12 = sshra.s32 %s5757_s9, 4  ;;  %s4105_s12 = int_to_ptr.hbm [resolvable:$true] %s4104_s12 }
  0x1e   : > { %721 = vmatpush.msra.mxu1 %v4299_v14  ;;  %4000 = vmatpush.msra.mxu3 %v442_v15  ;;  %v4381_v29 = vld [vmem:[%s5844_s1 + $0xb0] sm:$0xff]  ;;  %v4402_v32 = vld [vmem:[%s5844_s1 + $0xa8] sm:$0xff]  ;;  %v4417_v35 = vld [vmem:[%s5844_s1 + $0xa0] sm:$0xff]  ;;  %s4106_s14 = scalar_lea.hbm %s4105_s12, 576  ;;  %p4111_p1 = scmp.lt.s32.totalorder %s4105_s12, %s5846_s3 }
  0x1f   : > { %955 = vmatpush.msra.mxu2 %v4308_v16  ;;  %489 = vmatpush.msra.mxu0 %v442_v15  ;;  %v435_v36 = vld [vmem:[%s5844_s1 + $0x18] sm:$0xff]  ;;  %v434_v39 = vld [vmem:[%s5844_s1 + $0x10] sm:$0xff]  ;;  %v433_v42 = vld [vmem:[%s5844_s1 + $0x8] sm:$0xff]  ;;  %p4107_p12 = scmp.ne.s32.totalorder %s4105_s12, %s4106_s14  ;;  %p4112_p2 = scmp.lt.s32.totalorder %s4110_s23, %s4106_s14 }
  0x20   : > { %722 = vmatpush.msra.mxu1 %v4314_v17  ;;  %4001 = vmatpush.msra.mxu3 %v441_v18  ;;  %v4426_v37 = vld [vmem:[%s5844_s1 + $0x118] sm:$0xff]  ;;  %v4442_v40 = vld [vmem:[%s5844_s1 + $0x110] sm:$0xff]  ;;  %v4457_v43 = vld [vmem:[%s5844_s1 + $0x108] sm:$0xff] }
  0x21   : > { %956 = vmatpush.msra.mxu2 %v4323_v19  ;;  %490 = vmatpush.msra.mxu0 %v441_v18  ;;  %v4433_v38 = vld [vmem:[%s5844_s1 + $0x98] sm:$0xff]  ;;  %v4448_v41 = vld [vmem:[%s5844_s1 + $0x90] sm:$0xff]  ;;  %v449_v44 = vld [vmem:[%s5844_s1 + $0x88] sm:$0xff]  ;;  %p4108_p13 = pnand %p4107_p12, %p4219_p5  ;;  %p4113_p3 = por %p4112_p2, %p4111_p1 }
  0x22   : > { %723 = vmatpush.msra.mxu1 %v4330_v20  ;;  %4002 = vmatpush.msra.mxu3 %v440_v21  ;;  %v432_v45 = vld [vmem:[%s5844_s1] sm:$0xff]  ;;  %v378_v47 = vld [vmem:[%s4462_s11 + $0x510] sm:$0xff]  ;;  %v217_v51 = vld [vmem:[%s4462_s11 + $0x8] sm:$0xff] }
  0x23   : > { %957 = vmatpush.msra.mxu2 %v4339_v22  ;;  %491 = vmatpush.msra.mxu0 %v440_v21  ;;  %v4475_v46 = vld [vmem:[%s5844_s1 + $0x100] sm:$0xff]  ;;  %v218_v48 = vld [vmem:[%s4462_s11 + $0x10] sm:$0xff]  ;;  %v381_v52 = vld [vmem:[%s4462_s11 + $0x528] sm:$0xff]  ;;  %p4109_p0 = pneg %p4108_p13 }
  0x24   : > { %724 = vmatpush.msra.mxu1 %v4345_v23  ;;  %4003 = vmatpush.msra.mxu3 %v439_v24  ;;  %v448_v49 = vld [vmem:[%s5844_s1 + $0x80] sm:$0xff]  ;;  %v221_v53 = vld [vmem:[%s4462_s11 + $0x28] sm:$0xff]  ;;  %v219_v54 = vld [vmem:[%s4462_s11 + $0x18] sm:$0xff] }
  0x25   : > { %958 = vmatpush.msra.mxu2 %v4354_v25  ;;  %492 = vmatpush.msra.mxu0 %v439_v24  ;;  %v216_v50 = vld [vmem:[%s4462_s11] sm:$0xff]  ;;  %v222_v58 = vld [vmem:[%s4462_s11 + $0x30] sm:$0xff]  ;;  %v223_v59 = vld [vmem:[%s4462_s11 + $0x38] sm:$0xff]  ;;  %p4114_p4 = pnand %p4113_p3, %p4109_p0 }
  0x26   : > { %725 = vmatpush.msra.mxu1 %v4366_v26  ;;  %4004 = vmatpush.msra.mxu3 %v438_v27  ;;  %v220_v55 = vld [vmem:[%s4462_s11 + $0x20] sm:$0xff]  ;;  %v387_v60 = vld [vmem:[%s4462_s11 + $0x558] sm:$0xff]  ;;  %v225_v62 = vld [vmem:[%s4462_s11 + $0x48] sm:$0xff] }
  0x27   : > { %959 = vmatpush.msra.mxu2 %v4375_v28  ;;  %493 = vmatpush.msra.mxu0 %v438_v27  ;;  %v384_v56 = vld [vmem:[%s4462_s11 + $0x540] sm:$0xff]  ;;  %v227_v61 = vld [vmem:[%s4462_s11 + $0x58] sm:$0xff]  ;;  %v226_v63 = vld [vmem:[%s4462_s11 + $0x50] sm:$0xff] }
  0x28   : > { %726 = vmatpush.msra.mxu1 %v4381_v29  ;;  %4005 = vmatpush.msra.mxu3 %v437_v30  ;;  %v224_v57 = vld [vmem:[%s4462_s11 + $0x40] sm:$0xff]  ;;  %v390_v0 = vld [vmem:[%s4462_s11 + $0x570] sm:$0xff]  ;;  %v229_v5 = vld [vmem:[%s4462_s11 + $0x68] sm:$0xff] }
  0x29   : > { %960 = vmatpush.msra.mxu2 %v4390_v31  ;;  %494 = vmatpush.msra.mxu0 %v437_v30  ;;  %v230_v2 = vld [vmem:[%s4462_s11 + $0x70] sm:$0xff]  ;;  %v231_v9 = vld [vmem:[%s4462_s11 + $0x78] sm:$0xff]  ;;  %v240_v18 = vld [vmem:[%s4462_s11 + $0xc0] sm:$0xff] }
  0x2a   : > { %727 = vmatpush.msra.mxu1 %v4402_v32  ;;  %4006 = vmatpush.msra.mxu3 %v436_v33  ;;  %v234_v12 = vld [vmem:[%s4462_s11 + $0x90] sm:$0xff]  ;;  %v245_v21 = vld [vmem:[%s4462_s11 + $0xe8] sm:$0xff]  ;;  %v408_v24 = vld [vmem:[%s4462_s11 + $0x600] sm:$0xff] }
  0x2b   : > { %961 = vmatpush.msra.mxu2 %v4411_v34  ;;  %495 = vmatpush.msra.mxu0 %v436_v33  ;;  %v238_v15 = vld [vmem:[%s4462_s11 + $0xb0] sm:$0xff]  ;;  %v247_v27 = vld [vmem:[%s4462_s11 + $0xf8] sm:$0xff]  ;;  %v249_v30 = vld [vmem:[%s4462_s11 + $0x108] sm:$0xff] }
  0x2c   : > { %728 = vmatpush.msra.mxu1 %v4417_v35  ;;  %4007 = vmatpush.msra.mxu3 %v435_v36  ;;  %v254_v33 = vld [vmem:[%s4462_s11 + $0x130] sm:$0xff] }
  0x2d   : > { %962 = vmatpush.msra.mxu2 %v4426_v37  ;;  %496 = vmatpush.msra.mxu0 %v435_v36  ;;  %v417_v36 = vld [vmem:[%s4462_s11 + $0x648] sm:$0xff] }
  0x2e   : > { %729 = vmatpush.msra.mxu1 %v4433_v38  ;;  %4008 = vmatpush.msra.mxu3 %v434_v39 }
  0x2f   : > { %963 = vmatpush.msra.mxu2 %v4442_v40  ;;  %497 = vmatpush.msra.mxu0 %v434_v39  ;;  %v256_v39 = vld [vmem:[%s4462_s11 + $0x140] sm:$0xff] }
  0x30   : > { %730 = vmatpush.msra.mxu1 %v4448_v41  ;;  %4009 = vmatpush.msra.mxu3 %v433_v42 }
  0x31   : > { %964 = vmatpush.msra.mxu2 %v4457_v43  ;;  %498 = vmatpush.msra.mxu0 %v433_v42  ;;  %v258_v42 = vld [vmem:[%s4462_s11 + $0x150] sm:$0xff] }
  0x32   : > { %731 = vmatpush.msra.mxu1 %v449_v44  ;;  %4010 = vmatpush.msra.mxu3 %v432_v45 }
  0x33   : > { %965 = vmatpush.msra.mxu2 %v4475_v46  ;;  %662 = vmatmul.f32.vlgmr.msra.gmra.mxu3 %v378_v47  ;;  %v262_v47 = vld [vmem:[%s4462_s11 + $0x170] sm:$0xff] }
  0x34   : > { %966 = vmatmul.f32.vlgmr.msra.gmra.mxu2 %v218_v48  ;;  %499 = vmatpush.msra.mxu0 %v432_v45  ;;  %v263_v45 = vld [vmem:[%s4462_s11 + $0x178] sm:$0xff]  ;;  %v4579_v48 = vld [vmem:[%s5845_s2] ss:$0 sm:$0xff] }
  0x35   : > { %732 = vmatpush.msra.mxu1 %v448_v49  ;;  %500 = vmatmul.f32.vlgmr.msra.gmra.mxu0 %v216_v50  ;;  %v266_v50 = vld [vmem:[%s4462_s11 + $0x190] sm:$0xff] }
  0x36   : > { %4011 = vmatpush.msrb.mxu3 %v4249_v4  ;;  %733 = vmatmul.f32.vlgmr.msra.gmra.mxu1 %v217_v51  ;;  %v228_v4 = vld [vmem:[%s4462_s11 + $0x60] sm:$0xff] }
  0x38   : > { %4012 = vmatpush.msrb.mxu3 %v4263_v7  ;;  %v393_v7 = vld [vmem:[%s4462_s11 + $0x588] sm:$0xff] }
  0x3a   : > { %4013 = vmatpush.msrb.mxu3 %v4269_v8  ;;  %v233_v8 = vld [vmem:[%s4462_s11 + $0x88] sm:$0xff] }
  0x3b   : > { %665 = vmatmul.f32.gmra.mxu3 %v381_v52  ;;  %v264_v52 = vld [vmem:[%s4462_s11 + $0x180] sm:$0xff] }
  0x3c   : > { %969 = vmatmul.f32.gmra.mxu2 %v221_v53  ;;  %4014 = vmatpush.msrb.mxu3 %v4284_v11  ;;  %v232_v11 = vld [vmem:[%s4462_s11 + $0x80] sm:$0xff] }
  0x3d   : > { %503 = vmatmul.f32.gmra.mxu0 %v219_v54 }
  0x3e   : > { %736 = vmatmul.f32.gmra.mxu1 %v220_v55  ;;  %4015 = vmatpush.msrb.mxu3 %v4299_v14  ;;  %v237_v14 = vld [vmem:[%s4462_s11 + $0xa8] sm:$0xff] }
  0x3f   : > { %v265_v55 = vld [vmem:[%s4462_s11 + $0x188] sm:$0xff] }
  0x40   : > { %4016 = vmatpush.msrb.mxu3 %v4314_v17  ;;  %v242_v17 = vld [vmem:[%s4462_s11 + $0xd0] sm:$0xff] }
  0x42   : > { %4017 = vmatpush.msrb.mxu3 %v4330_v20  ;;  %v405_v20 = vld [vmem:[%s4462_s11 + $0x5e8] sm:$0xff] }
  0x43   : > { %668 = vmatmul.f32.gmra.mxu3 %v384_v56 }
  0x44   : > { %972 = vmatmul.f32.gmra.mxu2 %v224_v57  ;;  %4018 = vmatpush.msrb.mxu3 %v4345_v23  ;;  %v244_v23 = vld [vmem:[%s4462_s11 + $0xe0] sm:$0xff] }
  0x45   : > { %506 = vmatmul.f32.gmra.mxu0 %v222_v58 }
  0x46   : > { %739 = vmatmul.f32.gmra.mxu1 %v223_v59  ;;  %4019 = vmatpush.msrb.mxu3 %v4366_v26  ;;  %v246_v26 = vld [vmem:[%s4462_s11 + $0xf0] sm:$0xff] }
  0x48   : > { %4020 = vmatpush.msrb.mxu3 %v4381_v29  ;;  %v251_v29 = vld [vmem:[%s4462_s11 + $0x118] sm:$0xff] }
  0x4a   : > { %4021 = vmatpush.msrb.mxu3 %v4402_v32  ;;  %v414_v32 = vld [vmem:[%s4462_s11 + $0x630] sm:$0xff] }
  0x4b   : > { %671 = vmatmul.f32.gmra.mxu3 %v387_v60  ;;  %v429_v60 = vld [vmem:[%s4462_s11 + $0x6a8] sm:$0xff] }
  0x4c   : > { %975 = vmatmul.f32.gmra.mxu2 %v227_v61  ;;  %4022 = vmatpush.msrb.mxu3 %v4417_v35  ;;  %v253_v35 = vld [vmem:[%s4462_s11 + $0x128] sm:$0xff] }
  0x4d   : > { %509 = vmatmul.f32.gmra.mxu0 %v225_v62  ;;  %v269_v61 = vld [vmem:[%s4462_s11 + $0x1a8] sm:$0xff] }
  0x4e   : > { %742 = vmatmul.f32.gmra.mxu1 %v226_v63  ;;  %4023 = vmatpush.msrb.mxu3 %v4433_v38  ;;  %v255_v38 = vld [vmem:[%s4462_s11 + $0x138] sm:$0xff] }
  0x4f   : > { %v267_v63 = vld [vmem:[%s4462_s11 + $0x198] sm:$0xff] }
  0x50   : > { %4024 = vmatpush.msrb.mxu3 %v4448_v41  ;;  %v260_v41 = vld [vmem:[%s4462_s11 + $0x160] sm:$0xff] }
  0x52   : > { %4025 = vmatpush.msrb.mxu3 %v449_v44  ;;  %v423_v44 = vld [vmem:[%s4462_s11 + $0x678] sm:$0xff] }
  0x53   : > { %674 = vmatmul.f32.gmra.mxu3 %v390_v0 }
  0x54   : > { %978 = vmatmul.f32.gmra.mxu2 %v230_v2  ;;  %4026 = vmatpush.msrb.mxu3 %v448_v49  ;;  %v426_v49 = vld [vmem:[%s4462_s11 + $0x690] sm:$0xff]  ;;  %v268_v2 = vld [vmem:[%s4462_s11 + $0x1a0] sm:$0xff] }
  0x55   : > { %512 = vmatmul.f32.gmra.mxu0 %v228_v4 }
  0x56   : > { %4027 = vmatpush.msra.mxu3 %v4235_v1  ;;  %745 = vmatmul.f32.gmra.mxu1 %v229_v5  ;;  %v396_v1 = vld [vmem:[%s4462_s11 + $0x5a0] sm:$0xff] }
  0x58   : > { %4028 = vmatpush.msra.mxu3 %v4244_v3  ;;  %v236_v3 = vld [vmem:[%s4462_s11 + $0xa0] sm:$0xff] }
  0x5a   : > { %4029 = vmatpush.msra.mxu3 %v4258_v6  ;;  %v235_v6 = vld [vmem:[%s4462_s11 + $0x98] sm:$0xff] }
  0x5b   : > { %677 = vmatmul.f32.gmra.mxu3 %v393_v7 }
  0x5c   : > { %981 = vmatmul.f32.gmra.mxu2 %v233_v8  ;;  %4030 = vmatpush.msra.mxu3 %v4278_v10  ;;  %v399_v10 = vld [vmem:[%s4462_s11 + $0x5b8] sm:$0xff] }
  0x5d   : > { %515 = vmatmul.f32.gmra.mxu0 %v231_v9 }
  0x5e   : > { %748 = vmatmul.f32.gmra.mxu1 %v232_v11  ;;  %4031 = vmatpush.msra.mxu3 %v4293_v13  ;;  %v239_v13 = vld [vmem:[%s4462_s11 + $0xb8] sm:$0xff] }
  0x5f   : > { %v379_v11 = vld [vmem:[%s4462_s11 + $0x518] sm:$0xff] }
  0x60   : > { %4032 = vmatpush.msra.mxu3 %v4308_v16  ;;  %v402_v16 = vld [vmem:[%s4462_s11 + $0x5d0] sm:$0xff] }
  0x62   : > { %4033 = vmatpush.msra.mxu3 %v4323_v19  ;;  %v241_v19 = vld [vmem:[%s4462_s11 + $0xc8] sm:$0xff] }
  0x63   : > { %680 = vmatmul.f32.gmra.mxu3 %v396_v1  ;;  %v272_v1 = vld [vmem:[%s4462_s11 + $0x1c0] sm:$0xff] }
  0x64   : > { %984 = vmatmul.f32.gmra.mxu2 %v236_v3  ;;  %4034 = vmatpush.msra.mxu3 %v4339_v22  ;;  %v243_v22 = vld [vmem:[%s4462_s11 + $0xd8] sm:$0xff] }
  0x65   : > { %518 = vmatmul.f32.gmra.mxu0 %v234_v12  ;;  %v270_v12 = vld [vmem:[%s4462_s11 + $0x1b0] sm:$0xff] }
  0x66   : > { %751 = vmatmul.f32.gmra.mxu1 %v235_v6  ;;  %4035 = vmatpush.msra.mxu3 %v4354_v25  ;;  %v248_v25 = vld [vmem:[%s4462_s11 + $0x100] sm:$0xff] }
  0x68   : > { %4036 = vmatpush.msra.mxu3 %v4375_v28  ;;  %v411_v28 = vld [vmem:[%s4462_s11 + $0x618] sm:$0xff] }
  0x6a   : > { %4037 = vmatpush.msra.mxu3 %v4390_v31  ;;  %v250_v31 = vld [vmem:[%s4462_s11 + $0x110] sm:$0xff] }
  0x6b   : > { %683 = vmatmul.f32.gmra.mxu3 %v399_v10 }
  0x6c   : > { %987 = vmatmul.f32.gmra.mxu2 %v239_v13  ;;  %4038 = vmatpush.msra.mxu3 %v4411_v34  ;;  %v252_v34 = vld [vmem:[%s4462_s11 + $0x120] sm:$0xff]  ;;  %v271_v13 = vld [vmem:[%s4462_s11 + $0x1b8] sm:$0xff] }
  0x6d   : > { %521 = vmatmul.f32.gmra.mxu0 %v237_v14 }
  0x6e   : > { %754 = vmatmul.f32.gmra.mxu1 %v238_v15  ;;  %4039 = vmatpush.msra.mxu3 %v4426_v37  ;;  %v257_v37 = vld [vmem:[%s4462_s11 + $0x148] sm:$0xff] }
  0x70   : > { %4040 = vmatpush.msra.mxu3 %v4442_v40  ;;  %v420_v40 = vld [vmem:[%s4462_s11 + $0x660] sm:$0xff] }
  0x72   : > { %4041 = vmatpush.msra.mxu3 %v4457_v43  ;;  %v259_v43 = vld [vmem:[%s4462_s11 + $0x158] sm:$0xff] }
  0x73   : > { %686 = vmatmul.f32.gmra.mxu3 %v402_v16 }
  0x74   : > { %990 = vmatmul.f32.gmra.mxu2 %v242_v17  ;;  %4042 = vmatpush.msra.mxu3 %v4475_v46  ;;  %v261_v46 = vld [vmem:[%s4462_s11 + $0x168] sm:$0xff] }
  0x75   : > { %524 = vmatmul.f32.gmra.mxu0 %v240_v18  ;;  %v382_v18 = vld [vmem:[%s4462_s11 + $0x530] sm:$0xff] }
  0x76   : > { %757 = vmatmul.f32.gmra.mxu1 %v241_v19  ;;  %v275_v19 = vld [vmem:[%s4462_s11 + $0x1d8] sm:$0xff] }
  0x7b   : > { %689 = vmatmul.f32.gmra.mxu3 %v405_v20 }
  0x7c   : > { %993 = vmatmul.f32.gmra.mxu2 %v245_v21 }
  0x7d   : > { %527 = vmatmul.f32.gmra.mxu0 %v243_v22  ;;  %v273_v22 = vld [vmem:[%s4462_s11 + $0x1c8] sm:$0xff] }
  0x7e   : > { %760 = vmatmul.f32.gmra.mxu1 %v244_v23 }
  0x83   : > { %692 = vmatmul.f32.gmra.mxu3 %v408_v24  ;;  %v274_v24 = vld [vmem:[%s4462_s11 + $0x1d0] sm:$0xff] }
  0x84   : > { %996 = vmatmul.f32.gmra.mxu2 %v248_v25 }
  0x85   : > { %530 = vmatmul.f32.gmra.mxu0 %v246_v26 }
  0x86   : > { %763 = vmatmul.f32.gmra.mxu1 %v247_v27 }
  0x8b   : > { %695 = vmatmul.f32.gmra.mxu3 %v411_v28 }
  0x8c   : > { %999 = vmatmul.f32.gmra.mxu2 %v251_v29 }
  0x8d   : > { %533 = vmatmul.f32.gmra.mxu0 %v249_v30 }
  0x8e   : > { %766 = vmatmul.f32.gmra.mxu1 %v250_v31 }
  0x93   : > { %698 = vmatmul.f32.gmra.mxu3 %v414_v32 }
  0x94   : > { %1002 = vmatmul.f32.gmra.mxu2 %v254_v33 }
  0x95   : > { %536 = vmatmul.f32.gmra.mxu0 %v252_v34 }
  0x96   : > { %769 = vmatmul.f32.gmra.mxu1 %v253_v35  ;;  %v385_v35 = vld [vmem:[%s4462_s11 + $0x548] sm:$0xff] }
  0x9b   : > { %701 = vmatmul.f32.gmra.mxu3 %v417_v36  ;;  %v278_v36 = vld [vmem:[%s4462_s11 + $0x1f0] sm:$0xff] }
  0x9c   : > { %1005 = vmatmul.f32.gmra.mxu2 %v257_v37 }
  0x9d   : > { %539 = vmatmul.f32.gmra.mxu0 %v255_v38 }
  0x9e   : > { %772 = vmatmul.f32.gmra.mxu1 %v256_v39 }
  0xa3   : > { %704 = vmatmul.f32.gmra.mxu3 %v420_v40 }
  0xa4   : > { %1008 = vmatmul.f32.gmra.mxu2 %v260_v41  ;;  %v276_v41 = vld [vmem:[%s4462_s11 + $0x1e0] sm:$0xff] }
  0xa5   : > { %542 = vmatmul.f32.gmra.mxu0 %v258_v42 }
  0xa6   : > { %775 = vmatmul.f32.gmra.mxu1 %v259_v43 }
  0xab   : > { %707 = vmatmul.f32.gmra.mxu3 %v423_v44 }
  0xac   : > { %1011 = vmatmul.f32.gmra.mxu2 %v263_v45 }
  0xad   : > { %545 = vmatmul.f32.gmra.mxu0 %v261_v46 }
  0xae   : > { %778 = vmatmul.f32.gmra.mxu1 %v262_v47  ;;  %v277_v47 = vld [vmem:[%s4462_s11 + $0x1e8] sm:$0xff] }
  0xb2   : > { %v501_v51 = vpop.f32.mrf.mxu0 }
  0xb3   : > { %v502_v53 = vadd.f32 %v4579_v48, %v501_v51  ;;  %710 = vmatmul.f32.gmra.mxu3 %v426_v49  ;;  %v734_v54 = vpop.f32.mrf.mxu1 }
  0xb4   : > { %1014 = vmatmul.f32.gmra.mxu2 %v266_v50 }
  0xb5   : > { %v735_v56 = vadd.f32 %v734_v54, %v502_v53  ;;  %548 = vmatmul.f32.gmra.mxu0 %v264_v52 }
  0xb6   : > { %v4589_v57 = vpop.f32.mrf.mxu3  ;;  %781 = vmatmul.f32.gmra.mxu1 %v265_v55 }
  0xb7   : > { %v967_v58 = vpop.f32.mrf.mxu2 }
  0xb8   : > { %v968_v59 = vadd.f32 %v967_v58, %v735_v56 }
  0xba   : > { %1184 = vst.msk [vmem:[%s4593_s6] sm:$0xff] %vm1183_vm0, %v968_v59  ;;  %v504_v62 = vpop.f32.mrf.mxu0  ;;  %v1256_v20 = vmax.f32 %v968_v59, 0.0 }
  0xbb   : > { %713 = vmatmul.f32.gmra.mxu3 %v429_v60  ;;  %v737_v0 = vpop.f32.mrf.mxu1  ;;  %v505_v4 = vadd.f32 %v4579_v48, %v504_v62 }
  0xbc   : > { %1017 = vmatmul.f32.gmra.mxu2 %v269_v61  ;;  %v1400_v26 = vrot.slane %v1256_v20, 2  ;;  %v1401_v27 = vrot.slane %v1256_v20, 4  ;;  %v1402_v31 = vrot.slane %v1256_v20, 6  ;;  %v3703_v32 = vrot.slane %v1256_v20, 9 }
  0xbd   : > { %551 = vmatmul.f32.gmra.mxu0 %v267_v63  ;;  %v738_v5 = vadd.f32 %v737_v0, %v505_v4 }
  0xbe   : > { %v4600_v7 = vpop.f32.mrf.mxu3  ;;  %784 = vmatmul.f32.gmra.mxu1 %v268_v2  ;;  %v3704_v37 = vrot.slane %v1400_v26, 9  ;;  %v3705_v38 = vrot.slane %v1401_v27, 9  ;;  %v3706_v42 = vrot.slane %v1402_v31, 9  ;;  %v2696_v43 = vmax.f32 %v1256_v20, %v3703_v32 }
  0xbf   : > { %v970_v8 = vpop.f32.mrf.mxu2 }
  0xc0   : > { %v971_v9 = vadd.f32 %v970_v8, %v738_v5  ;;  %v2697_v0 = vmax.f32 %v1400_v26, %v3704_v37  ;;  %v2698_v2 = vmax.f32 %v1401_v27, %v3705_v38  ;;  %v2699_v4 = vmax.f32 %v1402_v31, %v3706_v42 }
  0xc2   : > { %1185 = vst.msk [vmem:[%s4593_s6 + $0x8] sm:$0xff] %vm1183_vm0, %v971_v9  ;;  %v507_v3 = vpop.f32.mrf.mxu0  ;;  %v4623_v33 = vmax.f32 %v971_v9, 0.0 }
  0xc3   : > { %v508_v6 = vadd.f32 %v4579_v48, %v507_v3  ;;  %895 = vmatmul.f32.vlgmr.msrb.gmra.mxu3 %v379_v11  ;;  %v740_v10 = vpop.f32.mrf.mxu1  ;;  %v388_v3 = vld [vmem:[%s4462_s11 + $0x560] sm:$0xff] }
  0xc4   : > { %1020 = vmatmul.f32.gmra.mxu2 %v272_v1  ;;  %v1403_v44 = vrot.slane %v4623_v33, 2  ;;  %v1404_v53 = vrot.slane %v4623_v33, 4  ;;  %v1405_v54 = vrot.slane %v4623_v33, 6  ;;  %v3707_v55 = vrot.slane %v4623_v33, 9 }
  0xc5   : > { %v741_v14 = vadd.f32 %v740_v10, %v508_v6  ;;  %554 = vmatmul.f32.gmra.mxu0 %v270_v12  ;;  %v281_v12 = vld [vmem:[%s4462_s11 + $0x208] sm:$0xff] }
  0xc6   : > { %v4609_v15 = vpop.f32.mrf.mxu3  ;;  %787 = vmatmul.f32.gmra.mxu1 %v271_v13  ;;  %v3708_v6 = vrot.slane %v1403_v44, 9  ;;  %v3709_v10 = vrot.slane %v1404_v53, 9  ;;  %v3710_v13 = vrot.slane %v1405_v54, 9 }
  0xc7   : > { %v973_v16 = vpop.f32.mrf.mxu2 }
  0xc8   : > { %v4611_v17 = vadd.f32 %v973_v16, %v741_v14  ;;  %v2700_v16 = vmax.f32 %v4623_v33, %v3707_v55 }
  0xca   : > { %1186 = vst.msk [vmem:[%s4593_s6 + $0x10] sm:$0xff] %vm1183_vm0, %v4611_v17  ;;  %v510_v21 = vpop.f32.mrf.mxu0 }
  0xcb   : > { %898 = vmatmul.f32.gmra.mxu3 %v382_v18  ;;  %v743_v23 = vpop.f32.mrf.mxu1  ;;  %v511_v25 = vadd.f32 %v4579_v48, %v510_v21 }
  0xcc   : > { %1023 = vmatmul.f32.gmra.mxu2 %v275_v19 }
  0xcd   : > { %557 = vmatmul.f32.gmra.mxu0 %v273_v22  ;;  %v744_v28 = vadd.f32 %v743_v23, %v511_v25  ;;  %v279_v22 = vld [vmem:[%s4462_s11 + $0x1f8] sm:$0xff] }
  0xce   : > { %v4621_v29 = vpop.f32.mrf.mxu3  ;;  %790 = vmatmul.f32.gmra.mxu1 %v274_v24 }
  0xcf   : > { %v976_v30 = vpop.f32.mrf.mxu2 }
  0xd0   : > { %v977_v34 = vadd.f32 %v976_v30, %v744_v28  ;;  %v280_v28 = vld [vmem:[%s4462_s11 + $0x200] sm:$0xff] }
  0xd2   : > { %1187 = vst.msk [vmem:[%s4593_s6 + $0x18] sm:$0xff] %vm1183_vm0, %v977_v34  ;;  %v1259_v39 = vmax.f32 %v977_v34, 0.0  ;;  %v513_v40 = vpop.f32.mrf.mxu0 }
  0xd3   : > { %v514_v45 = vadd.f32 %v4579_v48, %v513_v40  ;;  %901 = vmatmul.f32.gmra.mxu3 %v385_v35  ;;  %v746_v46 = vpop.f32.mrf.mxu1  ;;  %v2702_v40 = vmax.f32 %v1404_v53, %v3709_v10  ;;  %v284_v53 = vld [vmem:[%s4462_s11 + $0x220] sm:$0xff] }
  0xd4   : > { %1026 = vmatmul.f32.gmra.mxu2 %v278_v36  ;;  %v1409_v49 = vrot.slane %v1259_v39, 2  ;;  %v1410_v50 = vrot.slane %v1259_v39, 4  ;;  %v1411_v51 = vrot.slane %v1259_v39, 6  ;;  %v3715_v52 = vrot.slane %v1259_v39, 9 }
  0xd5   : > { %v747_v56 = vadd.f32 %v746_v46, %v514_v45  ;;  %560 = vmatmul.f32.gmra.mxu0 %v276_v41  ;;  %v2703_v46 = vmax.f32 %v1405_v54, %v3710_v13 }
  0xd6   : > { %v3716_v58 = vrot.slane %v1409_v49, 9  ;;  %v3717_v59 = vrot.slane %v1410_v50, 9  ;;  %v3718_v60 = vrot.slane %v1411_v51, 9  ;;  %v2708_v61 = vmax.f32 %v1259_v39, %v3715_v52  ;;  %v4636_v62 = vpop.f32.mrf.mxu3  ;;  %793 = vmatmul.f32.gmra.mxu1 %v277_v47  ;;  %v391_v52 = vld [vmem:[%s4462_s11 + $0x578] sm:$0xff] }
  0xd7   : > { %v979_v63 = vpop.f32.mrf.mxu2  ;;  %v2701_v39 = vmax.f32 %v1403_v44, %v3708_v6 }
  0xd8   : > { %v980_v5 = vadd.f32 %v979_v63, %v747_v56  ;;  %v2709_v8 = vmax.f32 %v1409_v49, %v3716_v58  ;;  %v2710_v9 = vmax.f32 %v1410_v50, %v3717_v59  ;;  %v2711_v11 = vmax.f32 %v1411_v51, %v3718_v60 }
  0xd9   : > { %v2984_v1 = vmax.f32 %v2696_v43, %v2708_v61  ;;  %v282_v61 = vld [vmem:[%s4462_s11 + $0x210] sm:$0xff] }
  0xda   : > { %1188 = vst.msk [vmem:[%s4593_s6 + $0x20] sm:$0xff] %vm1183_vm0, %v980_v5  ;;  %v1260_v14 = vmax.f32 %v980_v5, 0.0  ;;  %v2985_v18 = vmax.f32 %v2697_v0, %v2709_v8  ;;  %v2986_v19 = vmax.f32 %v2698_v2, %v2710_v9  ;;  %v2987_v20 = vmax.f32 %v2699_v4, %v2711_v11  ;;  %v516_v21 = vpop.f32.mrf.mxu0  ;;  %v283_v8 = vld [vmem:[%s4462_s11 + $0x218] sm:$0xff] }
  0xdb   : > { %904 = vmatmul.f32.gmra.mxu3 %v388_v3  ;;  %v749_v27 = vpop.f32.mrf.mxu1  ;;  %v3272_v30 = vperm.slane %v2984_v1, 0  ;;  %v517_v34 = vadd.f32 %v4579_v48, %v516_v21 }
  0xdc   : > { %v1412_v23 = vrot.slane %v1260_v14, 2  ;;  %v1413_v24 = vrot.slane %v1260_v14, 4  ;;  %v1414_v25 = vrot.slane %v1260_v14, 6  ;;  %v3719_v26 = vrot.slane %v1260_v14, 9  ;;  %1029 = vmatmul.f32.gmra.mxu2 %v281_v12 }
  0xdd   : > { %v3273_v31 = vperm.slane %v2985_v18, 0  ;;  %v3274_v32 = vperm.slane %v2986_v19, 0  ;;  %563 = vmatmul.f32.gmra.mxu0 %v279_v22  ;;  %v750_v42 = vadd.f32 %v749_v27, %v517_v34  ;;  %v3275_v55 = vperm.slane %v2987_v20, 0  ;;  %v394_v18 = vld [vmem:[%s4462_s11 + $0x590] sm:$0xff]  ;;  %v287_v19 = vld [vmem:[%s4462_s11 + $0x238] sm:$0xff]  ;;  %v285_v22 = vld [vmem:[%s4462_s11 + $0x228] sm:$0xff] }
  0xde   : > { %v3720_v35 = vrot.slane %v1412_v23, 9  ;;  %v3721_v36 = vrot.slane %v1413_v24, 9  ;;  %v3722_v37 = vrot.slane %v1414_v25, 9  ;;  %v2712_v38 = vmax.f32 %v1260_v14, %v3719_v26  ;;  %v4664_v43 = vpop.f32.mrf.mxu3  ;;  %796 = vmatmul.f32.gmra.mxu1 %v280_v28  ;;  %v397_v34 = vld [vmem:[%s4462_s11 + $0x5a8] sm:$0xff] }
  0xdf   : > { %v3417_v41 = vsel %vm3416_vm1, %v3273_v31, %v3272_v30  ;;  %v982_v45 = vpop.f32.mrf.mxu2  ;;  %v4694_v20 = vmax.f32 %v4611_v17, 0.0 }
  0xe0   : > { %v2713_v47 = vmax.f32 %v1412_v23, %v3720_v35  ;;  %v2714_v49 = vmax.f32 %v1413_v24, %v3721_v36  ;;  %v2715_v33 = vmax.f32 %v1414_v25, %v3722_v37  ;;  %v3419_v44 = vsel %vm3418_vm2, %v3274_v32, %v3417_v41  ;;  %v286_v24 = vld [vmem:[%s4462_s11 + $0x230] sm:$0xff] }
  0xe1   : > { %v2988_v50 = vmax.f32 %v2700_v16, %v2712_v38  ;;  %v983_v51 = vadd.f32 %v982_v45, %v750_v42  ;;  %v3421_v63 = vsel %vm3420_vm3, %v3275_v55, %v3419_v44  ;;  %v1406_v27 = vrot.slane %v4694_v20, 2  ;;  %v290_v35 = vld [vmem:[%s4462_s11 + $0x250] sm:$0xff]  ;;  %v288_v42 = vld [vmem:[%s4462_s11 + $0x240] sm:$0xff] }
  0xe2   : > { %v2989_v56 = vmax.f32 %v2701_v39, %v2713_v47  ;;  %v2990_v58 = vmax.f32 %v2702_v40, %v2714_v49  ;;  %v2991_v59 = vmax.f32 %v2703_v46, %v2715_v33  ;;  %v519_v54 = vpop.f32.mrf.mxu0  ;;  %v1407_v36 = vrot.slane %v4694_v20, 4  ;;  %v289_v49 = vld [vmem:[%s4462_s11 + $0x248] sm:$0xff] }
  0xe3   : > { %v3276_v60 = vperm.slane %v2988_v50, 0  ;;  %1189 = vst.msk [vmem:[%s4593_s6 + $0x28] sm:$0xff] %vm1183_vm0, %v983_v51  ;;  %v520_v4 = vadd.f32 %v4579_v48, %v519_v54  ;;  %907 = vmatmul.f32.gmra.mxu3 %v391_v52  ;;  %v752_v5 = vpop.f32.mrf.mxu1  ;;  %v1261_v16 = vmax.f32 %v983_v51, 0.0  ;;  %v3712_v37 = vrot.slane %v1406_v27, 9 }
  0xe4   : > { %v3277_v0 = vperm.slane %v2989_v56, 0  ;;  %v3278_v2 = vperm.slane %v2990_v58, 0  ;;  %1032 = vmatmul.f32.gmra.mxu2 %v284_v53  ;;  %v3279_v11 = vperm.slane %v2991_v59, 0  ;;  %v1408_v33 = vrot.slane %v4694_v20, 6 }
  0xe5   : > { %v3423_v9 = vsel %vm3422_vm4, %v3276_v60, %v3421_v63  ;;  %v753_v3 = vadd.f32 %v752_v5, %v520_v4  ;;  %566 = vmatmul.f32.gmra.mxu0 %v282_v61  ;;  %v1415_v25 = vrot.slane %v1261_v16, 2  ;;  %v1416_v17 = vrot.slane %v1261_v16, 4  ;;  %v400_v4 = vld [vmem:[%s4462_s11 + $0x5c0] sm:$0xff]  ;;  %v293_v5 = vld [vmem:[%s4462_s11 + $0x268] sm:$0xff] }
  0xe6   : > { %v3425_v1 = vsel %vm3424_vm5, %v3277_v0, %v3423_v9  ;;  %v4684_v6 = vpop.f32.mrf.mxu3  ;;  %799 = vmatmul.f32.gmra.mxu1 %v283_v8  ;;  %v1417_v38 = vrot.slane %v1261_v16, 6  ;;  %v3723_v39 = vrot.slane %v1261_v16, 9  ;;  %v3711_v44 = vrot.slane %v4694_v20, 9 }
  0xe7   : > { %v3427_v12 = vsel %vm3426_vm6, %v3278_v2, %v3425_v1  ;;  %v985_v10 = vpop.f32.mrf.mxu2  ;;  %v3724_v31 = vrot.slane %v1415_v25, 9  ;;  %v3725_v45 = vrot.slane %v1416_v17, 9  ;;  %v3713_v51 = vrot.slane %v1407_v36, 9 }
  0xe8   : > { %v3429_v13 = vsel %vm3428_vm7, %v3279_v11, %v3427_v12  ;;  %v986_v14 = vadd.f32 %v985_v10, %v753_v3  ;;  %v2705_v53 = vmax.f32 %v1406_v27, %v3712_v37  ;;  %v3726_v55 = vrot.slane %v1417_v38, 9  ;;  %v291_v3 = vld [vmem:[%s4462_s11 + $0x258] sm:$0xff] }
  0xe9   : > { %3567 = vst.msk [vmem:[%s4680_s20] sm:$0xff] %vm1183_vm0, %v3429_v13  ;;  %v2717_v50 = vmax.f32 %v1415_v25, %v3724_v31  ;;  %v2716_v56 = vmax.f32 %v1261_v16, %v3723_v39  ;;  %v2718_v60 = vmax.f32 %v1416_v17, %v3725_v45  ;;  %v3714_v63 = vrot.slane %v1408_v33, 9  ;;  %v294_v45 = vld [vmem:[%s4462_s11 + $0x270] sm:$0xff] }
  0xea   : > { %1190 = vst.msk [vmem:[%s4593_s6 + $0x30] sm:$0xff] %vm1183_vm0, %v986_v14  ;;  %v522_v21 = vpop.f32.mrf.mxu0  ;;  %v4714_v54 = vmax.f32 %v986_v14, 0.0  ;;  %v2704_v0 = vmax.f32 %v4694_v20, %v3711_v44  ;;  %v2706_v8 = vmax.f32 %v1407_v36, %v3713_v51  ;;  %v2719_v9 = vmax.f32 %v1417_v38, %v3726_v55  ;;  %v292_v14 = vld [vmem:[%s4462_s11 + $0x260] sm:$0xff] }
  0xeb   : > { %910 = vmatmul.f32.gmra.mxu3 %v394_v18  ;;  %v755_v23 = vpop.f32.mrf.mxu1  ;;  %v523_v26 = vadd.f32 %v4579_v48, %v522_v21  ;;  %v2993_v2 = vmax.f32 %v2705_v53, %v2717_v50  ;;  %v2707_v16 = vmax.f32 %v1408_v33, %v3714_v63  ;;  %v295_v50 = vld [vmem:[%s4462_s11 + $0x278] sm:$0xff] }
  0xec   : > { %1035 = vmatmul.f32.gmra.mxu2 %v287_v19  ;;  %v2992_v11 = vmax.f32 %v2704_v0, %v2716_v56  ;;  %v2994_v12 = vmax.f32 %v2706_v8, %v2718_v60  ;;  %v1418_v10 = vrot.slane %v4714_v54, 2  ;;  %v1419_v20 = vrot.slane %v4714_v54, 4 }
  0xed   : > { %569 = vmatmul.f32.gmra.mxu0 %v285_v22  ;;  %v756_v32 = vadd.f32 %v755_v23, %v523_v26  ;;  %v3281_v18 = vperm.slane %v2993_v2, 0  ;;  %v2995_v21 = vmax.f32 %v2707_v16, %v2719_v9  ;;  %v3727_v23 = vrot.slane %v4714_v54, 9  ;;  %v299_v16 = vld [vmem:[%s4462_s11 + $0x298] sm:$0xff] }
  0xee   : > { %v4700_v28 = vpop.f32.mrf.mxu3  ;;  %802 = vmatmul.f32.gmra.mxu1 %v286_v24  ;;  %v3280_v22 = vperm.slane %v2992_v11, 0  ;;  %v3282_v27 = vperm.slane %v2994_v12, 0  ;;  %v3728_v17 = vrot.slane %v1418_v10, 9  ;;  %v3729_v36 = vrot.slane %v1419_v20, 9 }
  0xef   : > { %v988_v30 = vpop.f32.mrf.mxu2  ;;  %v3283_v38 = vperm.slane %v2995_v21, 0  ;;  %v2720_v39 = vmax.f32 %v4714_v54, %v3727_v23 }
  0xf0   : > { %v989_v40 = vadd.f32 %v988_v30, %v756_v32  ;;  %v1420_v30 = vrot.slane %v4714_v54, 6  ;;  %v3430_v31 = vsel %vm3416_vm1, %v3281_v18, %v3280_v22  ;;  %v2722_v55 = vmax.f32 %v1419_v20, %v3729_v36  ;;  %v298_v36 = vld [vmem:[%s4462_s11 + $0x290] sm:$0xff] }
  0xf2   : > { %v525_v41 = vpop.f32.mrf.mxu0  ;;  %1191 = vst.msk [vmem:[%s4593_s6 + $0x38] sm:$0xff] %vm1183_vm0, %v989_v40  ;;  %v4736_v37 = vmax.f32 %v989_v40, 0.0 }
  0xf3   : > { %v526_v46 = vadd.f32 %v4579_v48, %v525_v41  ;;  %913 = vmatmul.f32.gmra.mxu3 %v397_v34  ;;  %v758_v47 = vpop.f32.mrf.mxu1  ;;  %v403_v34 = vld [vmem:[%s4462_s11 + $0x5d8] sm:$0xff] }
  0xf4   : > { %1038 = vmatmul.f32.gmra.mxu2 %v290_v35  ;;  %v296_v35 = vld [vmem:[%s4462_s11 + $0x280] sm:$0xff]  ;;  %v1421_v56 = vrot.slane %v4736_v37, 2  ;;  %v1423_v11 = vrot.slane %v4736_v37, 6  ;;  %v3731_v18 = vrot.slane %v4736_v37, 9 }
  0xf5   : > { %v759_v52 = vadd.f32 %v758_v47, %v526_v46  ;;  %572 = vmatmul.f32.gmra.mxu0 %v288_v42  ;;  %v3431_v46 = vsel %vm3418_vm2, %v3282_v27, %v3430_v31  ;;  %v3730_v47 = vrot.slane %v1420_v30, 9 }
  0xf6   : > { %v4712_v58 = vpop.f32.mrf.mxu3  ;;  %805 = vmatmul.f32.gmra.mxu1 %v289_v49  ;;  %v2721_v49 = vmax.f32 %v1418_v10, %v3728_v17  ;;  %v3432_v8 = vsel %vm3420_vm3, %v3283_v38, %v3431_v46  ;;  %v3734_v38 = vrot.slane %v1423_v11, 9 }
  0xf7   : > { %v991_v59 = vpop.f32.mrf.mxu2  ;;  %v2723_v9 = vmax.f32 %v1420_v30, %v3730_v47  ;;  %v297_v30 = vld [vmem:[%s4462_s11 + $0x288] sm:$0xff] }
  0xf8   : > { %v4716_v61 = vadd.f32 %v991_v59, %v759_v52  ;;  %v1422_v59 = vrot.slane %v4736_v37, 4 }
  0xfa   : > { %1192 = vst.msk [vmem:[%s4593_s6 + $0x40] sm:$0xff] %vm1183_vm0, %v4716_v61  ;;  %v528_v1 = vpop.f32.mrf.mxu0  ;;  %v3733_v20 = vrot.slane %v1422_v59, 9  ;;  %v4762_v46 = vmax.f32 %v4716_v61, 0.0 }
  0xfb   : > { %916 = vmatmul.f32.gmra.mxu3 %v400_v4  ;;  %v761_v13 = vpop.f32.mrf.mxu1  ;;  %v529_v19 = vadd.f32 %v4579_v48, %v528_v1 }
  0xfc   : > { %1041 = vmatmul.f32.gmra.mxu2 %v293_v5 }
  0xfd   : > { %575 = vmatmul.f32.gmra.mxu0 %v291_v3  ;;  %v762_v24 = vadd.f32 %v761_v13, %v529_v19  ;;  %v3732_v19 = vrot.slane %v1421_v56, 9 }
  0xfe   : > { %v4730_v25 = vpop.f32.mrf.mxu3  ;;  %808 = vmatmul.f32.gmra.mxu1 %v292_v14  ;;  %v406_v14 = vld [vmem:[%s4462_s11 + $0x5f0] sm:$0xff] }
  0xff   : > { %v994_v26 = vpop.f32.mrf.mxu2 }
 0x100   : > { %v995_v32 = vadd.f32 %v994_v26, %v762_v24 }
 0x102   : > { %1193 = vst.msk [vmem:[%s4593_s6 + $0x48] sm:$0xff] %vm1183_vm0, %v995_v32  ;;  %v1265_v41 = vmax.f32 %v995_v32, 0.0  ;;  %v531_v42 = vpop.f32.mrf.mxu0 }
 0x103   : > { %v532_v33 = vadd.f32 %v4579_v48, %v531_v42  ;;  %919 = vmatmul.f32.gmra.mxu3 %v403_v34  ;;  %v764_v44 = vpop.f32.mrf.mxu1 }
 0x104   : > { %1044 = vmatmul.f32.gmra.mxu2 %v296_v35  ;;  %v1427_v40 = vrot.slane %v1265_v41, 2  ;;  %v1428_v51 = vrot.slane %v1265_v41, 4  ;;  %v1429_v52 = vrot.slane %v1265_v41, 6  ;;  %v3739_v53 = vrot.slane %v1265_v41, 9 }
 0x105   : > { %v765_v60 = vadd.f32 %v764_v44, %v532_v33  ;;  %578 = vmatmul.f32.gmra.mxu0 %v294_v45  ;;  %v2725_v45 = vmax.f32 %v1421_v56, %v3732_v19 }
 0x106   : > { %v3740_v54 = vrot.slane %v1427_v40, 9  ;;  %v3741_v63 = vrot.slane %v1428_v51, 9  ;;  %v3742_v0 = vrot.slane %v1429_v52, 9  ;;  %v2732_v2 = vmax.f32 %v1265_v41, %v3739_v53  ;;  %v4747_v4 = vpop.f32.mrf.mxu3  ;;  %811 = vmatmul.f32.gmra.mxu1 %v295_v50 }
 0x107   : > { %v997_v5 = vpop.f32.mrf.mxu2 }
 0x108   : > { %v998_v1 = vadd.f32 %v997_v5, %v765_v60  ;;  %v2733_v3 = vmax.f32 %v1427_v40, %v3740_v54  ;;  %v2734_v12 = vmax.f32 %v1428_v51, %v3741_v63  ;;  %v2735_v10 = vmax.f32 %v1429_v52, %v3742_v0  ;;  %v302_v5 = vld [vmem:[%s4462_s11 + $0x2b0] sm:$0xff] }
 0x109   : > { %v2996_v13 = vmax.f32 %v2720_v39, %v2732_v2  ;;  %v2724_v60 = vmax.f32 %v4736_v37, %v3731_v18  ;;  %v2726_v54 = vmax.f32 %v1422_v59, %v3733_v20  ;;  %v409_v2 = vld [vmem:[%s4462_s11 + $0x608] sm:$0xff]  ;;  %v300_v59 = vld [vmem:[%s4462_s11 + $0x2a0] sm:$0xff] }
 0x10a   : > { %1194 = vst.msk [vmem:[%s4593_s6 + $0x50] sm:$0xff] %vm1183_vm0, %v998_v1  ;;  %v1266_v21 = vmax.f32 %v998_v1, 0.0  ;;  %v2997_v22 = vmax.f32 %v2721_v49, %v2733_v3  ;;  %v2998_v23 = vmax.f32 %v2722_v55, %v2734_v12  ;;  %v2999_v24 = vmax.f32 %v2723_v9, %v2735_v10  ;;  %v534_v27 = vpop.f32.mrf.mxu0  ;;  %v301_v20 = vld [vmem:[%s4462_s11 + $0x2a8] sm:$0xff] }
 0x10b   : > { %v3284_v26 = vperm.slane %v2996_v13, 0  ;;  %922 = vmatmul.f32.gmra.mxu3 %v406_v14  ;;  %v767_v35 = vpop.f32.mrf.mxu1  ;;  %v535_v40 = vadd.f32 %v4579_v48, %v534_v27  ;;  %v1425_v9 = vrot.slane %v4762_v46, 4  ;;  %v1426_v1 = vrot.slane %v4762_v46, 6 }
 0x10c   : > { %v1430_v17 = vrot.slane %v1266_v21, 2  ;;  %v1431_v31 = vrot.slane %v1266_v21, 4  ;;  %v1432_v32 = vrot.slane %v1266_v21, 6  ;;  %v3743_v34 = vrot.slane %v1266_v21, 9  ;;  %1047 = vmatmul.f32.gmra.mxu2 %v299_v16 }
 0x10d   : > { %v3285_v39 = vperm.slane %v2997_v22, 0  ;;  %v3286_v41 = vperm.slane %v2998_v23, 0  ;;  %v3433_v42 = vsel %vm3422_vm4, %v3284_v26, %v3432_v8  ;;  %581 = vmatmul.f32.gmra.mxu0 %v297_v30  ;;  %v3287_v33 = vperm.slane %v2999_v24, 0 }
 0x10e   : > { %v3744_v47 = vrot.slane %v1430_v17, 9  ;;  %v3745_v49 = vrot.slane %v1431_v31, 9  ;;  %v2736_v50 = vmax.f32 %v1266_v21, %v3743_v34  ;;  %v4766_v51 = vpop.f32.mrf.mxu3  ;;  %814 = vmatmul.f32.gmra.mxu1 %v298_v36  ;;  %v3746_v61 = vrot.slane %v1432_v32, 9 }
 0x10f   : > { %v3434_v44 = vsel %vm3424_vm5, %v3285_v39, %v3433_v42  ;;  %v1000_v52 = vpop.f32.mrf.mxu2  ;;  %v768_v0 = vadd.f32 %v767_v35, %v535_v40  ;;  %v1424_v8 = vrot.slane %v4762_v46, 2  ;;  %v2727_v21 = vmax.f32 %v1423_v11, %v3734_v38 }
 0x110   : > { %v3435_v53 = vsel %vm3426_vm6, %v3286_v41, %v3434_v44  ;;  %v2737_v55 = vmax.f32 %v1430_v17, %v3744_v47  ;;  %v2738_v56 = vmax.f32 %v1431_v31, %v3745_v49  ;;  %v3000_v12 = vmax.f32 %v2724_v60, %v2736_v50  ;;  %v305_v44 = vld [vmem:[%s4462_s11 + $0x2c8] sm:$0xff] }
 0x111   : > { %v3436_v63 = vsel %vm3428_vm7, %v3287_v33, %v3435_v53  ;;  %v1001_v10 = vadd.f32 %v1000_v52, %v768_v0  ;;  %v2739_v14 = vmax.f32 %v1432_v32, %v3746_v61  ;;  %v3735_v22 = vrot.slane %v4762_v46, 9  ;;  %v412_v33 = vld [vmem:[%s4462_s11 + $0x620] sm:$0xff] }
 0x112   : > { %3568 = vst.msk [vmem:[%s4680_s20 + $0x8] sm:$0xff] %vm1183_vm0, %v3436_v63  ;;  %v3001_v3 = vmax.f32 %v2725_v45, %v2737_v55  ;;  %v537_v13 = vpop.f32.mrf.mxu0  ;;  %v3002_v16 = vmax.f32 %v2726_v54, %v2738_v56  ;;  %v3736_v26 = vrot.slane %v1424_v8, 9  ;;  %v3737_v27 = vrot.slane %v1425_v9, 9  ;;  %v303_v63 = vld [vmem:[%s4462_s11 + $0x2b8] sm:$0xff] }
 0x113   : > { %v538_v18 = vadd.f32 %v4579_v48, %v537_v13  ;;  %925 = vmatmul.f32.gmra.mxu3 %v409_v2  ;;  %v770_v19 = vpop.f32.mrf.mxu1  ;;  %1195 = vst.msk [vmem:[%s4593_s6 + $0x58] sm:$0xff] %vm1183_vm0, %v1001_v10  ;;  %v1267_v24 = vmax.f32 %v1001_v10, 0.0  ;;  %v3738_v30 = vrot.slane %v1426_v1, 9  ;;  %v3288_v31 = vperm.slane %v3000_v12, 0 }
 0x114   : > { %1050 = vmatmul.f32.gmra.mxu2 %v302_v5  ;;  %v3289_v23 = vperm.slane %v3001_v3, 0  ;;  %v3003_v11 = vmax.f32 %v2727_v21, %v2739_v14  ;;  %v3290_v38 = vperm.slane %v3002_v16, 0  ;;  %v2728_v50 = vmax.f32 %v4762_v46, %v3735_v22  ;;  %v304_v46 = vld [vmem:[%s4462_s11 + $0x2c0] sm:$0xff]  ;;  %v415_v22 = vld [vmem:[%s4462_s11 + $0x638] sm:$0xff] }
 0x115   : > { %v771_v17 = vadd.f32 %v770_v19, %v538_v18  ;;  %584 = vmatmul.f32.gmra.mxu0 %v300_v59  ;;  %v1433_v32 = vrot.slane %v1267_v24, 2  ;;  %v1434_v34 = vrot.slane %v1267_v24, 4  ;;  %v1435_v35 = vrot.slane %v1267_v24, 6 }
 0x116   : > { %v4786_v36 = vpop.f32.mrf.mxu3  ;;  %817 = vmatmul.f32.gmra.mxu1 %v301_v20  ;;  %v3747_v39 = vrot.slane %v1267_v24, 9  ;;  %v3437_v42 = vsel %vm3416_vm1, %v3289_v23, %v3288_v31  ;;  %v2729_v40 = vmax.f32 %v1424_v8, %v3736_v26  ;;  %v2730_v52 = vmax.f32 %v1425_v9, %v3737_v27  ;;  %v308_v23 = vld [vmem:[%s4462_s11 + $0x2e0] sm:$0xff] }
 0x117   : > { %v1003_v37 = vpop.f32.mrf.mxu2  ;;  %v3748_v45 = vrot.slane %v1433_v32, 9  ;;  %v3749_v47 = vrot.slane %v1434_v34, 9  ;;  %v3750_v49 = vrot.slane %v1435_v35, 9  ;;  %v2731_v61 = vmax.f32 %v1426_v1, %v3738_v30 }
 0x118   : > { %v4788_v41 = vadd.f32 %v1003_v37, %v771_v17  ;;  %v2740_v53 = vmax.f32 %v1267_v24, %v3747_v39  ;;  %v3438_v0 = vsel %vm3418_vm2, %v3290_v38, %v3437_v42  ;;  %v3291_v3 = vperm.slane %v3003_v11, 0  ;;  %v306_v17 = vld [vmem:[%s4462_s11 + $0x2d0] sm:$0xff] }
 0x119   : > { %v2741_v55 = vmax.f32 %v1433_v32, %v3748_v45  ;;  %v2742_v56 = vmax.f32 %v1434_v34, %v3749_v47  ;;  %v2743_v60 = vmax.f32 %v1435_v35, %v3750_v49  ;;  %v307_v34 = vld [vmem:[%s4462_s11 + $0x2d8] sm:$0xff]  ;;  %v418_v42 = vld [vmem:[%s4462_s11 + $0x650] sm:$0xff] }
 0x11a   : > { %1196 = vst.msk [vmem:[%s4593_s6 + $0x60] sm:$0xff] %vm1183_vm0, %v4788_v41  ;;  %v540_v54 = vpop.f32.mrf.mxu0  ;;  %v3004_v2 = vmax.f32 %v2728_v50, %v2740_v53  ;;  %v3439_v1 = vsel %vm3420_vm3, %v3291_v3, %v3438_v0  ;;  %v311_v45 = vld [vmem:[%s4462_s11 + $0x2f8] sm:$0xff]  ;;  %v1268_v47 = vmax.f32 %v4788_v41, 0.0  ;;  %v310_v50 = vld [vmem:[%s4462_s11 + $0x2f0] sm:$0xff]  ;;  %v421_v0 = vld [vmem:[%s4462_s11 + $0x668] sm:$0xff] }
 0x11b   : > { %928 = vmatmul.f32.gmra.mxu3 %v412_v33  ;;  %v773_v5 = vpop.f32.mrf.mxu1  ;;  %v3005_v8 = vmax.f32 %v2729_v40, %v2741_v55  ;;  %v3006_v9 = vmax.f32 %v2730_v52, %v2742_v56  ;;  %v3007_v12 = vmax.f32 %v2731_v61, %v2743_v60  ;;  %v541_v21 = vadd.f32 %v4579_v48, %v540_v54  ;;  %v309_v33 = vld [vmem:[%s4462_s11 + $0x2e8] sm:$0xff] }
 0x11c   : > { %1053 = vmatmul.f32.gmra.mxu2 %v305_v44  ;;  %v3292_v10 = vperm.slane %v3004_v2, 0  ;;  %v1436_v52 = vrot.slane %v1268_v47, 2  ;;  %v1437_v53 = vrot.slane %v1268_v47, 4  ;;  %v1438_v41 = vrot.slane %v1268_v47, 6  ;;  %v314_v2 = vld [vmem:[%s4462_s11 + $0x310] sm:$0xff] }
 0x11d   : > { %587 = vmatmul.f32.gmra.mxu0 %v303_v63  ;;  %v3293_v13 = vperm.slane %v3005_v8, 0  ;;  %v3294_v59 = vperm.slane %v3006_v9, 0  ;;  %v3295_v19 = vperm.slane %v3007_v12, 0  ;;  %v774_v27 = vadd.f32 %v773_v5, %v541_v21  ;;  %v312_v9 = vld [vmem:[%s4462_s11 + $0x300] sm:$0xff] }
 0x11e   : > { %v4801_v14 = vpop.f32.mrf.mxu3  ;;  %820 = vmatmul.f32.gmra.mxu1 %v304_v46  ;;  %v3440_v18 = vsel %vm3422_vm4, %v3292_v10, %v3439_v1  ;;  %v3751_v60 = vrot.slane %v1268_v47, 9  ;;  %v3752_v5 = vrot.slane %v1436_v52, 9  ;;  %v3753_v46 = vrot.slane %v1437_v53, 9 }
 0x11f   : > { %v1006_v16 = vpop.f32.mrf.mxu2  ;;  %v3441_v20 = vsel %vm3424_vm5, %v3293_v13, %v3440_v18  ;;  %v3754_v12 = vrot.slane %v1438_v41, 9 }
 0x120   : > { %v3442_v24 = vsel %vm3426_vm6, %v3294_v59, %v3441_v20  ;;  %v1007_v35 = vadd.f32 %v1006_v16, %v774_v27  ;;  %v2744_v10 = vmax.f32 %v1268_v47, %v3751_v60  ;;  %v313_v16 = vld [vmem:[%s4462_s11 + $0x308] sm:$0xff] }
 0x121   : > { %v3443_v26 = vsel %vm3428_vm7, %v3295_v19, %v3442_v24 }
 0x122   : > { %v543_v30 = vpop.f32.mrf.mxu0  ;;  %3569 = vst.msk [vmem:[%s4680_s20 + $0x10] sm:$0xff] %vm1183_vm0, %v3443_v26  ;;  %v4832_v54 = vmax.f32 %v1007_v35, 0.0 }
 0x123   : > { %v544_v31 = vadd.f32 %v4579_v48, %v543_v30  ;;  %931 = vmatmul.f32.gmra.mxu3 %v415_v22  ;;  %v776_v32 = vpop.f32.mrf.mxu1  ;;  %1197 = vst.msk [vmem:[%s4593_s6 + $0x68] sm:$0xff] %vm1183_vm0, %v1007_v35  ;;  %v2746_v35 = vmax.f32 %v1437_v53, %v3753_v46 }
 0x124   : > { %1056 = vmatmul.f32.gmra.mxu2 %v308_v23  ;;  %v1439_v1 = vrot.slane %v4832_v54, 2  ;;  %v1440_v22 = vrot.slane %v4832_v54, 4  ;;  %v1441_v23 = vrot.slane %v4832_v54, 6  ;;  %v3755_v24 = vrot.slane %v4832_v54, 9 }
 0x125   : > { %v777_v37 = vadd.f32 %v776_v32, %v544_v31  ;;  %590 = vmatmul.f32.gmra.mxu0 %v306_v17 }
 0x126   : > { %v4817_v11 = vpop.f32.mrf.mxu3  ;;  %823 = vmatmul.f32.gmra.mxu1 %v307_v34  ;;  %v2745_v34 = vmax.f32 %v1436_v52, %v3752_v5  ;;  %v2748_v60 = vmax.f32 %v4832_v54, %v3755_v24  ;;  %v4857_v54 = vld [vmem:[%s5845_s2] ss:$0 sm:$0xff] }
 0x127   : > { %v1009_v38 = vpop.f32.mrf.mxu2 }
 0x128   : > { %v4819_v39 = vadd.f32 %v1009_v38, %v777_v37  ;;  %v2747_v37 = vmax.f32 %v1438_v41, %v3754_v12 }
 0x12a   : > { %1198 = vst.msk [vmem:[%s4593_s6 + $0x70] sm:$0xff] %vm1183_vm0, %v4819_v39  ;;  %v546_v49 = vpop.f32.mrf.mxu0 }
 0x12b   : > { %934 = vmatmul.f32.gmra.mxu3 %v418_v42  ;;  %v779_v44 = vpop.f32.mrf.mxu1  ;;  %v547_v40 = vadd.f32 %v4579_v48, %v546_v49 }
 0x12c   : > { %1059 = vmatmul.f32.gmra.mxu2 %v311_v45 }
 0x12d   : > { %593 = vmatmul.f32.gmra.mxu0 %v309_v33  ;;  %v780_v61 = vadd.f32 %v779_v44, %v547_v40  ;;  %v424_v33 = vld [vmem:[%s4462_s11 + $0x680] sm:$0xff]  ;;  %v317_v44 = vld [vmem:[%s4462_s11 + $0x328] sm:$0xff]  ;;  %v3757_v40 = vrot.slane %v1440_v22, 9 }
 0x12e   : > { %v4830_v55 = vpop.f32.mrf.mxu3  ;;  %826 = vmatmul.f32.gmra.mxu1 %v310_v50  ;;  %v3756_v50 = vrot.slane %v1439_v1, 9 }
 0x12f   : > { %v1012_v56 = vpop.f32.mrf.mxu2  ;;  %v2750_v24 = vmax.f32 %v1440_v22, %v3757_v40 }
 0x130   : > { %v1013_v63 = vadd.f32 %v1012_v56, %v780_v61  ;;  %v3758_v61 = vrot.slane %v1441_v23, 9 }
 0x132   : > { %1199 = vst.msk [vmem:[%s4593_s6 + $0x78] sm:$0xff] %vm1183_vm0, %v1013_v63  ;;  %v1271_v3 = vmax.f32 %v1013_v63, 0.0  ;;  %v549_v8 = vpop.f32.mrf.mxu0 }
 0x133   : > { %v550_v13 = vadd.f32 %v4579_v48, %v549_v8  ;;  %937 = vmatmul.f32.gmra.mxu3 %v421_v0  ;;  %v782_v59 = vpop.f32.mrf.mxu1  ;;  %v315_v0 = vld [vmem:[%s4462_s11 + $0x318] sm:$0xff] }
 0x134   : > { %1062 = vmatmul.f32.gmra.mxu2 %v314_v2  ;;  %v1445_v18 = vrot.slane %v1271_v3, 2  ;;  %v1446_v19 = vrot.slane %v1271_v3, 4  ;;  %v1447_v20 = vrot.slane %v1271_v3, 6  ;;  %v3763_v21 = vrot.slane %v1271_v3, 9 }
 0x135   : > { %v783_v26 = vadd.f32 %v782_v59, %v550_v13  ;;  %596 = vmatmul.f32.gmra.mxu0 %v312_v9  ;;  %v316_v9 = vld [vmem:[%s4462_s11 + $0x320] sm:$0xff] }
 0x136   : > { %v3764_v27 = vrot.slane %v1445_v18, 9  ;;  %v3765_v48 = vrot.slane %v1446_v19, 9  ;;  %v3766_v30 = vrot.slane %v1447_v20, 9  ;;  %v2756_v17 = vmax.f32 %v1271_v3, %v3763_v21  ;;  %v4845_v31 = vpop.f32.mrf.mxu3  ;;  %829 = vmatmul.f32.gmra.mxu1 %v313_v16 }
 0x137   : > { %v1015_v32 = vpop.f32.mrf.mxu2  ;;  %v2749_v21 = vmax.f32 %v1439_v1, %v3756_v50  ;;  %v320_v1 = vld [vmem:[%s4462_s11 + $0x340] sm:$0xff] }
 0x138   : > { %v1016_v38 = vadd.f32 %v1015_v32, %v783_v26  ;;  %v2757_v42 = vmax.f32 %v1445_v18, %v3764_v27  ;;  %v2758_v45 = vmax.f32 %v1446_v19, %v3765_v48  ;;  %v2759_v47 = vmax.f32 %v1447_v20, %v3766_v30 }
 0x139   : > { %v3008_v49 = vmax.f32 %v2744_v10, %v2756_v17  ;;  %v2751_v17 = vmax.f32 %v1441_v23, %v3758_v61  ;;  %v318_v23 = vld [vmem:[%s4462_s11 + $0x330] sm:$0xff] }
 0x13a   : > { %1200 = vst.msk [vmem:[%s4593_s6 + $0x80] sm:$0xff] %vm1183_vm0, %v1016_v38  ;;  %v1272_v56 = vmax.f32 %v1016_v38, 0.0  ;;  %v3009_v52 = vmax.f32 %v2745_v34, %v2757_v42  ;;  %v3010_v53 = vmax.f32 %v2746_v35, %v2758_v45  ;;  %v3011_v41 = vmax.f32 %v2747_v37, %v2759_v47  ;;  %v552_v63 = vpop.f32.mrf.mxu0  ;;  %v427_v45 = vld [vmem:[%s4462_s11 + $0x698] sm:$0xff] }
 0x13b   : > { %940 = vmatmul.f32.gmra.mxu3 %v424_v33  ;;  %v785_v8 = vpop.f32.mrf.mxu1  ;;  %v3296_v12 = vperm.slane %v3008_v49, 0  ;;  %v553_v59 = vadd.f32 %v4857_v54, %v552_v63  ;;  %v664_v63 = vadd.f32 %v4857_v54, %v4589_v57 }
 0x13c   : > { %v1448_v2 = vrot.slane %v1272_v56, 2  ;;  %v1449_v5 = vrot.slane %v1272_v56, 4  ;;  %v1450_v46 = vrot.slane %v1272_v56, 6  ;;  %v3767_v3 = vrot.slane %v1272_v56, 9  ;;  %1065 = vmatmul.f32.gmra.mxu2 %v317_v44 }
 0x13d   : > { %v3297_v10 = vperm.slane %v3009_v52, 0  ;;  %v3298_v13 = vperm.slane %v3010_v53, 0  ;;  %599 = vmatmul.f32.gmra.mxu0 %v315_v0  ;;  %v786_v27 = vadd.f32 %v785_v8, %v553_v59  ;;  %v3299_v22 = vperm.slane %v3011_v41, 0  ;;  %v319_v53 = vld [vmem:[%s4462_s11 + $0x338] sm:$0xff]  ;;  %v430_v59 = vld [vmem:[%s4462_s11 + $0x6b0] sm:$0xff] }
 0x13e   : > { %v3768_v16 = vrot.slane %v1448_v2, 9  ;;  %v3769_v18 = vrot.slane %v1449_v5, 9  ;;  %v3770_v19 = vrot.slane %v1450_v46, 9  ;;  %v2760_v20 = vmax.f32 %v1272_v56, %v3767_v3  ;;  %v4861_v48 = vpop.f32.mrf.mxu3  ;;  %832 = vmatmul.f32.gmra.mxu1 %v316_v9 }
 0x13f   : > { %v3444_v26 = vsel %vm3416_vm1, %v3297_v10, %v3296_v12  ;;  %v1018_v30 = vpop.f32.mrf.mxu2 }
 0x140   : > { %v2761_v32 = vmax.f32 %v1448_v2, %v3768_v16  ;;  %v2762_v34 = vmax.f32 %v1449_v5, %v3769_v18  ;;  %v2763_v35 = vmax.f32 %v1450_v46, %v3770_v19  ;;  %v3445_v37 = vsel %vm3418_vm2, %v3298_v13, %v3444_v26  ;;  %v323_v16 = vld [vmem:[%s4462_s11 + $0x358] sm:$0xff]  ;;  %v321_v19 = vld [vmem:[%s4462_s11 + $0x348] sm:$0xff] }
 0x141   : > { %v3012_v38 = vmax.f32 %v2748_v60, %v2760_v20  ;;  %v1019_v42 = vadd.f32 %v1018_v30, %v786_v27  ;;  %v3446_v40 = vsel %vm3420_vm3, %v3299_v22, %v3445_v37  ;;  %v4883_v13 = vmax.f32 %v4819_v39, 0.0 }
 0x142   : > { %v3013_v47 = vmax.f32 %v2749_v21, %v2761_v32  ;;  %v3014_v49 = vmax.f32 %v2750_v24, %v2762_v34  ;;  %v3015_v33 = vmax.f32 %v2751_v17, %v2763_v35  ;;  %v555_v50 = vpop.f32.mrf.mxu0  ;;  %v322_v24 = vld [vmem:[%s4462_s11 + $0x350] sm:$0xff]  ;;  %v667_v30 = vadd.f32 %v4857_v54, %v4600_v7 }
 0x143   : > { %v3300_v44 = vperm.slane %v3012_v38, 0  ;;  %1201 = vst.msk [vmem:[%s4593_s6 + $0x88] sm:$0xff] %vm1183_vm0, %v1019_v42  ;;  %v556_v52 = vadd.f32 %v4857_v54, %v555_v50  ;;  %943 = vmatmul.f32.gmra.mxu3 %v427_v45  ;;  %v788_v60 = vpop.f32.mrf.mxu1  ;;  %v4878_v12 = vmax.f32 %v1019_v42, 0.0  ;;  %v1442_v26 = vrot.slane %v4883_v13, 2  ;;  %v326_v45 = vld [vmem:[%s4462_s11 + $0x370] sm:$0xff] }
 0x144   : > { %v3301_v61 = vperm.slane %v3013_v47, 0  ;;  %v3302_v56 = vperm.slane %v3014_v49, 0  ;;  %1068 = vmatmul.f32.gmra.mxu2 %v320_v1  ;;  %v3303_v0 = vperm.slane %v3015_v33, 0  ;;  %v1443_v34 = vrot.slane %v4883_v13, 4  ;;  %v380_v1 = vld [vmem:[%s4462_s11 + $0x520] sm:$0xff] }
 0x145   : > { %v3447_v41 = vsel %vm3422_vm4, %v3300_v44, %v3446_v40  ;;  %v789_v5 = vadd.f32 %v788_v60, %v556_v52  ;;  %602 = vmatmul.f32.gmra.mxu0 %v318_v23  ;;  %v1451_v20 = vrot.slane %v4878_v12, 2  ;;  %v1452_v39 = vrot.slane %v4878_v12, 4  ;;  %v324_v23 = vld [vmem:[%s4462_s11 + $0x360] sm:$0xff]  ;;  %v325_v60 = vld [vmem:[%s4462_s11 + $0x368] sm:$0xff] }
 0x146   : > { %v3448_v2 = vsel %vm3424_vm5, %v3301_v61, %v3447_v41  ;;  %v896_v3 = vpop.f32.mrf.mxu3  ;;  %835 = vmatmul.f32.gmra.mxu1 %v319_v53  ;;  %v3760_v37 = vrot.slane %v1442_v26, 9  ;;  %v1453_v22 = vrot.slane %v4878_v12, 6  ;;  %v3771_v47 = vrot.slane %v4878_v12, 9 }
 0x147   : > { %v3449_v46 = vsel %vm3426_vm6, %v3302_v56, %v3448_v2  ;;  %v1021_v8 = vpop.f32.mrf.mxu2  ;;  %v4880_v10 = vadd.f32 %v896_v3, %v664_v63  ;;  %v3772_v35 = vrot.slane %v1451_v20, 9  ;;  %v3773_v7 = vrot.slane %v1452_v39, 9 }
 0x148   : > { %v3450_v9 = vsel %vm3428_vm7, %v3303_v0, %v3449_v46  ;;  %v1022_v57 = vadd.f32 %v1021_v8, %v789_v5  ;;  %v1444_v49 = vrot.slane %v4883_v13, 6  ;;  %v3759_v33 = vrot.slane %v4883_v13, 9 }
 0x149   : > { %3570 = vst.msk [vmem:[%s4680_s20 + $0x18] sm:$0xff] %vm1183_vm0, %v3450_v9  ;;  %v3761_v40 = vrot.slane %v1443_v34, 9  ;;  %v2765_v61 = vmax.f32 %v1451_v20, %v3772_v35  ;;  %v670_v53 = vadd.f32 %v4857_v54, %v4609_v15  ;;  %v2753_v41 = vmax.f32 %v1442_v26, %v3760_v37  ;;  %v329_v20 = vld [vmem:[%s4462_s11 + $0x388] sm:$0xff]  ;;  %v328_v35 = vld [vmem:[%s4462_s11 + $0x380] sm:$0xff] }
 0x14a   : > { %1202 = vst.msk [vmem:[%s4593_s6 + $0x90] sm:$0xff] %vm1183_vm0, %v1022_v57  ;;  %v558_v18 = vpop.f32.mrf.mxu0  ;;  %v3774_v63 = vrot.slane %v1453_v22, 9  ;;  %v2764_v0 = vmax.f32 %v4878_v12, %v3771_v47  ;;  %v2766_v2 = vmax.f32 %v1452_v39, %v3773_v7  ;;  %v3762_v46 = vrot.slane %v1444_v49, 9  ;;  %v383_v12 = vld [vmem:[%s4462_s11 + $0x538] sm:$0xff] }
 0x14b   : > { %946 = vmatmul.f32.gmra.mxu3 %v430_v59  ;;  %v791_v21 = vpop.f32.mrf.mxu1  ;;  %v559_v27 = vadd.f32 %v4857_v54, %v558_v18  ;;  %v2752_v3 = vmax.f32 %v4883_v13, %v3759_v33  ;;  %v1274_v8 = vmax.f32 %v1022_v57, 0.0  ;;  %v2754_v15 = vmax.f32 %v1443_v34, %v3761_v40 }
 0x14c   : > { %1071 = vmatmul.f32.gmra.mxu2 %v323_v16  ;;  %v3017_v16 = vmax.f32 %v2753_v41, %v2765_v61  ;;  %v676_v41 = vadd.f32 %v4857_v54, %v4636_v62 }
 0x14d   : > { %605 = vmatmul.f32.gmra.mxu0 %v321_v19  ;;  %v792_v38 = vadd.f32 %v791_v21, %v559_v27  ;;  %v2767_v21 = vmax.f32 %v1453_v22, %v3774_v63  ;;  %v3018_v26 = vmax.f32 %v2754_v15, %v2766_v2  ;;  %v1454_v57 = vrot.slane %v1274_v8, 2  ;;  %v327_v27 = vld [vmem:[%s4462_s11 + $0x378] sm:$0xff] }
 0x14e   : > { %v899_v17 = vpop.f32.mrf.mxu3  ;;  %838 = vmatmul.f32.gmra.mxu1 %v322_v24  ;;  %v3016_v24 = vmax.f32 %v2752_v3, %v2764_v0  ;;  %v1455_v13 = vrot.slane %v1274_v8, 4  ;;  %v3775_v47 = vrot.slane %v1274_v8, 9  ;;  %v4942_v63 = vadd.f32 %v4857_v54, %v4664_v43 }
 0x14f   : > { %v1024_v32 = vpop.f32.mrf.mxu2  ;;  %v4900_v42 = vadd.f32 %v899_v17, %v667_v30  ;;  %v2755_v30 = vmax.f32 %v1444_v49, %v3762_v46  ;;  %v3305_v17 = vperm.slane %v3017_v16, 0  ;;  %v3306_v22 = vperm.slane %v3018_v26, 0 }
 0x150   : > { %v1025_v44 = vadd.f32 %v1024_v32, %v792_v38  ;;  %v1456_v32 = vrot.slane %v1274_v8, 6  ;;  %v673_v38 = vadd.f32 %v4857_v54, %v4621_v29  ;;  %v3776_v7 = vrot.slane %v1454_v57, 9 }
 0x151   : > { %v3777_v49 = vrot.slane %v1455_v13, 9 }
 0x152   : > { %v561_v50 = vpop.f32.mrf.mxu0  ;;  %1203 = vst.msk [vmem:[%s4593_s6 + $0x98] sm:$0xff] %vm1183_vm0, %v1025_v44  ;;  %v3778_v61 = vrot.slane %v1456_v32, 9  ;;  %v2769_v46 = vmax.f32 %v1454_v57, %v3776_v7 }
 0x153   : > { %v562_v56 = vadd.f32 %v4857_v54, %v561_v50  ;;  %1128 = vmatmul.f32.vlgmr.msra.gmra.mxu3 %v380_v1  ;;  %v794_v52 = vpop.f32.mrf.mxu1  ;;  %v3304_v1 = vperm.slane %v3016_v24, 0 }
 0x154   : > { %1074 = vmatmul.f32.gmra.mxu2 %v326_v45  ;;  %v3019_v45 = vmax.f32 %v2755_v30, %v2767_v21  ;;  %v2771_v15 = vmax.f32 %v1456_v32, %v3778_v61 }
 0x155   : > { %v795_v5 = vadd.f32 %v794_v52, %v562_v56  ;;  %608 = vmatmul.f32.gmra.mxu0 %v324_v23  ;;  %v3451_v40 = vsel %vm3416_vm1, %v3305_v17, %v3304_v1  ;;  %v4932_v56 = vmax.f32 %v1025_v44, 0.0 }
 0x156   : > { %v902_v9 = vpop.f32.mrf.mxu3  ;;  %841 = vmatmul.f32.gmra.mxu1 %v325_v60  ;;  %v332_v60 = vld [vmem:[%s4462_s11 + $0x3a0] sm:$0xff]  ;;  %v3307_v0 = vperm.slane %v3019_v45, 0  ;;  %v3452_v2 = vsel %vm3418_vm2, %v3306_v22, %v3451_v40 }
 0x157   : > { %v1027_v59 = vpop.f32.mrf.mxu2  ;;  %v4917_v18 = vadd.f32 %v902_v9, %v670_v53  ;;  %v386_v53 = vld [vmem:[%s4462_s11 + $0x550] sm:$0xff]  ;;  %v1457_v16 = vrot.slane %v4932_v56, 2  ;;  %v1458_v26 = vrot.slane %v4932_v56, 4  ;;  %v1459_v57 = vrot.slane %v4932_v56, 6 }
 0x158   : > { %v4919_v19 = vadd.f32 %v1027_v59, %v795_v5  ;;  %v2768_v5 = vmax.f32 %v1274_v8, %v3775_v47  ;;  %v330_v9 = vld [vmem:[%s4462_s11 + $0x390] sm:$0xff]  ;;  %v2770_v59 = vmax.f32 %v1455_v13, %v3777_v49 }
 0x159   : > { %v3782_v40 = vrot.slane %v1459_v57, 9 }
 0x15a   : > { %1204 = vst.msk [vmem:[%s4593_s6 + $0xa0] sm:$0xff] %vm1183_vm0, %v4919_v19  ;;  %v564_v39 = vpop.f32.mrf.mxu0 }
 0x15b   : > { %1131 = vmatmul.f32.gmra.mxu3 %v383_v12  ;;  %v797_v34 = vpop.f32.mrf.mxu1  ;;  %v565_v37 = vadd.f32 %v4857_v54, %v564_v39  ;;  %v3779_v39 = vrot.slane %v4932_v56, 9 }
 0x15c   : > { %1077 = vmatmul.f32.gmra.mxu2 %v329_v20  ;;  %v331_v20 = vld [vmem:[%s4462_s11 + $0x398] sm:$0xff] }
 0x15d   : > { %611 = vmatmul.f32.gmra.mxu0 %v327_v27  ;;  %v798_v33 = vadd.f32 %v797_v34, %v565_v37  ;;  %v3453_v37 = vsel %vm3420_vm3, %v3307_v0, %v3452_v2  ;;  %v4962_v61 = vmax.f32 %v4932_v56, %v3779_v39 }
 0x15e   : > { %v905_v50 = vpop.f32.mrf.mxu3  ;;  %844 = vmatmul.f32.gmra.mxu1 %v328_v35 }
 0x15f   : > { %v1030_v23 = vpop.f32.mrf.mxu2  ;;  %v4934_v29 = vadd.f32 %v905_v50, %v673_v38  ;;  %v3780_v38 = vrot.slane %v1457_v16, 9  ;;  %v389_v50 = vld [vmem:[%s4462_s11 + $0x568] sm:$0xff] }
 0x160   : > { %v1031_v52 = vadd.f32 %v1030_v23, %v798_v33  ;;  %v335_v33 = vld [vmem:[%s4462_s11 + $0x3b8] sm:$0xff]  ;;  %v3781_v23 = vrot.slane %v1458_v26, 9 }
 0x162   : > { %1205 = vst.msk [vmem:[%s4593_s6 + $0xa8] sm:$0xff] %vm1183_vm0, %v1031_v52  ;;  %v1277_v44 = vmax.f32 %v1031_v52, 0.0  ;;  %v567_v3 = vpop.f32.mrf.mxu0 }
 0x163   : > { %v568_v62 = vadd.f32 %v4857_v54, %v567_v3  ;;  %1134 = vmatmul.f32.gmra.mxu3 %v386_v53  ;;  %v800_v43 = vpop.f32.mrf.mxu1 }
 0x164   : > { %1080 = vmatmul.f32.gmra.mxu2 %v332_v60  ;;  %v1463_v12 = vrot.slane %v1277_v44, 2  ;;  %v1464_v21 = vrot.slane %v1277_v44, 4  ;;  %v1465_v24 = vrot.slane %v1277_v44, 6  ;;  %v3787_v8 = vrot.slane %v1277_v44, 9 }
 0x165   : > { %v801_v13 = vadd.f32 %v800_v43, %v568_v62  ;;  %614 = vmatmul.f32.gmra.mxu0 %v330_v9 }
 0x166   : > { %v3788_v27 = vrot.slane %v1463_v12, 9  ;;  %v3789_v30 = vrot.slane %v1464_v21, 9  ;;  %v3790_v17 = vrot.slane %v1465_v24, 9  ;;  %v2780_v32 = vmax.f32 %v1277_v44, %v3787_v8  ;;  %v908_v34 = vpop.f32.mrf.mxu3  ;;  %847 = vmatmul.f32.gmra.mxu1 %v331_v20  ;;  %v333_v44 = vld [vmem:[%s4462_s11 + $0x3a8] sm:$0xff]  ;;  %v334_v20 = vld [vmem:[%s4462_s11 + $0x3b0] sm:$0xff] }
 0x167   : > { %v1033_v35 = vpop.f32.mrf.mxu2  ;;  %v4955_v45 = vadd.f32 %v908_v34, %v676_v41  ;;  %v2774_v34 = vmax.f32 %v1458_v26, %v3781_v23 }
 0x168   : > { %v1034_v1 = vadd.f32 %v1033_v35, %v801_v13  ;;  %v2781_v22 = vmax.f32 %v1463_v12, %v3788_v27  ;;  %v2782_v47 = vmax.f32 %v1464_v21, %v3789_v30  ;;  %v2783_v7 = vmax.f32 %v1465_v24, %v3790_v17 }
 0x169   : > { %v3020_v49 = vmax.f32 %v2768_v5, %v2780_v32  ;;  %v4969_v12 = vmax.f32 %v4919_v19, 0.0 }
 0x16a   : > { %1206 = vst.msk [vmem:[%s4593_s6 + $0xb0] sm:$0xff] %vm1183_vm0, %v1034_v1  ;;  %v1278_v52 = vmax.f32 %v1034_v1, 0.0  ;;  %v3021_v60 = vmax.f32 %v2769_v46, %v2781_v22  ;;  %v3022_v53 = vmax.f32 %v2770_v59, %v2782_v47  ;;  %v3023_v41 = vmax.f32 %v2771_v15, %v2783_v7  ;;  %v570_v2 = vpop.f32.mrf.mxu0  ;;  %v338_v7 = vld [vmem:[%s4462_s11 + $0x3d0] sm:$0xff] }
 0x16b   : > { %v3308_v0 = vperm.slane %v3020_v49, 0  ;;  %1137 = vmatmul.f32.gmra.mxu3 %v389_v50  ;;  %v803_v43 = vpop.f32.mrf.mxu1  ;;  %v2773_v59 = vmax.f32 %v1457_v16, %v3780_v38  ;;  %v571_v17 = vadd.f32 %v4857_v54, %v570_v2  ;;  %v1460_v38 = vrot.slane %v4969_v12, 2  ;;  %v392_v49 = vld [vmem:[%s4462_s11 + $0x580] sm:$0xff] }
 0x16c   : > { %v1466_v5 = vrot.slane %v1278_v52, 2  ;;  %v1467_v3 = vrot.slane %v1278_v52, 4  ;;  %v1468_v9 = vrot.slane %v1278_v52, 6  ;;  %v3791_v62 = vrot.slane %v1278_v52, 9  ;;  %1083 = vmatmul.f32.gmra.mxu2 %v335_v33 }
 0x16d   : > { %v3309_v21 = vperm.slane %v3021_v60, 0  ;;  %v3310_v24 = vperm.slane %v3022_v53, 0  ;;  %v3454_v46 = vsel %vm3422_vm4, %v3308_v0, %v3453_v37  ;;  %617 = vmatmul.f32.gmra.mxu0 %v333_v44  ;;  %v3311_v13 = vperm.slane %v3023_v41, 0  ;;  %v336_v41 = vld [vmem:[%s4462_s11 + $0x3c0] sm:$0xff] }
 0x16e   : > { %v3792_v15 = vrot.slane %v1466_v5, 9  ;;  %v3793_v8 = vrot.slane %v1467_v3, 9  ;;  %v3794_v39 = vrot.slane %v1468_v9, 9  ;;  %v2784_v30 = vmax.f32 %v1278_v52, %v3791_v62  ;;  %v911_v19 = vpop.f32.mrf.mxu3  ;;  %850 = vmatmul.f32.gmra.mxu1 %v334_v20 }
 0x16f   : > { %v3455_v27 = vsel %vm3424_vm5, %v3309_v21, %v3454_v46  ;;  %v1036_v32 = vpop.f32.mrf.mxu2  ;;  %v804_v22 = vadd.f32 %v803_v43, %v571_v17  ;;  %v4978_v47 = vadd.f32 %v911_v19, %v4942_v63  ;;  %v1461_v33 = vrot.slane %v4969_v12, 4 }
 0x170   : > { %v3456_v35 = vsel %vm3426_vm6, %v3310_v24, %v3455_v27  ;;  %v2785_v16 = vmax.f32 %v1466_v5, %v3792_v15  ;;  %v2786_v37 = vmax.f32 %v1467_v3, %v3793_v8  ;;  %v1462_v26 = vrot.slane %v4969_v12, 6  ;;  %v337_v3 = vld [vmem:[%s4462_s11 + $0x3c8] sm:$0xff] }
 0x171   : > { %v3457_v1 = vsel %vm3428_vm7, %v3311_v13, %v3456_v35  ;;  %v2787_v50 = vmax.f32 %v1468_v9, %v3794_v39  ;;  %v682_v52 = vadd.f32 %v4857_v54, %v4684_v6  ;;  %v3024_v60 = vmax.f32 %v4962_v61, %v2784_v30  ;;  %v395_v35 = vld [vmem:[%s4462_s11 + $0x598] sm:$0xff] }
 0x172   : > { %3571 = vst.msk [vmem:[%s4680_s20 + $0x20] sm:$0xff] %vm1183_vm0, %v3457_v1  ;;  %v3025_v23 = vmax.f32 %v2773_v59, %v2785_v16  ;;  %v1037_v53 = vadd.f32 %v1036_v32, %v804_v22  ;;  %v573_v63 = vpop.f32.mrf.mxu0  ;;  %v2775_v0 = vmax.f32 %v1459_v57, %v3782_v40  ;;  %v3026_v2 = vmax.f32 %v2774_v34, %v2786_v37  ;;  %v341_v34 = vld [vmem:[%s4462_s11 + $0x3e8] sm:$0xff] }
 0x173   : > { %v574_v44 = vadd.f32 %v4857_v54, %v573_v63  ;;  %1140 = vmatmul.f32.gmra.mxu3 %v392_v49  ;;  %v806_v5 = vpop.f32.mrf.mxu1  ;;  %v3783_v9 = vrot.slane %v4969_v12, 9  ;;  %v3784_v62 = vrot.slane %v1460_v38, 9  ;;  %v3785_v61 = vrot.slane %v1461_v33, 9 }
 0x174   : > { %1086 = vmatmul.f32.gmra.mxu2 %v338_v7  ;;  %v3313_v43 = vperm.slane %v3025_v23, 0  ;;  %1207 = vst.msk [vmem:[%s4593_s6 + $0xb8] sm:$0xff] %vm1183_vm0, %v1037_v53  ;;  %v1279_v6 = vmax.f32 %v1037_v53, 0.0  ;;  %v3786_v20 = vrot.slane %v1462_v26, 9  ;;  %v3027_v21 = vmax.f32 %v2775_v0, %v2787_v50  ;;  %v340_v0 = vld [vmem:[%s4462_s11 + $0x3e0] sm:$0xff] }
 0x175   : > { %v807_v24 = vadd.f32 %v806_v5, %v574_v44  ;;  %620 = vmatmul.f32.gmra.mxu0 %v336_v41  ;;  %v3312_v56 = vperm.slane %v3024_v60, 0  ;;  %v3314_v8 = vperm.slane %v3026_v2, 0  ;;  %v2776_v16 = vmax.f32 %v4969_v12, %v3783_v9  ;;  %v339_v60 = vld [vmem:[%s4462_s11 + $0x3d8] sm:$0xff] }
 0x176   : > { %v1469_v57 = vrot.slane %v1279_v6, 2  ;;  %v1470_v40 = vrot.slane %v1279_v6, 4  ;;  %v1471_v46 = vrot.slane %v1279_v6, 6  ;;  %v914_v59 = vpop.f32.mrf.mxu3  ;;  %853 = vmatmul.f32.gmra.mxu1 %v337_v3  ;;  %v3795_v39 = vrot.slane %v1279_v6, 9 }
 0x177   : > { %v1039_v15 = vpop.f32.mrf.mxu2  ;;  %v4997_v13 = vadd.f32 %v914_v59, %v682_v52  ;;  %v3458_v30 = vsel %vm3416_vm1, %v3313_v43, %v3312_v56  ;;  %v2777_v37 = vmax.f32 %v1460_v38, %v3784_v62  ;;  %v2778_v1 = vmax.f32 %v1461_v33, %v3785_v61  ;;  %v398_v56 = vld [vmem:[%s4462_s11 + $0x5b0] sm:$0xff] }
 0x178   : > { %v1040_v27 = vadd.f32 %v1039_v15, %v807_v24  ;;  %v3796_v17 = vrot.slane %v1469_v57, 9  ;;  %v3797_v19 = vrot.slane %v1470_v40, 9  ;;  %v3798_v32 = vrot.slane %v1471_v46, 9  ;;  %v342_v15 = vld [vmem:[%s4462_s11 + $0x3f0] sm:$0xff] }
 0x179   : > { %v2788_v22 = vmax.f32 %v1279_v6, %v3795_v39  ;;  %v2779_v7 = vmax.f32 %v1462_v26, %v3786_v20  ;;  %v3459_v53 = vsel %vm3418_vm2, %v3314_v8, %v3458_v30  ;;  %v3315_v12 = vperm.slane %v3027_v21, 0  ;;  %v343_v30 = vld [vmem:[%s4462_s11 + $0x3f8] sm:$0xff] }
 0x17a   : > { %1208 = vst.msk [vmem:[%s4593_s6 + $0xc0] sm:$0xff] %vm1183_vm0, %v1040_v27  ;;  %v2789_v49 = vmax.f32 %v1469_v57, %v3796_v17  ;;  %v2790_v50 = vmax.f32 %v1470_v40, %v3797_v19  ;;  %v2791_v23 = vmax.f32 %v1471_v46, %v3798_v32  ;;  %v576_v52 = vpop.f32.mrf.mxu0  ;;  %v685_v26 = vadd.f32 %v4857_v54, %v4700_v28  ;;  %v344_v28 = vld [vmem:[%s4462_s11 + $0x400] sm:$0xff] }
 0x17b   : > { %v3028_v63 = vmax.f32 %v2776_v16, %v2788_v22  ;;  %1143 = vmatmul.f32.gmra.mxu3 %v395_v35  ;;  %v809_v41 = vpop.f32.mrf.mxu1  ;;  %v3460_v5 = vsel %vm3420_vm3, %v3315_v12, %v3459_v53  ;;  %v577_v21 = vadd.f32 %v4857_v54, %v576_v52  ;;  %v688_v19 = vadd.f32 %v4857_v54, %v4712_v58  ;;  %v347_v22 = vld [vmem:[%s4462_s11 + $0x418] sm:$0xff]  ;;  %v346_v52 = vld [vmem:[%s4462_s11 + $0x410] sm:$0xff] }
 0x17c   : > { %1089 = vmatmul.f32.gmra.mxu2 %v341_v34  ;;  %v3029_v2 = vmax.f32 %v2777_v37, %v2789_v49  ;;  %v3030_v38 = vmax.f32 %v2778_v1, %v2790_v50  ;;  %v3031_v33 = vmax.f32 %v2779_v7, %v2791_v23  ;;  %v5029_v16 = vmax.f32 %v1040_v27, 0.0  ;;  %v401_v7 = vld [vmem:[%s4462_s11 + $0x5c8] sm:$0xff] }
 0x17d   : > { %v3316_v44 = vperm.slane %v3028_v63, 0  ;;  %623 = vmatmul.f32.gmra.mxu0 %v339_v60  ;;  %v810_v46 = vadd.f32 %v809_v41, %v577_v21  ;;  %v345_v49 = vld [vmem:[%s4462_s11 + $0x408] sm:$0xff]  ;;  %v691_v60 = vadd.f32 %v4857_v54, %v4730_v25  ;;  %v350_v25 = vld [vmem:[%s4462_s11 + $0x430] sm:$0xff] }
 0x17e   : > { %v3317_v3 = vperm.slane %v3029_v2, 0  ;;  %v3318_v9 = vperm.slane %v3030_v38, 0  ;;  %v917_v62 = vpop.f32.mrf.mxu3  ;;  %856 = vmatmul.f32.gmra.mxu1 %v340_v0  ;;  %v3319_v61 = vperm.slane %v3031_v33, 0  ;;  %v1472_v50 = vrot.slane %v5029_v16, 2 }
 0x17f   : > { %v1042_v43 = vpop.f32.mrf.mxu2  ;;  %v3461_v6 = vsel %vm3422_vm4, %v3316_v44, %v3460_v5  ;;  %v5014_v24 = vadd.f32 %v917_v62, %v685_v26  ;;  %v1473_v53 = vrot.slane %v5029_v16, 4  ;;  %v1474_v63 = vrot.slane %v5029_v16, 6  ;;  %v404_v5 = vld [vmem:[%s4462_s11 + $0x5e0] sm:$0xff] }
 0x180   : > { %v3462_v20 = vsel %vm3424_vm5, %v3317_v3, %v3461_v6  ;;  %v1043_v17 = vadd.f32 %v1042_v43, %v810_v46  ;;  %v3799_v2 = vrot.slane %v5029_v16, 9  ;;  %v3800_v38 = vrot.slane %v1472_v50, 9 }
 0x181   : > { %v3463_v57 = vsel %vm3426_vm6, %v3318_v9, %v3462_v20  ;;  %v694_v3 = vadd.f32 %v4857_v54, %v4747_v4  ;;  %v5059_v9 = vadd.f32 %v4857_v54, %v4766_v51  ;;  %v3801_v62 = vrot.slane %v1473_v53, 9  ;;  %v348_v20 = vld [vmem:[%s4462_s11 + $0x420] sm:$0xff] }
 0x182   : > { %v3464_v40 = vsel %vm3428_vm7, %v3319_v61, %v3463_v57  ;;  %v579_v59 = vpop.f32.mrf.mxu0  ;;  %1209 = vst.msk [vmem:[%s4593_s6 + $0xc8] sm:$0xff] %vm1183_vm0, %v1043_v17  ;;  %v5049_v33 = vmax.f32 %v1043_v17, 0.0  ;;  %v3802_v43 = vrot.slane %v1474_v63, 9  ;;  %v2792_v21 = vmax.f32 %v5029_v16, %v3799_v2 }
 0x183   : > { %3572 = vst.msk [vmem:[%s4680_s20 + $0x28] sm:$0xff] %vm1183_vm0, %v3464_v40  ;;  %v580_v8 = vadd.f32 %v4857_v54, %v579_v59  ;;  %1146 = vmatmul.f32.gmra.mxu3 %v398_v56  ;;  %v812_v39 = vpop.f32.mrf.mxu1  ;;  %v349_v40 = vld [vmem:[%s4462_s11 + $0x428] sm:$0xff] }
 0x184   : > { %1092 = vmatmul.f32.gmra.mxu2 %v344_v28  ;;  %v2793_v28 = vmax.f32 %v1472_v50, %v3800_v38  ;;  %v1475_v56 = vrot.slane %v5049_v33, 2 }
 0x185   : > { %v813_v32 = vadd.f32 %v812_v39, %v580_v8  ;;  %626 = vmatmul.f32.gmra.mxu0 %v342_v15  ;;  %v1476_v8 = vrot.slane %v5049_v33, 4  ;;  %v1477_v39 = vrot.slane %v5049_v33, 6 }
 0x186   : > { %v920_v34 = vpop.f32.mrf.mxu3  ;;  %859 = vmatmul.f32.gmra.mxu1 %v343_v30  ;;  %v3803_v30 = vrot.slane %v5049_v33, 9 }
 0x187   : > { %v1045_v35 = vpop.f32.mrf.mxu2  ;;  %v5031_v37 = vadd.f32 %v920_v34, %v688_v19  ;;  %v3805_v2 = vrot.slane %v1476_v8, 9  ;;  %v3806_v38 = vrot.slane %v1477_v39, 9 }
 0x188   : > { %v5033_v1 = vadd.f32 %v1045_v35, %v813_v32 }
 0x18a   : > { %1210 = vst.msk [vmem:[%s4593_s6 + $0xd0] sm:$0xff] %vm1183_vm0, %v5033_v1  ;;  %v582_v58 = vpop.f32.mrf.mxu0 }
 0x18b   : > { %1149 = vmatmul.f32.gmra.mxu3 %v401_v7  ;;  %v815_v23 = vpop.f32.mrf.mxu1  ;;  %v583_v27 = vadd.f32 %v4857_v54, %v582_v58  ;;  %v2794_v7 = vmax.f32 %v1473_v53, %v3801_v62  ;;  %v2795_v58 = vmax.f32 %v1474_v63, %v3802_v43  ;;  %v2796_v53 = vmax.f32 %v5049_v33, %v3803_v30  ;;  %v351_v62 = vld [vmem:[%s4462_s11 + $0x438] sm:$0xff] }
 0x18c   : > { %1095 = vmatmul.f32.gmra.mxu2 %v347_v22 }
 0x18d   : > { %629 = vmatmul.f32.gmra.mxu0 %v345_v49  ;;  %v816_v41 = vadd.f32 %v815_v23, %v583_v27 }
 0x18e   : > { %v923_v0 = vpop.f32.mrf.mxu3  ;;  %862 = vmatmul.f32.gmra.mxu1 %v346_v52 }
 0x18f   : > { %v1048_v12 = vpop.f32.mrf.mxu2  ;;  %v5051_v44 = vadd.f32 %v923_v0, %v691_v60  ;;  %v407_v0 = vld [vmem:[%s4462_s11 + $0x5f8] sm:$0xff] }
 0x190   : > { %v1049_v26 = vadd.f32 %v1048_v12, %v816_v41  ;;  %v353_v41 = vld [vmem:[%s4462_s11 + $0x448] sm:$0xff]  ;;  %v3804_v12 = vrot.slane %v1475_v56, 9 }
 0x192   : > { %1211 = vst.msk [vmem:[%s4593_s6 + $0xd8] sm:$0xff] %vm1183_vm0, %v1049_v26  ;;  %v1283_v6 = vmax.f32 %v1049_v26, 0.0  ;;  %v585_v61 = vpop.f32.mrf.mxu0  ;;  %v2797_v30 = vmax.f32 %v1475_v56, %v3804_v12 }
 0x193   : > { %v586_v57 = vadd.f32 %v4857_v54, %v585_v61  ;;  %1152 = vmatmul.f32.gmra.mxu3 %v404_v5  ;;  %v818_v4 = vpop.f32.mrf.mxu1 }
 0x194   : > { %1098 = vmatmul.f32.gmra.mxu2 %v350_v25  ;;  %v1481_v51 = vrot.slane %v1283_v6, 2  ;;  %v1482_v46 = vrot.slane %v1283_v6, 4  ;;  %v1483_v59 = vrot.slane %v1283_v6, 6  ;;  %v3811_v15 = vrot.slane %v1283_v6, 9 }
 0x195   : > { %v819_v17 = vadd.f32 %v818_v4, %v586_v57  ;;  %632 = vmatmul.f32.gmra.mxu0 %v348_v20  ;;  %v352_v57 = vld [vmem:[%s4462_s11 + $0x440] sm:$0xff] }
 0x196   : > { %v3812_v19 = vrot.slane %v1481_v51, 9  ;;  %v3813_v32 = vrot.slane %v1482_v46, 9  ;;  %v3814_v34 = vrot.slane %v1483_v59, 9  ;;  %v2804_v35 = vmax.f32 %v1283_v6, %v3811_v15  ;;  %v926_v16 = vpop.f32.mrf.mxu3  ;;  %865 = vmatmul.f32.gmra.mxu1 %v349_v40 }
 0x197   : > { %v1051_v22 = vpop.f32.mrf.mxu2  ;;  %v5071_v49 = vadd.f32 %v926_v16, %v694_v3  ;;  %v2799_v16 = vmax.f32 %v1477_v39, %v3806_v38  ;;  %v354_v38 = vld [vmem:[%s4462_s11 + $0x450] sm:$0xff] }
 0x198   : > { %v1052_v50 = vadd.f32 %v1051_v22, %v819_v17  ;;  %v2805_v23 = vmax.f32 %v1481_v51, %v3812_v19  ;;  %v2806_v52 = vmax.f32 %v1482_v46, %v3813_v32  ;;  %v2807_v27 = vmax.f32 %v1483_v59, %v3814_v34 }
 0x199   : > { %v3032_v60 = vmax.f32 %v2792_v21, %v2804_v35  ;;  %v2798_v17 = vmax.f32 %v1476_v8, %v3805_v2  ;;  %v356_v8 = vld [vmem:[%s4462_s11 + $0x460] sm:$0xff] }
 0x19a   : > { %1212 = vst.msk [vmem:[%s4593_s6 + $0xe0] sm:$0xff] %vm1183_vm0, %v1052_v50  ;;  %v1284_v26 = vmax.f32 %v1052_v50, 0.0  ;;  %v3033_v63 = vmax.f32 %v2793_v28, %v2805_v23  ;;  %v3034_v25 = vmax.f32 %v2794_v7, %v2806_v52  ;;  %v3035_v5 = vmax.f32 %v2795_v58, %v2807_v27  ;;  %v588_v3 = vpop.f32.mrf.mxu0  ;;  %v410_v27 = vld [vmem:[%s4462_s11 + $0x610] sm:$0xff] }
 0x19b   : > { %1155 = vmatmul.f32.gmra.mxu3 %v407_v0  ;;  %v821_v21 = vpop.f32.mrf.mxu1  ;;  %v3320_v4 = vperm.slane %v3032_v60, 0  ;;  %v589_v46 = vadd.f32 %v4857_v54, %v588_v3  ;;  %v355_v3 = vld [vmem:[%s4462_s11 + $0x458] sm:$0xff] }
 0x19c   : > { %v1484_v43 = vrot.slane %v1284_v26, 2  ;;  %v1485_v6 = vrot.slane %v1284_v26, 4  ;;  %v1486_v61 = vrot.slane %v1284_v26, 6  ;;  %v3815_v20 = vrot.slane %v1284_v26, 9  ;;  %1101 = vmatmul.f32.gmra.mxu2 %v353_v41 }
 0x19d   : > { %v3321_v40 = vperm.slane %v3033_v63, 0  ;;  %v3322_v51 = vperm.slane %v3034_v25, 0  ;;  %635 = vmatmul.f32.gmra.mxu0 %v351_v62  ;;  %v822_v32 = vadd.f32 %v821_v21, %v589_v46  ;;  %v3323_v60 = vperm.slane %v3035_v5, 0  ;;  %v359_v46 = vld [vmem:[%s4462_s11 + $0x478] sm:$0xff] }
 0x19e   : > { %v3816_v59 = vrot.slane %v1484_v43, 9  ;;  %v3817_v33 = vrot.slane %v1485_v6, 9  ;;  %v3818_v28 = vrot.slane %v1486_v61, 9  ;;  %v2808_v15 = vmax.f32 %v1284_v26, %v3815_v20  ;;  %v929_v34 = vpop.f32.mrf.mxu3  ;;  %868 = vmatmul.f32.gmra.mxu1 %v352_v57 }
 0x19f   : > { %v3465_v19 = vsel %vm3416_vm1, %v3321_v40, %v3320_v4  ;;  %v1054_v35 = vpop.f32.mrf.mxu2  ;;  %v5084_v52 = vadd.f32 %v929_v34, %v5059_v9  ;;  %v700_v62 = vadd.f32 %v4857_v54, %v4786_v36 }
 0x1a0   : > { %v2809_v22 = vmax.f32 %v1484_v43, %v3816_v59  ;;  %v2810_v7 = vmax.f32 %v1485_v6, %v3817_v33  ;;  %v2811_v58 = vmax.f32 %v1486_v61, %v3818_v28  ;;  %v3466_v50 = vsel %vm3418_vm2, %v3322_v51, %v3465_v19  ;;  %v413_v59 = vld [vmem:[%s4462_s11 + $0x628] sm:$0xff]  ;;  %v358_v19 = vld [vmem:[%s4462_s11 + $0x470] sm:$0xff] }
 0x1a1   : > { %v3036_v23 = vmax.f32 %v2796_v53, %v2808_v15  ;;  %v1055_v56 = vadd.f32 %v1054_v35, %v822_v32  ;;  %v3467_v26 = vsel %vm3420_vm3, %v3323_v60, %v3466_v50  ;;  %v5109_v33 = vmax.f32 %v5033_v1, 0.0  ;;  %v357_v15 = vld [vmem:[%s4462_s11 + $0x468] sm:$0xff] }
 0x1a2   : > { %v3037_v41 = vmax.f32 %v2797_v30, %v2809_v22  ;;  %v3038_v0 = vmax.f32 %v2798_v17, %v2810_v7  ;;  %v3039_v12 = vmax.f32 %v2799_v16, %v2811_v58  ;;  %v591_v39 = vpop.f32.mrf.mxu0  ;;  %v703_v1 = vadd.f32 %v4857_v54, %v4801_v14 }
 0x1a3   : > { %v3324_v2 = vperm.slane %v3036_v23, 0  ;;  %1213 = vst.msk [vmem:[%s4593_s6 + $0xe8] sm:$0xff] %vm1183_vm0, %v1055_v56  ;;  %v592_v9 = vadd.f32 %v4857_v54, %v591_v39  ;;  %1158 = vmatmul.f32.gmra.mxu3 %v410_v27  ;;  %v824_v25 = vpop.f32.mrf.mxu1  ;;  %v5100_v40 = vmax.f32 %v1055_v56, 0.0  ;;  %v1478_v32 = vrot.slane %v5109_v33, 2  ;;  %v362_v56 = vld [vmem:[%s4462_s11 + $0x490] sm:$0xff] }
 0x1a4   : > { %v3325_v63 = vperm.slane %v3037_v41, 0  ;;  %v3326_v53 = vperm.slane %v3038_v0, 0  ;;  %1104 = vmatmul.f32.gmra.mxu2 %v356_v8  ;;  %v3327_v43 = vperm.slane %v3039_v12, 0  ;;  %v1479_v58 = vrot.slane %v5109_v33, 4  ;;  %v416_v8 = vld [vmem:[%s4462_s11 + $0x640] sm:$0xff] }
 0x1a5   : > { %v3468_v5 = vsel %vm3422_vm4, %v3324_v2, %v3467_v26  ;;  %v825_v61 = vadd.f32 %v824_v25, %v592_v9  ;;  %638 = vmatmul.f32.gmra.mxu0 %v354_v38  ;;  %v1487_v30 = vrot.slane %v5100_v40, 2  ;;  %v1488_v35 = vrot.slane %v5100_v40, 4  ;;  %v360_v2 = vld [vmem:[%s4462_s11 + $0x480] sm:$0xff]  ;;  %v361_v9 = vld [vmem:[%s4462_s11 + $0x488] sm:$0xff] }
 0x1a6   : > { %v3469_v6 = vsel %vm3424_vm5, %v3325_v63, %v3468_v5  ;;  %v932_v21 = vpop.f32.mrf.mxu3  ;;  %871 = vmatmul.f32.gmra.mxu1 %v355_v3  ;;  %v3808_v27 = vrot.slane %v1478_v32, 9  ;;  %v1489_v60 = vrot.slane %v5100_v40, 6  ;;  %v3819_v14 = vrot.slane %v5100_v40, 9  ;;  %v5134_v26 = vld [vmem:[%s5845_s2] ss:$0 sm:$0xff] }
 0x1a7   : > { %v3470_v20 = vsel %vm3426_vm6, %v3326_v53, %v3469_v6  ;;  %v1057_v57 = vpop.f32.mrf.mxu2  ;;  %v5102_v51 = vadd.f32 %v932_v21, %v700_v62  ;;  %v3820_v7 = vrot.slane %v1487_v30, 9  ;;  %v3821_v41 = vrot.slane %v1488_v35, 9 }
 0x1a8   : > { %v3471_v4 = vsel %vm3428_vm7, %v3327_v43, %v3470_v20  ;;  %v1058_v36 = vadd.f32 %v1057_v57, %v825_v61  ;;  %v3807_v39 = vrot.slane %v5109_v33, 9  ;;  %v706_v25 = vadd.f32 %v5134_v26, %v4817_v11 }
 0x1a9   : > { %3573 = vst.msk [vmem:[%s4680_s20 + $0x30] sm:$0xff] %vm1183_vm0, %v3471_v4  ;;  %v2813_v38 = vmax.f32 %v1487_v30, %v3820_v7  ;;  %v3809_v3 = vrot.slane %v1479_v58, 9  ;;  %v2801_v5 = vmax.f32 %v1478_v32, %v3808_v27  ;;  %v3822_v62 = vrot.slane %v1489_v60, 9  ;;  %v365_v30 = vld [vmem:[%s4462_s11 + $0x4a8] sm:$0xff] }
 0x1aa   : > { %1214 = vst.msk [vmem:[%s4593_s6 + $0xf0] sm:$0xff] %vm1183_vm0, %v1058_v36  ;;  %v594_v28 = vpop.f32.mrf.mxu0  ;;  %v2812_v43 = vmax.f32 %v5100_v40, %v3819_v14  ;;  %v2814_v20 = vmax.f32 %v1488_v35, %v3821_v41  ;;  %v1286_v21 = vmax.f32 %v1058_v36, 0.0  ;;  %v2800_v11 = vmax.f32 %v5109_v33, %v3807_v39  ;;  %v419_v40 = vld [vmem:[%s4462_s11 + $0x658] sm:$0xff] }
 0x1ab   : > { %1161 = vmatmul.f32.gmra.mxu3 %v413_v59  ;;  %v827_v17 = vpop.f32.mrf.mxu1  ;;  %v595_v34 = vadd.f32 %v4857_v54, %v594_v28  ;;  %v1480_v54 = vrot.slane %v5109_v33, 6  ;;  %v363_v35 = vld [vmem:[%s4462_s11 + $0x498] sm:$0xff] }
 0x1ac   : > { %1107 = vmatmul.f32.gmra.mxu2 %v359_v46  ;;  %v3041_v46 = vmax.f32 %v2801_v5, %v2813_v38  ;;  %v1490_v32 = vrot.slane %v1286_v21, 2  ;;  %v712_v5 = vadd.f32 %v5134_v26, %v4845_v31 }
 0x1ad   : > { %641 = vmatmul.f32.gmra.mxu0 %v357_v15  ;;  %v828_v50 = vadd.f32 %v827_v17, %v595_v34  ;;  %v3810_v61 = vrot.slane %v1480_v54, 9  ;;  %v2802_v15 = vmax.f32 %v1479_v58, %v3809_v3  ;;  %v2815_v17 = vmax.f32 %v1489_v60, %v3822_v62  ;;  %v364_v58 = vld [vmem:[%s4462_s11 + $0x4a0] sm:$0xff]  ;;  %v422_v3 = vld [vmem:[%s4462_s11 + $0x670] sm:$0xff] }
 0x1ae   : > { %v935_v16 = vpop.f32.mrf.mxu3  ;;  %874 = vmatmul.f32.gmra.mxu1 %v358_v19  ;;  %v3040_v19 = vmax.f32 %v2800_v11, %v2812_v43  ;;  %v1491_v34 = vrot.slane %v1286_v21, 4  ;;  %v3823_v60 = vrot.slane %v1286_v21, 9  ;;  %v3824_v41 = vrot.slane %v1490_v32, 9  ;;  %v366_v11 = vld [vmem:[%s4462_s11 + $0x4b0] sm:$0xff] }
 0x1af   : > { %v1060_v22 = vpop.f32.mrf.mxu2  ;;  %v5122_v23 = vadd.f32 %v935_v16, %v703_v1  ;;  %v3042_v36 = vmax.f32 %v2802_v15, %v2814_v20  ;;  %v2803_v33 = vmax.f32 %v1480_v54, %v3810_v61  ;;  %v3329_v16 = vperm.slane %v3041_v46, 0 }
 0x1b0   : > { %v1061_v0 = vadd.f32 %v1060_v22, %v828_v50  ;;  %v1492_v22 = vrot.slane %v1286_v21, 6  ;;  %v3328_v27 = vperm.slane %v3040_v19, 0  ;;  %v3825_v54 = vrot.slane %v1491_v34, 9 }
 0x1b1   : > { %v3330_v14 = vperm.slane %v3042_v36, 0  ;;  %v5169_v62 = vadd.f32 %v5134_v26, %v4861_v48  ;;  %v2817_v20 = vmax.f32 %v1490_v32, %v3824_v41 }
 0x1b2   : > { %v597_v12 = vpop.f32.mrf.mxu0  ;;  %1215 = vst.msk [vmem:[%s4593_s6 + $0xf8] sm:$0xff] %vm1183_vm0, %v1061_v0  ;;  %v3472_v38 = vsel %vm3416_vm1, %v3329_v16, %v3328_v27 }
 0x1b3   : > { %v598_v63 = vadd.f32 %v5134_v26, %v597_v12  ;;  %1164 = vmatmul.f32.gmra.mxu3 %v416_v8  ;;  %v830_v53 = vpop.f32.mrf.mxu1  ;;  %v3043_v8 = vmax.f32 %v2803_v33, %v2815_v17  ;;  %v3473_v61 = vsel %vm3418_vm2, %v3330_v14, %v3472_v38 }
 0x1b4   : > { %1110 = vmatmul.f32.gmra.mxu2 %v362_v56  ;;  %v709_v56 = vadd.f32 %v5134_v26, %v4830_v55 }
 0x1b5   : > { %v831_v6 = vadd.f32 %v830_v53, %v598_v63  ;;  %644 = vmatmul.f32.gmra.mxu0 %v360_v2  ;;  %v3826_v63 = vrot.slane %v1492_v22, 9  ;;  %v5159_v53 = vmax.f32 %v1061_v0, 0.0  ;;  %v3331_v43 = vperm.slane %v3043_v8, 0 }
 0x1b6   : > { %v938_v57 = vpop.f32.mrf.mxu3  ;;  %877 = vmatmul.f32.gmra.mxu1 %v361_v9  ;;  %v2818_v0 = vmax.f32 %v1491_v34, %v3825_v54 }
 0x1b7   : > { %v1063_v4 = vpop.f32.mrf.mxu2  ;;  %v5144_v59 = vadd.f32 %v938_v57, %v706_v25  ;;  %v368_v25 = vld [vmem:[%s4462_s11 + $0x4c0] sm:$0xff]  ;;  %v2819_v46 = vmax.f32 %v1492_v22, %v3826_v63  ;;  %v1493_v15 = vrot.slane %v5159_v53, 2  ;;  %v1494_v31 = vrot.slane %v5159_v53, 4 }
 0x1b8   : > { %v5146_v28 = vadd.f32 %v1063_v4, %v831_v6  ;;  %v2816_v6 = vmax.f32 %v1286_v21, %v3823_v60  ;;  %v367_v21 = vld [vmem:[%s4462_s11 + $0x4b8] sm:$0xff]  ;;  %v1495_v32 = vrot.slane %v5159_v53, 6  ;;  %v3827_v34 = vrot.slane %v5159_v53, 9 }
 0x1b9   : > { %v3829_v8 = vrot.slane %v1494_v31, 9 }
 0x1ba   : > { %1216 = vst.msk [vmem:[%s4593_s6 + $0x100] sm:$0xff] %vm1183_vm0, %v5146_v28  ;;  %v600_v1 = vpop.f32.mrf.mxu0  ;;  %v3830_v38 = vrot.slane %v1495_v32, 9  ;;  %v5189_v63 = vmax.f32 %v5159_v53, %v3827_v34 }
 0x1bb   : > { %1167 = vmatmul.f32.gmra.mxu3 %v419_v40  ;;  %v833_v7 = vpop.f32.mrf.mxu1  ;;  %v601_v50 = vadd.f32 %v5134_v26, %v600_v1  ;;  %v3474_v1 = vsel %vm3420_vm3, %v3331_v43, %v3473_v61  ;;  %v2822_v34 = vmax.f32 %v1494_v31, %v3829_v8 }
 0x1bc   : > { %1113 = vmatmul.f32.gmra.mxu2 %v365_v30 }
 0x1bd   : > { %647 = vmatmul.f32.gmra.mxu0 %v363_v35  ;;  %v834_v12 = vadd.f32 %v833_v7, %v601_v50 }
 0x1be   : > { %v941_v2 = vpop.f32.mrf.mxu3  ;;  %880 = vmatmul.f32.gmra.mxu1 %v364_v58 }
 0x1bf   : > { %v1066_v39 = vpop.f32.mrf.mxu2  ;;  %v5161_v55 = vadd.f32 %v941_v2, %v709_v56  ;;  %v3828_v56 = vrot.slane %v1493_v15, 9  ;;  %v371_v2 = vld [vmem:[%s4462_s11 + $0x4d8] sm:$0xff] }
 0x1c0   : > { %v1067_v9 = vadd.f32 %v1066_v39, %v834_v12  ;;  %v425_v39 = vld [vmem:[%s4462_s11 + $0x688] sm:$0xff] }
 0x1c1   : > { %5861 = vst [vmem:[#allocation5_spill] sm:$0xff] %v5161_v55 }
 0x1c2   : > { %1217 = vst.msk [vmem:[%s4593_s6 + $0x108] sm:$0xff] %vm1183_vm0, %v1067_v9  ;;  %v1289_v57 = vmax.f32 %v1067_v9, 0.0  ;;  %v603_v4 = vpop.f32.mrf.mxu0  ;;  %v5192_v9 = vmax.f32 %v5146_v28, 0.0  ;;  %v2821_v28 = vmax.f32 %v1493_v15, %v3828_v56 }
 0x1c3   : > { %v604_v48 = vadd.f32 %v5134_v26, %v603_v4  ;;  %1170 = vmatmul.f32.gmra.mxu3 %v422_v3  ;;  %v836_v30 = vpop.f32.mrf.mxu1 }
 0x1c4   : > { %1116 = vmatmul.f32.gmra.mxu2 %v368_v25  ;;  %v1499_v40 = vrot.slane %v1289_v57, 2  ;;  %v1500_v17 = vrot.slane %v1289_v57, 4  ;;  %v1501_v19 = vrot.slane %v1289_v57, 6  ;;  %v3835_v36 = vrot.slane %v1289_v57, 9 }
 0x1c5   : > { %v837_v35 = vadd.f32 %v836_v30, %v604_v48  ;;  %650 = vmatmul.f32.gmra.mxu0 %v366_v11  ;;  %v1497_v56 = vrot.slane %v5192_v9, 4 }
 0x1c6   : > { %v3836_v33 = vrot.slane %v1499_v40, 9  ;;  %v3837_v16 = vrot.slane %v1500_v17, 9  ;;  %v3838_v22 = vrot.slane %v1501_v19, 9  ;;  %v2828_v7 = vmax.f32 %v1289_v57, %v3835_v36  ;;  %v944_v58 = vpop.f32.mrf.mxu3  ;;  %883 = vmatmul.f32.gmra.mxu1 %v367_v21  ;;  %v369_v57 = vld [vmem:[%s4462_s11 + $0x4c8] sm:$0xff] }
 0x1c7   : > { %v1069_v50 = vpop.f32.mrf.mxu2  ;;  %v5182_v27 = vadd.f32 %v944_v58, %v712_v5  ;;  %v1496_v58 = vrot.slane %v5192_v9, 2 }
 0x1c8   : > { %v1070_v60 = vadd.f32 %v1069_v50, %v837_v35  ;;  %v2829_v14 = vmax.f32 %v1499_v40, %v3836_v33  ;;  %v2830_v41 = vmax.f32 %v1500_v17, %v3837_v16  ;;  %v2831_v54 = vmax.f32 %v1501_v19, %v3838_v22  ;;  %v370_v40 = vld [vmem:[%s4462_s11 + $0x4d0] sm:$0xff] }
 0x1c9   : > { %5862 = vst [vmem:[#allocation6_spill] sm:$0xff] %v5182_v27  ;;  %v3044_v12 = vmax.f32 %v2816_v6, %v2828_v7 }
 0x1ca   : > { %1218 = vst.msk [vmem:[%s4593_s6 + $0x110] sm:$0xff] %vm1183_vm0, %v1070_v60  ;;  %v1290_v25 = vmax.f32 %v1070_v60, 0.0  ;;  %v3045_v3 = vmax.f32 %v2817_v20, %v2829_v14  ;;  %v3046_v5 = vmax.f32 %v2818_v0, %v2830_v41  ;;  %v3047_v43 = vmax.f32 %v2819_v46, %v2831_v54  ;;  %v606_v6 = vpop.f32.mrf.mxu0  ;;  %v374_v41 = vld [vmem:[%s4462_s11 + $0x4f0] sm:$0xff]  ;;  %v428_v54 = vld [vmem:[%s4462_s11 + $0x6a0] sm:$0xff] }
 0x1cb   : > { %v3332_v61 = vperm.slane %v3044_v12, 0  ;;  %1173 = vmatmul.f32.gmra.mxu3 %v425_v39  ;;  %v839_v21 = vpop.f32.mrf.mxu1  ;;  %v607_v22 = vadd.f32 %v5134_v26, %v606_v6  ;;  %v1498_v12 = vrot.slane %v5192_v9, 6 }
 0x1cc   : > { %v1502_v4 = vrot.slane %v1290_v25, 2  ;;  %v1503_v11 = vrot.slane %v1290_v25, 4  ;;  %v1504_v48 = vrot.slane %v1290_v25, 6  ;;  %v3839_v30 = vrot.slane %v1290_v25, 9  ;;  %1119 = vmatmul.f32.gmra.mxu2 %v371_v2 }
 0x1cd   : > { %v3333_v17 = vperm.slane %v3045_v3, 0  ;;  %v3334_v19 = vperm.slane %v3046_v5, 0  ;;  %v3475_v36 = vsel %vm3422_vm4, %v3332_v61, %v3474_v1  ;;  %653 = vmatmul.f32.gmra.mxu0 %v369_v57  ;;  %v3335_v35 = vperm.slane %v3047_v43, 0  ;;  %v372_v61 = vld [vmem:[%s4462_s11 + $0x4e0] sm:$0xff] }
 0x1ce   : > { %v3840_v20 = vrot.slane %v1502_v4, 9  ;;  %v3841_v0 = vrot.slane %v1503_v11, 9  ;;  %v3842_v46 = vrot.slane %v1504_v48, 9  ;;  %v2832_v16 = vmax.f32 %v1290_v25, %v3839_v30  ;;  %v947_v7 = vpop.f32.mrf.mxu3  ;;  %886 = vmatmul.f32.gmra.mxu1 %v370_v40 }
 0x1cf   : > { %v3476_v33 = vsel %vm3424_vm5, %v3333_v17, %v3475_v36  ;;  %v1072_v15 = vpop.f32.mrf.mxu2  ;;  %v840_v60 = vadd.f32 %v839_v21, %v607_v22  ;;  %v5206_v14 = vadd.f32 %v947_v7, %v5169_v62  ;;  %v3831_v2 = vrot.slane %v5192_v9, 9 }
 0x1d0   : > { %v3477_v31 = vsel %vm3426_vm6, %v3334_v19, %v3476_v33  ;;  %v2833_v1 = vmax.f32 %v1502_v4, %v3840_v20  ;;  %v2834_v50 = vmax.f32 %v1503_v11, %v3841_v0  ;;  %v2835_v39 = vmax.f32 %v1504_v48, %v3842_v46  ;;  %v373_v11 = vld [vmem:[%s4462_s11 + $0x4e8] sm:$0xff] }
 0x1d1   : > { %v3478_v8 = vsel %vm3428_vm7, %v3335_v35, %v3477_v31  ;;  %5863 = vst [vmem:[#allocation7_spill] sm:$0xff] %v5206_v14  ;;  %v3048_v3 = vmax.f32 %v5189_v63, %v2832_v16  ;;  %v1073_v5 = vadd.f32 %v1072_v15, %v840_v60  ;;  %v2823_v62 = vmax.f32 %v1495_v32, %v3830_v38  ;;  %v377_v15 = vld [vmem:[%s4462_s11 + $0x508] sm:$0xff]  ;;  %v431_v31 = vld [vmem:[%s4462_s11 + $0x6b8] sm:$0xff] }
 0x1d2   : > { %3574 = vst.msk [vmem:[%s4680_s20 + $0x38] sm:$0xff] %vm1183_vm0, %v3478_v8  ;;  %v3049_v25 = vmax.f32 %v2821_v28, %v2833_v1  ;;  %v609_v43 = vpop.f32.mrf.mxu0  ;;  %v3050_v6 = vmax.f32 %v2822_v34, %v2834_v50  ;;  %v3832_v30 = vrot.slane %v1496_v58, 9  ;;  %v3833_v21 = vrot.slane %v1497_v56, 9 }
 0x1d3   : > { %v610_v57 = vadd.f32 %v5134_v26, %v609_v43  ;;  %1176 = vmatmul.f32.gmra.mxu3 %v428_v54  ;;  %v842_v4 = vpop.f32.mrf.mxu1  ;;  %1219 = vst.msk [vmem:[%s4593_s6 + $0x118] sm:$0xff] %vm1183_vm0, %v1073_v5  ;;  %v1291_v40 = vmax.f32 %v1073_v5, 0.0  ;;  %v3834_v63 = vrot.slane %v1498_v12, 9  ;;  %v2824_v28 = vmax.f32 %v5192_v9, %v3831_v2 }
 0x1d4   : > { %1122 = vmatmul.f32.gmra.mxu2 %v374_v41  ;;  %v3337_v48 = vperm.slane %v3049_v25, 0  ;;  %v3051_v17 = vmax.f32 %v2823_v62, %v2835_v39  ;;  %v3336_v53 = vperm.slane %v3048_v3, 0  ;;  %v3338_v0 = vperm.slane %v3050_v6, 0  ;;  %v375_v25 = vld [vmem:[%s4462_s11 + $0x4f8] sm:$0xff] }
 0x1d5   : > { %v843_v19 = vadd.f32 %v842_v4, %v610_v57  ;;  %656 = vmatmul.f32.gmra.mxu0 %v372_v61  ;;  %v1505_v32 = vrot.slane %v1291_v40, 2  ;;  %v1506_v38 = vrot.slane %v1291_v40, 4  ;;  %v1507_v36 = vrot.slane %v1291_v40, 6 }
 0x1d6   : > { %v1129_v20 = vpop.f32.mrf.mxu3  ;;  %889 = vmatmul.f32.gmra.mxu1 %v373_v11  ;;  %v3843_v46 = vrot.slane %v1291_v40, 9  ;;  %v3479_v9 = vsel %vm3416_vm1, %v3337_v48, %v3336_v53  ;;  %v2825_v1 = vmax.f32 %v1496_v58, %v3832_v30  ;;  %v2826_v50 = vmax.f32 %v1497_v56, %v3833_v21  ;;  %v376_v56 = vld [vmem:[%s4462_s11 + $0x500] sm:$0xff] }
 0x1d7   : > { %v1075_v34 = vpop.f32.mrf.mxu2  ;;  %v1130_v33 = vadd.f32 %v1129_v20, %v4880_v10  ;;  %v3844_v16 = vrot.slane %v1505_v32, 9  ;;  %v3845_v22 = vrot.slane %v1506_v38, 9  ;;  %v3846_v7 = vrot.slane %v1507_v36, 9 }
 0x1d8   : > { %v1076_v35 = vadd.f32 %v1075_v34, %v843_v19  ;;  %v2827_v8 = vmax.f32 %v1498_v12, %v3834_v63  ;;  %v2836_v60 = vmax.f32 %v1291_v40, %v3843_v46  ;;  %v3480_v3 = vsel %vm3418_vm2, %v3338_v0, %v3479_v9 }
 0x1d9   : > { %v2837_v41 = vmax.f32 %v1505_v32, %v3844_v16  ;;  %v2838_v54 = vmax.f32 %v1506_v38, %v3845_v22  ;;  %v2839_v2 = vmax.f32 %v1507_v36, %v3846_v7  ;;  %1238 = vst.msk [vmem:[%s4593_s6 + $0x1b0] sm:$0xff] %vm1183_vm0, %v1130_v33  ;;  %v3339_v12 = vperm.slane %v3051_v17, 0 }
 0x1da   : > { %1220 = vst.msk [vmem:[%s4593_s6 + $0x120] sm:$0xff] %vm1183_vm0, %v1076_v35  ;;  %v5229_v10 = vmax.f32 %v1076_v35, 0.0  ;;  %v612_v39 = vpop.f32.mrf.mxu0  ;;  %v3052_v5 = vmax.f32 %v2824_v28, %v2836_v60  ;;  %v1310_v19 = vmax.f32 %v1130_v33, 0.0 }
 0x1db   : > { %1179 = vmatmul.f32.gmra.mxu3 %v431_v31  ;;  %v845_v58 = vpop.f32.mrf.mxu1  ;;  %v3053_v43 = vmax.f32 %v2825_v1, %v2837_v41  ;;  %v3054_v61 = vmax.f32 %v2826_v50, %v2838_v54  ;;  %v3055_v62 = vmax.f32 %v2827_v8, %v2839_v2  ;;  %v3481_v57 = vsel %vm3420_vm3, %v3339_v12, %v3480_v3 }
 0x1dc   : > { %1125 = vmatmul.f32.gmra.mxu2 %v377_v15  ;;  %v3340_v6 = vperm.slane %v3052_v5, 0  ;;  %v1508_v30 = vrot.slane %v5229_v10, 2  ;;  %v1509_v17 = vrot.slane %v5229_v10, 4  ;;  %v1510_v32 = vrot.slane %v5229_v10, 6 }
 0x1dd   : > { %659 = vmatmul.f32.gmra.mxu0 %v375_v25  ;;  %v3341_v4 = vperm.slane %v3053_v43, 0  ;;  %v3342_v11 = vperm.slane %v3054_v61, 0  ;;  %v3343_v63 = vperm.slane %v3055_v62, 0  ;;  %v613_v38 = vadd.f32 %v5134_v26, %v612_v39 }
 0x1de   : > { %v1132_v48 = vpop.f32.mrf.mxu3  ;;  %892 = vmatmul.f32.gmra.mxu1 %v376_v56  ;;  %v3482_v40 = vsel %vm3422_vm4, %v3340_v6, %v3481_v57  ;;  %v3847_v20 = vrot.slane %v5229_v10, 9  ;;  %v3848_v0 = vrot.slane %v1508_v30, 9  ;;  %v1562_v22 = vrot.slane %v1310_v19, 2 }
 0x1df   : > { %v1078_v21 = vpop.f32.mrf.mxu2  ;;  %v3483_v28 = vsel %vm3424_vm5, %v3341_v4, %v3482_v40  ;;  %v1133_v36 = vadd.f32 %v1132_v48, %v4900_v42  ;;  %v846_v35 = vadd.f32 %v845_v58, %v613_v38  ;;  %v3849_v7 = vrot.slane %v1509_v17, 9 }
 0x1e0   : > { %v3484_v53 = vsel %vm3426_vm6, %v3342_v11, %v3483_v28  ;;  %v3850_v15 = vrot.slane %v1510_v32, 9  ;;  %v1563_v42 = vrot.slane %v1310_v19, 4  ;;  %v5253_v1 = vmax.f32 %v5229_v10, %v3847_v20 }
 0x1e1   : > { %v3485_v34 = vsel %vm3428_vm7, %v3343_v63, %v3484_v53  ;;  %v1311_v9 = vmax.f32 %v1133_v36, 0.0  ;;  %1239 = vst.msk [vmem:[%s4593_s6 + $0x1b8] sm:$0xff] %vm1183_vm0, %v1133_v36  ;;  %v1079_v31 = vadd.f32 %v1078_v21, %v846_v35  ;;  %v5255_v50 = vmax.f32 %v1508_v30, %v3848_v0 }
 0x1e2   : > { %v615_v46 = vpop.f32.mrf.mxu0  ;;  %3575 = vst.msk [vmem:[%s4680_s20 + $0x40] sm:$0xff] %vm1183_vm0, %v3485_v34  ;;  %v1564_v8 = vrot.slane %v1310_v19, 6  ;;  %v3919_v2 = vrot.slane %v1310_v19, 9  ;;  %v3920_v5 = vrot.slane %v1562_v22, 9  ;;  %v5260_v12 = vmax.f32 %v1509_v17, %v3849_v7 }
 0x1e3   : > { %v616_v33 = vadd.f32 %v5134_v26, %v615_v46  ;;  %v848_v16 = vpop.f32.mrf.mxu1  ;;  %1221 = vst.msk [vmem:[%s4593_s6 + $0x128] sm:$0xff] %vm1183_vm0, %v1079_v31  ;;  %v1293_v39 = vmax.f32 %v1079_v31, 0.0  ;;  %v1565_v25 = vrot.slane %v1311_v9, 2  ;;  %v1566_v3 = vrot.slane %v1311_v9, 4 }
 0x1e4   : > { %v1567_v58 = vrot.slane %v1311_v9, 6  ;;  %v5262_v43 = vmax.f32 %v1510_v32, %v3850_v15  ;;  %v3921_v61 = vrot.slane %v1563_v42, 9  ;;  %v3922_v6 = vrot.slane %v1564_v8, 9 }
 0x1e5   : > { %v849_v60 = vadd.f32 %v848_v16, %v616_v33  ;;  %v1511_v62 = vrot.slane %v1293_v39, 2  ;;  %v1512_v57 = vrot.slane %v1293_v39, 4  ;;  %v1513_v4 = vrot.slane %v1293_v39, 6 }
 0x1e6   : > { %v1135_v54 = vpop.f32.mrf.mxu3  ;;  %v5266_v21 = vmax.f32 %v1310_v19, %v3919_v2  ;;  %v3923_v48 = vrot.slane %v1311_v9, 9  ;;  %v3924_v40 = vrot.slane %v1565_v25, 9  ;;  %v3925_v63 = vrot.slane %v1566_v3, 9 }
 0x1e7   : > { %v1081_v41 = vpop.f32.mrf.mxu2  ;;  %v1136_v10 = vadd.f32 %v1135_v54, %v4917_v18  ;;  %v5270_v28 = vmax.f32 %v1562_v22, %v3920_v5  ;;  %v3851_v17 = vrot.slane %v1293_v39, 9  ;;  %v3926_v53 = vrot.slane %v1567_v58, 9 }
 0x1e8   : > { %v1082_v56 = vadd.f32 %v1081_v41, %v849_v60  ;;  %5864 = vst [vmem:[#allocation8_spill] sm:$0xff] %v5266_v21  ;;  %v3852_v38 = vrot.slane %v1511_v62, 9  ;;  %v5274_v0 = vmax.f32 %v1563_v42, %v3921_v61  ;;  %v5276_v19 = vmax.f32 %v1564_v8, %v3922_v6 }
 0x1e9   : > { %1240 = vst.msk [vmem:[%s4593_s6 + $0x1c0] sm:$0xff] %vm1183_vm0, %v1136_v10  ;;  %v5272_v20 = vmax.f32 %v1136_v10, 0.0  ;;  %v3853_v46 = vrot.slane %v1512_v57, 9  ;;  %v3854_v35 = vrot.slane %v1513_v4, 9  ;;  %v5278_v7 = vmax.f32 %v1311_v9, %v3923_v48 }
 0x1ea   : > { %1222 = vst.msk [vmem:[%s4593_s6 + $0x130] sm:$0xff] %vm1183_vm0, %v1082_v56  ;;  %v1294_v11 = vmax.f32 %v1082_v56, 0.0  ;;  %v618_v30 = vpop.f32.mrf.mxu0  ;;  %v5280_v22 = vmax.f32 %v1565_v25, %v3924_v40  ;;  %v5282_v15 = vmax.f32 %v1566_v3, %v3925_v63  ;;  %v5284_v60 = vmax.f32 %v1293_v39, %v3851_v17 }
 0x1eb   : > { %v851_v18 = vpop.f32.mrf.mxu1  ;;  %5865 = vst [vmem:[#allocation9_spill] sm:$0xff] %v5270_v28  ;;  %v5286_v41 = vmax.f32 %v1567_v58, %v3926_v53  ;;  %v619_v42 = vadd.f32 %v5134_v26, %v618_v30  ;;  %v5289_v8 = vmax.f32 %v1511_v62, %v3852_v38  ;;  %v5848_v9 = vrot.slane %v5272_v20, 2 }
 0x1ec   : > { %v1514_v32 = vrot.slane %v1294_v11, 2  ;;  %v1515_v36 = vrot.slane %v1294_v11, 4  ;;  %v1516_v34 = vrot.slane %v1294_v11, 6  ;;  %5866 = vst [vmem:[#allocation10_spill] sm:$0xff] %v5274_v0  ;;  %v3855_v31 = vrot.slane %v1294_v11, 9 }
 0x1ed   : > { %5867 = vst [vmem:[#allocation11_spill] sm:$0xff] %v5276_v19  ;;  %v5292_v56 = vmax.f32 %v1512_v57, %v3853_v46  ;;  %v5294_v25 = vmax.f32 %v1513_v4, %v3854_v35  ;;  %v852_v3 = vadd.f32 %v851_v18, %v619_v42  ;;  %v1569_v61 = vrot.slane %v5272_v20, 4 }
 0x1ee   : > { %v1138_v16 = vpop.f32.mrf.mxu3  ;;  %v3856_v54 = vrot.slane %v1514_v32, 9  ;;  %v3857_v2 = vrot.slane %v1515_v36, 9  ;;  %v3858_v5 = vrot.slane %v1516_v34, 9  ;;  %v5297_v10 = vmax.f32 %v1294_v11, %v3855_v31 }
 0x1ef   : > { %v1084_v33 = vpop.f32.mrf.mxu2  ;;  %v1139_v39 = vadd.f32 %v1138_v16, %v4934_v29  ;;  %v3927_v57 = vrot.slane %v5272_v20, 9  ;;  %v3928_v11 = vrot.slane %v5848_v9, 9 }
 0x1f0   : > { %v5302_v48 = vmax.f32 %v1514_v32, %v3856_v54  ;;  %v1085_v4 = vadd.f32 %v1084_v33, %v852_v3  ;;  %v5307_v29 = vmax.f32 %v1515_v36, %v3857_v2  ;;  %v5309_v63 = vmax.f32 %v1516_v34, %v3858_v5 }
 0x1f1   : > { %1241 = vst.msk [vmem:[%s4593_s6 + $0x1c8] sm:$0xff] %vm1183_vm0, %v1139_v39  ;;  %v1313_v40 = vmax.f32 %v1139_v39, 0.0  ;;  %v3929_v33 = vrot.slane %v1569_v61, 9 }
 0x1f2   : > { %v621_v58 = vpop.f32.mrf.mxu0  ;;  %1223 = vst.msk [vmem:[%s4593_s6 + $0x138] sm:$0xff] %vm1183_vm0, %v1085_v4  ;;  %v1295_v17 = vmax.f32 %v1085_v4, 0.0 }
 0x1f3   : > { %v622_v6 = vadd.f32 %v5134_v26, %v621_v58  ;;  %v854_v30 = vpop.f32.mrf.mxu1  ;;  %v1571_v53 = vrot.slane %v1313_v40, 2  ;;  %v1572_v32 = vrot.slane %v1313_v40, 4  ;;  %v1573_v38 = vrot.slane %v1313_v40, 6 }
 0x1f4   : > { %v3931_v16 = vrot.slane %v1313_v40, 9  ;;  %v1517_v31 = vrot.slane %v1295_v17, 2  ;;  %v1518_v54 = vrot.slane %v1295_v17, 4  ;;  %v1519_v42 = vrot.slane %v1295_v17, 6 }
 0x1f5   : > { %v855_v18 = vadd.f32 %v854_v30, %v622_v6  ;;  %v3859_v2 = vrot.slane %v1295_v17, 9  ;;  %v3932_v5 = vrot.slane %v1571_v53, 9  ;;  %v3933_v3 = vrot.slane %v1572_v32, 9 }
 0x1f6   : > { %v1141_v35 = vpop.f32.mrf.mxu3  ;;  %v3934_v39 = vrot.slane %v1573_v38, 9  ;;  %v5316_v58 = vmax.f32 %v1313_v40, %v3931_v16  ;;  %v3860_v6 = vrot.slane %v1517_v31, 9  ;;  %v3861_v30 = vrot.slane %v1518_v54, 9 }
 0x1f7   : > { %v1087_v46 = vpop.f32.mrf.mxu2  ;;  %v1142_v34 = vadd.f32 %v1141_v35, %v4955_v45  ;;  %v3862_v4 = vrot.slane %v1519_v42, 9  ;;  %v2852_v9 = vmax.f32 %v1295_v17, %v3859_v2  ;;  %v5324_v45 = vmax.f32 %v1571_v53, %v3932_v5 }
 0x1f8   : > { %v1088_v36 = vadd.f32 %v1087_v46, %v855_v18  ;;  %5868 = vst [vmem:[#allocation12_spill] sm:$0xff] %v5316_v58  ;;  %v5326_v46 = vmax.f32 %v1572_v32, %v3933_v3  ;;  %v5328_v35 = vmax.f32 %v1573_v38, %v3934_v39  ;;  %v2853_v62 = vmax.f32 %v1517_v31, %v3860_v6 }
 0x1f9   : > { %1242 = vst.msk [vmem:[%s4593_s6 + $0x1d0] sm:$0xff] %vm1183_vm0, %v1142_v34  ;;  %v2854_v14 = vmax.f32 %v1518_v54, %v3861_v30  ;;  %v2855_v27 = vmax.f32 %v1519_v42, %v3862_v4  ;;  %v3056_v17 = vmax.f32 %v5253_v1, %v2852_v9  ;;  %v5872_v2 = vrot.slane %v5272_v20, 6 }
 0x1fa   : > { %1224 = vst.msk [vmem:[%s4593_s6 + $0x140] sm:$0xff] %vm1183_vm0, %v1088_v36  ;;  %v5322_v18 = vpop.f32.mrf.mxu0  ;;  %v5346_v5 = vmax.f32 %v5272_v20, %v3927_v57  ;;  %v3057_v31 = vmax.f32 %v5255_v50, %v2853_v62  ;;  %v5873_v3 = vrot.slane %v5272_v20, 2  ;;  %v5357_v6 = vmax.f32 %v1569_v61, %v3929_v33 }
 0x1fb   : > { %5869 = vst [vmem:[#allocation13_spill] sm:$0xff] %v5324_v45  ;;  %v5332_v16 = vpop.f32.mrf.mxu1  ;;  %v5337_v55 = vrot.slane %v5872_v2, 9  ;;  %v3058_v1 = vmax.f32 %v5260_v12, %v2854_v14  ;;  %v3059_v9 = vmax.f32 %v5262_v43, %v2855_v27  ;;  %v3344_v30 = vperm.slane %v3056_v17, 0 }
 0x1fc   : > { %5870 = vst [vmem:[#allocation14_spill] sm:$0xff] %v5326_v46  ;;  %v5355_v39 = vmax.f32 %v5873_v3, %v3928_v11  ;;  %v1296_v4 = vmax.f32 %v1088_v36, 0.0  ;;  %v3345_v2 = vperm.slane %v3057_v31, 0  ;;  %v1314_v32 = vmax.f32 %v1142_v34, 0.0 }
 0x1fd   : > { %5871 = vst [vmem:[#allocation15_spill] sm:$0xff] %v5328_v35  ;;  %v3346_v57 = vperm.slane %v3058_v1, 0  ;;  %v3347_v38 = vperm.slane %v3059_v9, 0 }
 0x1fe   : > { %v1144_v42 = vpop.f32.mrf.mxu3  ;;  %v1520_v50 = vrot.slane %v1296_v4, 2  ;;  %v1521_v62 = vrot.slane %v1296_v4, 4  ;;  %v1522_v14 = vrot.slane %v1296_v4, 6  ;;  %v3863_v12 = vrot.slane %v1296_v4, 9 }
 0x1ff   : > { %v5351_v54 = vpop.f32.mrf.mxu2  ;;  %v3486_v27 = vsel %vm3416_vm1, %v3345_v2, %v3344_v30  ;;  %v1574_v43 = vrot.slane %v1314_v32, 2  ;;  %v1575_v53 = vrot.slane %v1314_v32, 4  ;;  %v1576_v40 = vrot.slane %v1314_v32, 6 }
 0x200   : > { %v3487_v11 = vsel %vm3418_vm2, %v3346_v57, %v3486_v27  ;;  %v3864_v61 = vrot.slane %v1520_v50, 9  ;;  %v3865_v33 = vrot.slane %v1521_v62, 9  ;;  %v3866_v17 = vrot.slane %v1522_v14, 9 }
 0x201   : > { %v3488_v31 = vsel %vm3420_vm3, %v3347_v38, %v3487_v11  ;;  %v2856_v1 = vmax.f32 %v1296_v4, %v3863_v12  ;;  %v3935_v34 = vrot.slane %v1314_v32, 9  ;;  %v3936_v9 = vrot.slane %v1574_v43, 9 }
 0x202   : > { %v627_v35 = vpop.f32.mrf.mxu0  ;;  %v2857_v3 = vmax.f32 %v1520_v50, %v3864_v61  ;;  %v2858_v19 = vmax.f32 %v1521_v62, %v3865_v33  ;;  %v2859_v46 = vmax.f32 %v1522_v14, %v3866_v17  ;;  %v3937_v0 = vrot.slane %v1575_v53, 9 }
 0x203   : > { %v860_v36 = vpop.f32.mrf.mxu1  ;;  %v3060_v30 = vmax.f32 %v5284_v60, %v2856_v1  ;;  %v3938_v2 = vrot.slane %v1576_v40, 9  ;;  %v2928_v45 = vmax.f32 %v1314_v32, %v3935_v34  ;;  %v2929_v28 = vmax.f32 %v1574_v43, %v3936_v9 }
 0x204   : > { %v3061_v57 = vmax.f32 %v5289_v8, %v2857_v3  ;;  %v3062_v27 = vmax.f32 %v5292_v56, %v2858_v19  ;;  %v3063_v21 = vmax.f32 %v5294_v25, %v2859_v46  ;;  %v2930_v38 = vmax.f32 %v1575_v53, %v3937_v0 }
 0x205   : > { %v3348_v12 = vperm.slane %v3060_v30, 0  ;;  %v2931_v11 = vmax.f32 %v1576_v40, %v3938_v2  ;;  %v3096_v50 = vmax.f32 %v5278_v7, %v2928_v45  ;;  %v3097_v62 = vmax.f32 %v5280_v22, %v2929_v28 }
 0x206   : > { %v1147_v58 = vpop.f32.mrf.mxu3  ;;  %v3349_v14 = vperm.slane %v3061_v57, 0  ;;  %v3350_v60 = vperm.slane %v3062_v27, 0  ;;  %v3351_v61 = vperm.slane %v3063_v21, 0  ;;  %v3098_v32 = vmax.f32 %v5282_v15, %v2930_v38 }
 0x207   : > { %v1093_v4 = vpop.f32.mrf.mxu2  ;;  %v3489_v43 = vsel %vm3422_vm4, %v3348_v12, %v3488_v31  ;;  %v3099_v8 = vmax.f32 %v5286_v41, %v2931_v11  ;;  %v3384_v19 = vperm.slane %v3096_v50, 0  ;;  %v3385_v56 = vperm.slane %v3097_v62, 0 }
 0x208   : > { %v3490_v25 = vsel %vm3424_vm5, %v3349_v14, %v3489_v43  ;;  %v3386_v46 = vperm.slane %v3098_v32, 0  ;;  %v625_v28 = vadd.f32 %v5134_v26, %v5322_v18  ;;  %v1145_v7 = vadd.f32 %v1144_v42, %v4978_v47 }
 0x209   : > { %v3491_v21 = vsel %vm3426_vm6, %v3350_v60, %v3490_v25  ;;  %v3387_v22 = vperm.slane %v3099_v8, 0  ;;  %v3521_v15 = vsel %vm3416_vm1, %v3385_v56, %v3384_v19  ;;  %v628_v41 = vadd.f32 %v5134_v26, %v627_v35 }
 0x20a   : > { %v630_v0 = vpop.f32.mrf.mxu0  ;;  %v3492_v40 = vsel %vm3428_vm7, %v3351_v61, %v3491_v21  ;;  %v3522_v53 = vsel %vm3418_vm2, %v3386_v46, %v3521_v15  ;;  %v858_v33 = vadd.f32 %v5332_v16, %v625_v28  ;;  %1243 = vst.msk [vmem:[%s4593_s6 + $0x1d8] sm:$0xff] %vm1183_vm0, %v1145_v7  ;;  %v1315_v18 = vmax.f32 %v1145_v7, 0.0 }
 0x20b   : > { %v863_v45 = vpop.f32.mrf.mxu1  ;;  %3576 = vst.msk [vmem:[%s4680_s20 + $0x48] sm:$0xff] %vm1183_vm0, %v3492_v40  ;;  %v3523_v47 = vsel %vm3420_vm3, %v3387_v22, %v3522_v53  ;;  %v861_v42 = vadd.f32 %v860_v36, %v628_v41  ;;  %v1148_v17 = vadd.f32 %v1147_v58, %v4997_v13  ;;  %v631_v35 = vadd.f32 %v5134_v26, %v630_v0 }
 0x20c   : > { %v1091_v1 = vadd.f32 %v5351_v54, %v858_v33  ;;  %v1577_v16 = vrot.slane %v1315_v18, 2  ;;  %v1578_v34 = vrot.slane %v1315_v18, 4  ;;  %v1579_v9 = vrot.slane %v1315_v18, 6 }
 0x20d   : > { %v5874_v3 = vrot.slane %v5272_v20, 6  ;;  %v3939_v2 = vrot.slane %v1315_v18, 9  ;;  %v1094_v57 = vadd.f32 %v1093_v4, %v861_v42  ;;  %1244 = vst.msk [vmem:[%s4593_s6 + $0x1e0] sm:$0xff] %vm1183_vm0, %v1148_v17  ;;  %v5396_v36 = vmax.f32 %v1148_v17, 0.0 }
 0x20e   : > { %v5388_v31 = vpop.f32.mrf.mxu3  ;;  %1225 = vst.msk [vmem:[%s4593_s6 + $0x148] sm:$0xff] %vm1183_vm0, %v1091_v1  ;;  %v1297_v13 = vmax.f32 %v1091_v1, 0.0  ;;  %v3940_v26 = vrot.slane %v1577_v16, 9  ;;  %v3941_v58 = vrot.slane %v1578_v34, 9  ;;  %v3942_v54 = vrot.slane %v1579_v9, 9 }
 0x20f   : > { %v2923_v30 = vmax.f32 %v5874_v3, %v5337_v55  ;;  %v5400_v27 = vpop.f32.mrf.mxu2  ;;  %v2932_v38 = vmax.f32 %v1315_v18, %v3939_v2  ;;  %1226 = vst.msk [vmem:[%s4593_s6 + $0x150] sm:$0xff] %vm1183_vm0, %v1094_v57  ;;  %v5404_v12 = vmax.f32 %v1094_v57, 0.0  ;;  %v1580_v55 = vrot.slane %v5396_v36, 2 }
 0x210   : > { %v864_v20 = vadd.f32 %v863_v45, %v631_v35  ;;  %v1523_v11 = vrot.slane %v1297_v13, 2  ;;  %v1524_v50 = vrot.slane %v1297_v13, 4  ;;  %v1525_v62 = vrot.slane %v1297_v13, 6 }
 0x211   : > { %v3867_v14 = vrot.slane %v1297_v13, 9  ;;  %v2933_v60 = vmax.f32 %v1577_v16, %v3940_v26  ;;  %v2934_v61 = vmax.f32 %v1578_v34, %v3941_v58  ;;  %v2935_v32 = vmax.f32 %v1579_v9, %v3942_v54 }
 0x212   : > { %v5407_v4 = vpop.f32.mrf.mxu0  ;;  %v3100_v43 = vmax.f32 %v5346_v5, %v2932_v38  ;;  %v3868_v8 = vrot.slane %v1523_v11, 9  ;;  %v3869_v19 = vrot.slane %v1524_v50, 9  ;;  %v3870_v56 = vrot.slane %v1525_v62, 9 }
 0x213   : > { %v2860_v0 = vmax.f32 %v1297_v13, %v3867_v14  ;;  %v3101_v25 = vmax.f32 %v5355_v39, %v2933_v60  ;;  %v3102_v46 = vmax.f32 %v5357_v6, %v2934_v61  ;;  %v3103_v28 = vmax.f32 %v2923_v30, %v2935_v32  ;;  %v866_v21 = vpop.f32.mrf.mxu1 }
 0x214   : > { %v3388_v7 = vperm.slane %v3100_v43, 0  ;;  %v2861_v15 = vmax.f32 %v1523_v11, %v3868_v8  ;;  %v2862_v41 = vmax.f32 %v1524_v50, %v3869_v19  ;;  %v2863_v45 = vmax.f32 %v1525_v62, %v3870_v56 }
 0x215   : > { %v3064_v40 = vmax.f32 %v5297_v10, %v2860_v0  ;;  %v3389_v53 = vperm.slane %v3101_v25, 0  ;;  %v3390_v33 = vperm.slane %v3102_v46, 0  ;;  %v1581_v18 = vrot.slane %v5396_v36, 4  ;;  %v5454_v46 = vld [vmem:[%s5845_s2] ss:$0 sm:$0xff] }
 0x216   : > { %v1153_v22 = vpop.f32.mrf.mxu3  ;;  %v3524_v5 = vsel %vm3422_vm4, %v3388_v7, %v3523_v47  ;;  %v3065_v42 = vmax.f32 %v5302_v48, %v2861_v15  ;;  %v3066_v39 = vmax.f32 %v5307_v29, %v2862_v41  ;;  %v3067_v6 = vmax.f32 %v5309_v63, %v2863_v45 }
 0x217   : > { %v3391_v17 = vperm.slane %v3103_v28, 0  ;;  %v3525_v35 = vsel %vm3424_vm5, %v3389_v53, %v3524_v5  ;;  %v1526_v1 = vrot.slane %v5404_v12, 2  ;;  %v1527_v10 = vrot.slane %v5404_v12, 4  ;;  %v1099_v30 = vpop.f32.mrf.mxu2 }
 0x218   : > { %v1528_v16 = vrot.slane %v5404_v12, 6  ;;  %v3352_v47 = vperm.slane %v3064_v40, 0  ;;  %v3353_v9 = vperm.slane %v3065_v42, 0  ;;  %v3354_v3 = vperm.slane %v3066_v39, 0 }
 0x219   : > { %v3526_v48 = vsel %vm3426_vm6, %v3390_v33, %v3525_v35  ;;  %v3871_v63 = vrot.slane %v5404_v12, 9  ;;  %v3872_v2 = vrot.slane %v1526_v1, 9  ;;  %v3873_v57 = vrot.slane %v1527_v10, 9 }
 0x21a   : > { %v636_v34 = vpop.f32.mrf.mxu0  ;;  %v3527_v29 = vsel %vm3428_vm7, %v3391_v17, %v3526_v48  ;;  %v3493_v13 = vsel %vm3416_vm1, %v3353_v9, %v3352_v47  ;;  %v3874_v26 = vrot.slane %v1528_v16, 9  ;;  %v1582_v58 = vrot.slane %v5396_v36, 6 }
 0x21b   : > { %3581 = vst.msk [vmem:[%s4680_s20 + $0x70] sm:$0xff] %vm1183_vm0, %v3527_v29  ;;  %v3943_v54 = vrot.slane %v5396_v36, 9  ;;  %v3355_v38 = vperm.slane %v3067_v6, 0  ;;  %v3494_v11 = vsel %vm3418_vm2, %v3354_v3, %v3493_v13  ;;  %v5432_v50 = vmax.f32 %v5404_v12, %v3871_v63  ;;  %v869_v56 = vpop.f32.mrf.mxu1 }
 0x21c   : > { %v5434_v62 = vmax.f32 %v1526_v1, %v3872_v2  ;;  %v5436_v14 = vmax.f32 %v1527_v10, %v3873_v57  ;;  %v3944_v60 = vrot.slane %v1580_v55, 9  ;;  %v3945_v61 = vrot.slane %v1581_v18, 9 }
 0x21d   : > { %v5441_v43 = vsel %vm3420_vm3, %v3355_v38, %v3494_v11  ;;  %v3946_v8 = vrot.slane %v1582_v58, 9  ;;  %v1097_v19 = vadd.f32 %v5400_v27, %v864_v20  ;;  %v1151_v12 = vadd.f32 %v5388_v31, %v5014_v24 }
 0x21e   : > { %v1156_v32 = vpop.f32.mrf.mxu3  ;;  %v5446_v0 = vmax.f32 %v1528_v16, %v3874_v26  ;;  %v5449_v25 = vmax.f32 %v5396_v36, %v3943_v54  ;;  %v634_v28 = vadd.f32 %v5454_v46, %v5407_v4  ;;  %v1154_v27 = vadd.f32 %v1153_v22, %v5031_v37 }
 0x21f   : > { %v5461_v24 = vmax.f32 %v1580_v55, %v3944_v60  ;;  %v5463_v31 = vmax.f32 %v1581_v18, %v3945_v61  ;;  %1227 = vst.msk [vmem:[%s4593_s6 + $0x158] sm:$0xff] %vm1183_vm0, %v1097_v19  ;;  %v1299_v20 = vmax.f32 %v1097_v19, 0.0  ;;  %v1317_v7 = vmax.f32 %v1151_v12, 0.0  ;;  %v1102_v42 = vpop.f32.mrf.mxu2 }
 0x220   : > { %v5467_v15 = vmax.f32 %v1582_v58, %v3946_v8  ;;  %1245 = vst.msk [vmem:[%s4593_s6 + $0x1e8] sm:$0xff] %vm1183_vm0, %v1151_v12  ;;  %v867_v41 = vadd.f32 %v866_v21, %v634_v28  ;;  %v1318_v4 = vmax.f32 %v1154_v27, 0.0  ;;  %v1157_v45 = vadd.f32 %v1156_v32, %v5051_v44 }
 0x221   : > { %v1529_v37 = vrot.slane %v1299_v20, 2  ;;  %v1530_v22 = vrot.slane %v1299_v20, 4  ;;  %v1531_v36 = vrot.slane %v1299_v20, 6  ;;  %v3875_v55 = vrot.slane %v1299_v20, 9  ;;  %1246 = vst.msk [vmem:[%s4593_s6 + $0x1f0] sm:$0xff] %vm1183_vm0, %v1154_v27 }
 0x222   : > { %v639_v40 = vpop.f32.mrf.mxu0  ;;  %v1583_v53 = vrot.slane %v1317_v7, 2  ;;  %v1584_v33 = vrot.slane %v1317_v7, 4  ;;  %v1585_v5 = vrot.slane %v1317_v7, 6  ;;  %v3947_v18 = vrot.slane %v1317_v7, 9  ;;  %1247 = vst.msk [vmem:[%s4593_s6 + $0x1f8] sm:$0xff] %vm1183_vm0, %v1157_v45 }
 0x223   : > { %v3876_v39 = vrot.slane %v1529_v37, 9  ;;  %v3877_v6 = vrot.slane %v1530_v22, 9  ;;  %v3878_v21 = vrot.slane %v1531_v36, 9  ;;  %v637_v44 = vadd.f32 %v5454_v46, %v636_v34  ;;  %v872_v54 = vpop.f32.mrf.mxu1 }
 0x224   : > { %v5477_v17 = vmax.f32 %v1299_v20, %v3875_v55  ;;  %v3948_v35 = vrot.slane %v1583_v53, 9  ;;  %v3949_v1 = vrot.slane %v1584_v33, 9  ;;  %v640_v10 = vadd.f32 %v5454_v46, %v639_v40 }
 0x225   : > { %v5480_v16 = vmax.f32 %v1529_v37, %v3876_v39  ;;  %v3950_v47 = vrot.slane %v1585_v5, 9  ;;  %v5482_v9 = vmax.f32 %v1317_v7, %v3947_v18  ;;  %v1100_v3 = vadd.f32 %v1099_v30, %v867_v41 }
 0x226   : > { %v5484_v48 = vmax.f32 %v1530_v22, %v3877_v6  ;;  %v5486_v29 = vmax.f32 %v1531_v36, %v3878_v21  ;;  %v5488_v63 = vmax.f32 %v1583_v53, %v3948_v35  ;;  %v1586_v2 = vrot.slane %v1318_v4, 2  ;;  %v1159_v34 = vpop.f32.mrf.mxu3 }
 0x227   : > { %1228 = vst.msk [vmem:[%s4593_s6 + $0x160] sm:$0xff] %vm1183_vm0, %v1100_v3  ;;  %v5492_v57 = vmax.f32 %v1100_v3, 0.0  ;;  %v1587_v13 = vrot.slane %v1318_v4, 4  ;;  %v1588_v26 = vrot.slane %v1318_v4, 6  ;;  %v3951_v58 = vrot.slane %v1318_v4, 9  ;;  %v1105_v40 = vpop.f32.mrf.mxu2 }
 0x228   : > { %v5494_v38 = vmax.f32 %v1584_v33, %v3949_v1  ;;  %v3952_v11 = vrot.slane %v1586_v2, 9  ;;  %v870_v30 = vadd.f32 %v869_v56, %v637_v44  ;;  %v1319_v60 = vmax.f32 %v1157_v45, 0.0 }
 0x229   : > { %v1532_v61 = vrot.slane %v5492_v57, 2  ;;  %v1533_v32 = vrot.slane %v5492_v57, 4  ;;  %v1534_v8 = vrot.slane %v5492_v57, 6  ;;  %v3879_v19 = vrot.slane %v5492_v57, 9 }
 0x22a   : > { %v5500_v12 = vmax.f32 %v1585_v5, %v3950_v47  ;;  %v3953_v28 = vrot.slane %v1587_v13, 9  ;;  %v3954_v27 = vrot.slane %v1588_v26, 9  ;;  %v873_v20 = vadd.f32 %v872_v54, %v640_v10  ;;  %v642_v53 = vpop.f32.mrf.mxu0 }
 0x22b   : > { %v3880_v7 = vrot.slane %v1532_v61, 9  ;;  %v5504_v41 = vrot.slane %v1533_v32, 9  ;;  %v5506_v56 = vmax.f32 %v1318_v4, %v3951_v58  ;;  %v5508_v45 = vmax.f32 %v1586_v2, %v3952_v11 }
 0x22c   : > { %v5512_v37 = vrot.slane %v1534_v8, 9  ;;  %v5515_v22 = vmax.f32 %v5492_v57, %v3879_v19  ;;  %v1103_v36 = vadd.f32 %v1102_v42, %v870_v30  ;;  %v1589_v55 = vrot.slane %v1319_v60, 2 }
 0x22d   : > { %v5517_v33 = vmax.f32 %v1532_v61, %v3880_v7  ;;  %v5519_v5 = vmax.f32 %v1587_v13, %v3953_v28  ;;  %v5521_v18 = vmax.f32 %v1588_v26, %v3954_v27  ;;  %v1590_v4 = vrot.slane %v1319_v60, 4 }
 0x22e   : > { %1229 = vst.msk [vmem:[%s4593_s6 + $0x168] sm:$0xff] %vm1183_vm0, %v1103_v36  ;;  %v1301_v39 = vmax.f32 %v1103_v36, 0.0  ;;  %v1591_v6 = vrot.slane %v1319_v60, 6  ;;  %v3955_v21 = vrot.slane %v1319_v60, 9  ;;  %v3956_v44 = vrot.slane %v1589_v55, 9  ;;  %v5529_v26 = vpop.f32.mrf.mxu3 }
 0x22f   : > { %v3957_v35 = vrot.slane %v1590_v4, 9  ;;  %v1106_v1 = vadd.f32 %v1105_v40, %v873_v20  ;;  %v1160_v42 = vadd.f32 %v1159_v34, %v5071_v49  ;;  %v5527_v10 = vadd.f32 %v5454_v46, %v642_v53 }
 0x230   : > { %v1535_v47 = vrot.slane %v1301_v39, 2  ;;  %v1536_v3 = vrot.slane %v1301_v39, 4  ;;  %v1537_v2 = vrot.slane %v1301_v39, 6  ;;  %v3883_v13 = vrot.slane %v1301_v39, 9 }
 0x231   : > { %v3958_v58 = vrot.slane %v1591_v6, 9  ;;  %v2948_v54 = vmax.f32 %v1319_v60, %v3955_v21  ;;  %v2949_v11 = vmax.f32 %v1589_v55, %v3956_v44  ;;  %v2950_v30 = vmax.f32 %v1590_v4, %v3957_v35  ;;  %1230 = vst.msk [vmem:[%s4593_s6 + $0x170] sm:$0xff] %vm1183_vm0, %v1106_v1 }
 0x232   : > { %v3884_v61 = vrot.slane %v1535_v47, 9  ;;  %v3885_v19 = vrot.slane %v1536_v3, 9  ;;  %v3886_v28 = vrot.slane %v1537_v2, 9  ;;  %v2876_v49 = vmax.f32 %v1301_v39, %v3883_v13  ;;  %1248 = vst.msk [vmem:[%s4593_s6 + $0x200] sm:$0xff] %vm1183_vm0, %v1160_v42  ;;  %v875_v39 = vpop.f32.mrf.mxu1 }
 0x233   : > { %v2951_v34 = vmax.f32 %v1591_v6, %v3958_v58  ;;  %v3104_v27 = vmax.f32 %v5449_v25, %v2948_v54  ;;  %v3105_v20 = vmax.f32 %v5461_v24, %v2949_v11  ;;  %v3106_v7 = vmax.f32 %v5463_v31, %v2950_v30 }
 0x234   : > { %v2877_v36 = vmax.f32 %v1535_v47, %v3884_v61  ;;  %v2878_v40 = vmax.f32 %v1536_v3, %v3885_v19  ;;  %v2879_v60 = vmax.f32 %v1537_v2, %v3886_v28  ;;  %v3068_v55 = vmax.f32 %v5432_v50, %v2876_v49 }
 0x235   : > { %v3107_v53 = vmax.f32 %v5467_v15, %v2951_v34  ;;  %v3392_v4 = vperm.slane %v3104_v27, 0  ;;  %v3393_v21 = vperm.slane %v3105_v20, 0  ;;  %v3394_v44 = vperm.slane %v3106_v7, 0  ;;  %v1108_v27 = vpop.f32.mrf.mxu2 }
 0x236   : > { %v3069_v35 = vmax.f32 %v5434_v62, %v2877_v36  ;;  %v3070_v6 = vmax.f32 %v5436_v14, %v2878_v40  ;;  %v3071_v25 = vmax.f32 %v5446_v0, %v2879_v60  ;;  %v3356_v24 = vperm.slane %v3068_v55, 0 }
 0x237   : > { %v3395_v13 = vperm.slane %v3107_v53, 0  ;;  %v3528_v31 = vsel %vm3416_vm1, %v3393_v21, %v3392_v4  ;;  %v1302_v47 = vmax.f32 %v1106_v1, 0.0  ;;  %v1320_v3 = vmax.f32 %v1160_v42, 0.0  ;;  %v1165_v1 = vpop.f32.mrf.mxu3 }
 0x238   : > { %v3357_v2 = vperm.slane %v3069_v35, 0  ;;  %v3358_v50 = vperm.slane %v3070_v6, 0  ;;  %v3359_v58 = vperm.slane %v3071_v25, 0  ;;  %v3496_v15 = vsel %vm3422_vm4, %v3356_v24, %v5441_v43  ;;  %v645_v43 = vpop.f32.mrf.mxu0 }
 0x239   : > { %v3529_v54 = vsel %vm3418_vm2, %v3394_v44, %v3528_v31  ;;  %v1538_v11 = vrot.slane %v1302_v47, 2  ;;  %v1539_v62 = vrot.slane %v1302_v47, 4  ;;  %v1540_v30 = vrot.slane %v1302_v47, 6 }
 0x23a   : > { %v3497_v14 = vsel %vm3424_vm5, %v3357_v2, %v3496_v15  ;;  %v3530_v0 = vsel %vm3420_vm3, %v3395_v13, %v3529_v54  ;;  %v3887_v61 = vrot.slane %v1302_v47, 9  ;;  %v1592_v19 = vrot.slane %v1320_v3, 2 }
 0x23b   : > { %v3498_v42 = vsel %vm3426_vm6, %v3358_v50, %v3497_v14  ;;  %v3888_v28 = vrot.slane %v1538_v11, 9  ;;  %v3889_v49 = vrot.slane %v1539_v62, 9  ;;  %v3890_v34 = vrot.slane %v1540_v30, 9 }
 0x23c   : > { %v3499_v20 = vsel %vm3428_vm7, %v3359_v58, %v3498_v42  ;;  %v2880_v7 = vmax.f32 %v1302_v47, %v3887_v61  ;;  %v1593_v36 = vrot.slane %v1320_v3, 4  ;;  %v1594_v40 = vrot.slane %v1320_v3, 6  ;;  %v878_v47 = vpop.f32.mrf.mxu1 }
 0x23d   : > { %3577 = vst.msk [vmem:[%s4680_s20 + $0x50] sm:$0xff] %vm1183_vm0, %v3499_v20  ;;  %v2881_v60 = vmax.f32 %v1538_v11, %v3888_v28  ;;  %v2882_v55 = vmax.f32 %v1539_v62, %v3889_v49  ;;  %v2883_v53 = vmax.f32 %v1540_v30, %v3890_v34  ;;  %v3959_v4 = vrot.slane %v1320_v3, 9 }
 0x23e   : > { %v3072_v21 = vmax.f32 %v5477_v17, %v2880_v7  ;;  %v3960_v44 = vrot.slane %v1592_v19, 9  ;;  %v3961_v35 = vrot.slane %v1593_v36, 9  ;;  %v3962_v6 = vrot.slane %v1594_v40, 9 }
 0x23f   : > { %v5557_v25 = vmax.f32 %v1533_v32, %v5504_v41  ;;  %v3073_v24 = vmax.f32 %v5480_v16, %v2881_v60  ;;  %v3074_v13 = vmax.f32 %v5484_v48, %v2882_v55  ;;  %v2952_v31 = vmax.f32 %v1320_v3, %v3959_v4 }
 0x240   : > { %v3075_v2 = vmax.f32 %v5486_v29, %v2883_v53  ;;  %v2953_v50 = vmax.f32 %v1592_v19, %v3960_v44  ;;  %v2954_v58 = vmax.f32 %v1593_v36, %v3961_v35  ;;  %v2955_v15 = vmax.f32 %v1594_v40, %v3962_v6  ;;  %v648_v57 = vpop.f32.mrf.mxu0 }
 0x241   : > { %v3360_v17 = vperm.slane %v3072_v21, 0  ;;  %v3361_v54 = vperm.slane %v3073_v24, 0  ;;  %v3362_v11 = vperm.slane %v3074_v13, 0  ;;  %v3108_v62 = vmax.f32 %v5482_v9, %v2952_v31 }
 0x242   : > { %v3109_v30 = vmax.f32 %v5488_v63, %v2953_v50  ;;  %v3110_v32 = vmax.f32 %v5494_v38, %v2954_v58  ;;  %v3111_v16 = vmax.f32 %v5500_v12, %v2955_v15  ;;  %v876_v48 = vadd.f32 %v875_v39, %v5527_v10  ;;  %v5576_v12 = vpop.f32.mrf.mxu3 }
 0x243   : > { %v3500_v41 = vsel %vm3416_vm1, %v3361_v54, %v3360_v17  ;;  %v3396_v29 = vperm.slane %v3108_v62, 0  ;;  %v1163_v3 = vadd.f32 %v5529_v26, %v5084_v52  ;;  %v646_v14 = vadd.f32 %v5454_v46, %v645_v43  ;;  %v1111_v26 = vpop.f32.mrf.mxu2 }
 0x244   : > { %v5574_v9 = vmax.f32 %v1534_v8, %v5512_v37  ;;  %v3363_v63 = vperm.slane %v3075_v2, 0  ;;  %v3397_v38 = vperm.slane %v3109_v30, 0  ;;  %v3398_v61 = vperm.slane %v3110_v32, 0  ;;  %v881_v55 = vpop.f32.mrf.mxu1 }
 0x245   : > { %v3501_v10 = vsel %vm3418_vm2, %v3362_v11, %v3500_v41  ;;  %v3531_v39 = vsel %vm3422_vm4, %v3396_v29, %v3530_v0  ;;  %v1109_v19 = vadd.f32 %v1108_v27, %v876_v48  ;;  %1249 = vst.msk [vmem:[%s4593_s6 + $0x208] sm:$0xff] %vm1183_vm0, %v1163_v3  ;;  %v1321_v52 = vmax.f32 %v1163_v3, 0.0 }
 0x246   : > { %v3399_v8 = vperm.slane %v3111_v16, 0  ;;  %v3532_v37 = vsel %vm3424_vm5, %v3397_v38, %v3531_v39  ;;  %v879_v42 = vadd.f32 %v878_v47, %v646_v14  ;;  %v1166_v28 = vadd.f32 %v1165_v1, %v5102_v51 }
 0x247   : > { %v3533_v49 = vsel %vm3426_vm6, %v3398_v61, %v3532_v37  ;;  %1231 = vst.msk [vmem:[%s4593_s6 + $0x178] sm:$0xff] %vm1183_vm0, %v1109_v19  ;;  %v1303_v34 = vmax.f32 %v1109_v19, 0.0  ;;  %v1595_v0 = vrot.slane %v1321_v52, 2  ;;  %v1596_v27 = vrot.slane %v1321_v52, 4 }
 0x248   : > { %v3534_v43 = vsel %vm3428_vm7, %v3399_v8, %v3533_v49  ;;  %v1597_v20 = vrot.slane %v1321_v52, 6  ;;  %v3963_v7 = vrot.slane %v1321_v52, 9  ;;  %v1112_v36 = vadd.f32 %v1111_v26, %v879_v42  ;;  %1250 = vst.msk [vmem:[%s4593_s6 + $0x210] sm:$0xff] %vm1183_vm0, %v1166_v28  ;;  %v651_v3 = vpop.f32.mrf.mxu0 }
 0x249   : > { %3582 = vst.msk [vmem:[%s4680_s20 + $0x78] sm:$0xff] %vm1183_vm0, %v3534_v43  ;;  %v1541_v40 = vrot.slane %v1303_v34, 2  ;;  %v1542_v60 = vrot.slane %v1303_v34, 4  ;;  %v1543_v51 = vrot.slane %v1303_v34, 6  ;;  %v3891_v1 = vrot.slane %v1303_v34, 9 }
 0x24a   : > { %v3964_v53 = vrot.slane %v1595_v0, 9  ;;  %v3965_v4 = vrot.slane %v1596_v27, 9  ;;  %v3966_v21 = vrot.slane %v1597_v20, 9  ;;  %v2956_v44 = vmax.f32 %v1321_v52, %v3963_v7  ;;  %1232 = vst.msk [vmem:[%s4593_s6 + $0x180] sm:$0xff] %vm1183_vm0, %v1112_v36  ;;  %v1171_v16 = vpop.f32.mrf.mxu3 }
 0x24b   : > { %v3892_v35 = vrot.slane %v1541_v40, 9  ;;  %v3893_v6 = vrot.slane %v1542_v60, 9  ;;  %v3894_v24 = vrot.slane %v1543_v51, 9  ;;  %v2884_v13 = vmax.f32 %v1303_v34, %v3891_v1 }
 0x24c   : > { %v2957_v31 = vmax.f32 %v1595_v0, %v3964_v53  ;;  %v2958_v47 = vmax.f32 %v1596_v27, %v3965_v4  ;;  %v2959_v2 = vmax.f32 %v1597_v20, %v3966_v21  ;;  %v3112_v50 = vmax.f32 %v5506_v56, %v2956_v44  ;;  %v884_v37 = vpop.f32.mrf.mxu1 }
 0x24d   : > { %v2885_v58 = vmax.f32 %v1541_v40, %v3892_v35  ;;  %v2886_v15 = vmax.f32 %v1542_v60, %v3893_v6  ;;  %v2887_v17 = vmax.f32 %v1543_v51, %v3894_v24  ;;  %v3076_v54 = vmax.f32 %v5515_v22, %v2884_v13 }
 0x24e   : > { %v3502_v11 = vsel %vm3420_vm3, %v3363_v63, %v3501_v10  ;;  %v3113_v62 = vmax.f32 %v5508_v45, %v2957_v31  ;;  %v3114_v30 = vmax.f32 %v5519_v5, %v2958_v47  ;;  %v3115_v32 = vmax.f32 %v5521_v18, %v2959_v2  ;;  %v1114_v63 = vpop.f32.mrf.mxu2  ;;  %v5875_v2 = vld [vmem:[#allocation5_spill] sm:$0xff] }
 0x24f   : > { %v3077_v48 = vmax.f32 %v5517_v33, %v2885_v58  ;;  %v3078_v41 = vmax.f32 %v5557_v25, %v2886_v15  ;;  %v3079_v56 = vmax.f32 %v5574_v9, %v2887_v17  ;;  %v3364_v29 = vperm.slane %v3076_v54, 0 }
 0x250   : > { %v3400_v14 = vperm.slane %v3112_v50, 0  ;;  %v3401_v38 = vperm.slane %v3113_v62, 0  ;;  %v3402_v22 = vperm.slane %v3114_v30, 0  ;;  %v1304_v61 = vmax.f32 %v1112_v36, 0.0  ;;  %v654_v35 = vpop.f32.mrf.mxu0 }
 0x251   : > { %v3365_v10 = vperm.slane %v3077_v48, 0  ;;  %v3366_v45 = vperm.slane %v3078_v41, 0  ;;  %v3503_v5 = vsel %vm3422_vm4, %v3364_v29, %v3502_v11  ;;  %v649_v18 = vadd.f32 %v5454_v46, %v648_v57 }
 0x252   : > { %v3403_v39 = vperm.slane %v3115_v32, 0  ;;  %v3535_v33 = vsel %vm3416_vm1, %v3401_v38, %v3400_v14  ;;  %v1544_v25 = vrot.slane %v1304_v61, 2  ;;  %v1545_v19 = vrot.slane %v1304_v61, 4  ;;  %v1174_v1 = vpop.f32.mrf.mxu3 }
 0x253   : > { %v3367_v9 = vperm.slane %v3079_v56, 0  ;;  %v3504_v52 = vsel %vm3424_vm5, %v3365_v10, %v3503_v5  ;;  %v3536_v26 = vsel %vm3418_vm2, %v3402_v22, %v3535_v33  ;;  %v1322_v8 = vmax.f32 %v1166_v28, 0.0 }
 0x254   : > { %v3505_v42 = vsel %vm3426_vm6, %v3366_v45, %v3504_v52  ;;  %v5610_v49 = vsel %vm3420_vm3, %v3403_v39, %v3536_v26  ;;  %v1546_v34 = vrot.slane %v1304_v61, 6  ;;  %v3895_v0 = vrot.slane %v1304_v61, 9  ;;  %v887_v32 = vpop.f32.mrf.mxu1 }
 0x255   : > { %v3506_v57 = vsel %vm3428_vm7, %v3367_v9, %v3505_v42  ;;  %v3896_v27 = vrot.slane %v1544_v25, 9  ;;  %v3897_v43 = vrot.slane %v1545_v19, 9  ;;  %v1598_v20 = vrot.slane %v1322_v8, 2 }
 0x256   : > { %3578 = vst.msk [vmem:[%s4680_s20 + $0x58] sm:$0xff] %vm1183_vm0, %v3506_v57  ;;  %v1599_v7 = vrot.slane %v1322_v8, 4  ;;  %v1600_v36 = vrot.slane %v1322_v8, 6  ;;  %v882_v40 = vadd.f32 %v881_v55, %v649_v18  ;;  %v3898_v28 = vrot.slane %v1546_v34, 9 }
 0x257   : > { %v1169_v60 = vadd.f32 %v5576_v12, %v5122_v23  ;;  %v652_v51 = vadd.f32 %v5454_v46, %v651_v3  ;;  %v5618_v53 = vmax.f32 %v1304_v61, %v3895_v0  ;;  %v5620_v4 = vmax.f32 %v1544_v25, %v3896_v27  ;;  %v1117_v12 = vpop.f32.mrf.mxu2 }
 0x258   : > { %v1115_v21 = vadd.f32 %v1114_v63, %v882_v40  ;;  %v1172_v44 = vadd.f32 %v1171_v16, %v5144_v59  ;;  %v5623_v6 = vmax.f32 %v1545_v19, %v3897_v43  ;;  %v3967_v55 = vrot.slane %v1322_v8, 9  ;;  %v657_v42 = vpop.f32.mrf.mxu0 }
 0x259   : > { %v3968_v24 = vrot.slane %v1598_v20, 9  ;;  %1251 = vst.msk [vmem:[%s4593_s6 + $0x218] sm:$0xff] %vm1183_vm0, %v1169_v60  ;;  %v1323_v23 = vmax.f32 %v1169_v60, 0.0  ;;  %v3969_v13 = vrot.slane %v1599_v7, 9  ;;  %v3970_v31 = vrot.slane %v1600_v36, 9 }
 0x25a   : > { %1233 = vst.msk [vmem:[%s4593_s6 + $0x188] sm:$0xff] %vm1183_vm0, %v1115_v21  ;;  %v1305_v47 = vmax.f32 %v1115_v21, 0.0  ;;  %v1175_v50 = vadd.f32 %v1174_v1, %v5875_v2  ;;  %v885_v17 = vadd.f32 %v884_v37, %v652_v51  ;;  %v5632_v30 = vmax.f32 %v1172_v44, 0.0 }
 0x25b   : > { %v1601_v58 = vrot.slane %v1323_v23, 2  ;;  %v1602_v59 = vrot.slane %v1323_v23, 4  ;;  %v1603_v15 = vrot.slane %v1323_v23, 6  ;;  %1252 = vst.msk [vmem:[%s4593_s6 + $0x220] sm:$0xff] %vm1183_vm0, %v1172_v44  ;;  %v5636_v16 = vmax.f32 %v1546_v34, %v3898_v28 }
 0x25c   : > { %v1547_v54 = vrot.slane %v1305_v47, 2  ;;  %v1548_v11 = vrot.slane %v1305_v47, 4  ;;  %v1549_v62 = vrot.slane %v1305_v47, 6  ;;  %1253 = vst.msk [vmem:[%s4593_s6 + $0x228] sm:$0xff] %vm1183_vm0, %v1175_v50  ;;  %v3899_v48 = vrot.slane %v1305_v47, 9 }
 0x25d   : > { %v3971_v41 = vrot.slane %v1323_v23, 9  ;;  %v3972_v56 = vrot.slane %v1601_v58, 9  ;;  %v5638_v29 = vmax.f32 %v1322_v8, %v3967_v55  ;;  %v5640_v3 = vmax.f32 %v1598_v20, %v3968_v24  ;;  %v890_v24 = vpop.f32.mrf.mxu1 }
 0x25e   : > { %v5642_v14 = vmax.f32 %v1599_v7, %v3969_v13  ;;  %v655_v38 = vadd.f32 %v5454_v46, %v654_v35  ;;  %v5645_v22 = vmax.f32 %v1600_v36, %v3970_v31  ;;  %v3973_v61 = vrot.slane %v1602_v59, 9 }
 0x25f   : > { %v3974_v63 = vrot.slane %v1603_v15, 9  ;;  %v1118_v10 = vadd.f32 %v1117_v12, %v885_v17  ;;  %v3900_v45 = vrot.slane %v1547_v54, 9  ;;  %v3901_v5 = vrot.slane %v1548_v11, 9  ;;  %v1120_v43 = vpop.f32.mrf.mxu2 }
 0x260   : > { %v3902_v18 = vrot.slane %v1549_v62, 9  ;;  %v1604_v39 = vrot.slane %v5632_v30, 2  ;;  %v5648_v33 = vmax.f32 %v1305_v47, %v3899_v48  ;;  %v5650_v25 = vmax.f32 %v1323_v23, %v3971_v41  ;;  %v1177_v23 = vpop.f32.mrf.mxu3 }
 0x261   : > { %v5652_v19 = vmax.f32 %v1601_v58, %v3972_v56  ;;  %1234 = vst.msk [vmem:[%s4593_s6 + $0x190] sm:$0xff] %vm1183_vm0, %v1118_v10  ;;  %v5656_v9 = vmax.f32 %v1118_v10, 0.0  ;;  %v1605_v52 = vrot.slane %v5632_v30, 4  ;;  %v1606_v26 = vrot.slane %v5632_v30, 6 }
 0x262   : > { %v888_v8 = vadd.f32 %v887_v32, %v655_v38  ;;  %v1325_v37 = vmax.f32 %v1175_v50, 0.0  ;;  %v5660_v34 = vmax.f32 %v1602_v59, %v3973_v61  ;;  %v3975_v0 = vrot.slane %v5632_v30, 9 }
 0x263   : > { %v1550_v57 = vrot.slane %v5656_v9, 2  ;;  %v3976_v27 = vrot.slane %v1604_v39, 9  ;;  %v5664_v20 = vmax.f32 %v1547_v54, %v3900_v45  ;;  %v5666_v7 = vmax.f32 %v1548_v11, %v3901_v5  ;;  %v5876_v11 = vld [vmem:[#allocation6_spill] sm:$0xff] }
 0x264   : > { %v5668_v36 = vmax.f32 %v1549_v62, %v3902_v18  ;;  %v5670_v40 = vmax.f32 %v1603_v15, %v3974_v63  ;;  %v1551_v28 = vrot.slane %v5656_v9, 4  ;;  %v1552_v60 = vrot.slane %v5656_v9, 6 }
 0x265   : > { %v3903_v51 = vrot.slane %v5656_v9, 9  ;;  %v658_v1 = vadd.f32 %v5454_v46, %v657_v42  ;;  %v5678_v21 = vrot.slane %v1605_v52, 9  ;;  %v5682_v44 = vrot.slane %v1606_v26, 9 }
 0x266   : > { %v1121_v35 = vadd.f32 %v1120_v43, %v888_v8  ;;  %v1607_v55 = vrot.slane %v1325_v37, 2  ;;  %v5686_v12 = vrot.slane %v1550_v57, 9  ;;  %v5689_v13 = vmax.f32 %v5632_v30, %v3975_v0  ;;  %v660_v43 = vpop.f32.mrf.mxu0 }
 0x267   : > { %v5691_v31 = vmax.f32 %v1604_v39, %v3976_v27  ;;  %v1608_v47 = vrot.slane %v1325_v37, 4  ;;  %v1609_v50 = vrot.slane %v1325_v37, 6  ;;  %v3979_v58 = vrot.slane %v1325_v37, 9 }
 0x268   : > { %1235 = vst.msk [vmem:[%s4593_s6 + $0x198] sm:$0xff] %vm1183_vm0, %v1121_v35  ;;  %v1307_v2 = vmax.f32 %v1121_v35, 0.0  ;;  %v3980_v59 = vrot.slane %v1607_v55, 9  ;;  %v5697_v15 = vrot.slane %v1551_v28, 9  ;;  %v891_v54 = vadd.f32 %v890_v24, %v658_v1 }
 0x269   : > { %v3981_v17 = vrot.slane %v1608_v47, 9  ;;  %v1178_v62 = vadd.f32 %v1177_v23, %v5876_v11  ;;  %v3982_v38 = vrot.slane %v1609_v50, 9  ;;  %v2972_v61 = vmax.f32 %v1325_v37, %v3979_v58 }
 0x26a   : > { %v1553_v32 = vrot.slane %v1307_v2, 2  ;;  %v1554_v48 = vrot.slane %v1307_v2, 4  ;;  %v1555_v41 = vrot.slane %v1307_v2, 6  ;;  %v3907_v56 = vrot.slane %v1307_v2, 9 }
 0x26b   : > { %v2973_v63 = vmax.f32 %v1607_v55, %v3980_v59  ;;  %v2974_v10 = vmax.f32 %v1608_v47, %v3981_v17  ;;  %1254 = vst.msk [vmem:[%s4593_s6 + $0x230] sm:$0xff] %vm1183_vm0, %v1178_v62  ;;  %v2975_v8 = vmax.f32 %v1609_v50, %v3982_v38  ;;  %v3116_v42 = vmax.f32 %v5638_v29, %v2972_v61  ;;  %v1123_v55 = vpop.f32.mrf.mxu2 }
 0x26c   : > { %v3908_v45 = vrot.slane %v1553_v32, 9  ;;  %v3909_v5 = vrot.slane %v1554_v48, 9  ;;  %v3910_v18 = vrot.slane %v1555_v41, 9  ;;  %v2900_v39 = vmax.f32 %v1307_v2, %v3907_v56 }
 0x26d   : > { %v3117_v0 = vmax.f32 %v5640_v3, %v2973_v63  ;;  %v3118_v27 = vmax.f32 %v5642_v14, %v2974_v10  ;;  %v3119_v23 = vmax.f32 %v5645_v22, %v2975_v8  ;;  %v3404_v47 = vperm.slane %v3116_v42, 0 }
 0x26e   : > { %v2901_v1 = vmax.f32 %v1553_v32, %v3908_v45  ;;  %v2902_v35 = vmax.f32 %v1554_v48, %v3909_v5  ;;  %v2903_v24 = vmax.f32 %v1555_v41, %v3910_v18  ;;  %v3080_v37 = vmax.f32 %v5618_v53, %v2900_v39 }
 0x26f   : > { %v3405_v58 = vperm.slane %v3117_v0, 0  ;;  %v3406_v2 = vperm.slane %v3118_v27, 0  ;;  %v5711_v14 = vadd.f32 %v5454_v46, %v660_v43  ;;  %v3538_v53 = vsel %vm3422_vm4, %v3404_v47, %v5610_v49 }
 0x270   : > { %v3081_v50 = vmax.f32 %v5620_v4, %v2901_v1  ;;  %v3082_v29 = vmax.f32 %v5623_v6, %v2902_v35  ;;  %v3083_v3 = vmax.f32 %v5636_v16, %v2903_v24  ;;  %v3368_v59 = vperm.slane %v3080_v37, 0 }
 0x271   : > { %v1124_v17 = vadd.f32 %v1123_v55, %v891_v54  ;;  %v1326_v22 = vmax.f32 %v1178_v62, 0.0  ;;  %v3407_v48 = vperm.slane %v3119_v23, 0  ;;  %v3539_v41 = vsel %vm3424_vm5, %v3405_v58, %v3538_v53 }
 0x272   : > { %v3369_v11 = vperm.slane %v3081_v50, 0  ;;  %v3370_v32 = vperm.slane %v3082_v29, 0  ;;  %v3540_v4 = vsel %vm3426_vm6, %v3406_v2, %v3539_v41  ;;  %v3371_v62 = vperm.slane %v3083_v3, 0 }
 0x273   : > { %1236 = vst.msk [vmem:[%s4593_s6 + $0x1a0] sm:$0xff] %vm1183_vm0, %v1124_v17  ;;  %v1308_v6 = vmax.f32 %v1124_v17, 0.0  ;;  %v1610_v46 = vrot.slane %v1326_v22, 2  ;;  %v1611_v16 = vrot.slane %v1326_v22, 4  ;;  %v3541_v49 = vsel %vm3428_vm7, %v3407_v48, %v3540_v4  ;;  %v1180_v17 = vpop.f32.mrf.mxu3 }
 0x274   : > { %v3507_v56 = vsel %vm3416_vm1, %v3369_v11, %v3368_v59  ;;  %v1612_v54 = vrot.slane %v1326_v22, 6  ;;  %v3983_v38 = vrot.slane %v1326_v22, 9  ;;  %3583 = vst.msk [vmem:[%s4680_s20 + $0x80] sm:$0xff] %vm1183_vm0, %v3541_v49  ;;  %v2898_v30 = vmax.f32 %v1551_v28, %v5697_v15 }
 0x275   : > { %v1556_v61 = vrot.slane %v1308_v6, 2  ;;  %v1557_v63 = vrot.slane %v1308_v6, 4  ;;  %v1558_v10 = vrot.slane %v1308_v6, 6  ;;  %v3508_v45 = vsel %vm3418_vm2, %v3370_v32, %v3507_v56 }
 0x276   : > { %v3911_v5 = vrot.slane %v1308_v6, 9  ;;  %v3984_v18 = vrot.slane %v1610_v46, 9  ;;  %v3985_v39 = vrot.slane %v1611_v16, 9  ;;  %v3986_v27 = vrot.slane %v1612_v54, 9 }
 0x277   : > { %v3912_v8 = vrot.slane %v1556_v61, 9  ;;  %v3913_v42 = vrot.slane %v1557_v63, 9  ;;  %v3914_v0 = vrot.slane %v1558_v10, 9  ;;  %v2976_v1 = vmax.f32 %v1326_v22, %v3983_v38 }
 0x278   : > { %v2904_v43 = vmax.f32 %v1308_v6, %v3911_v5  ;;  %v2977_v35 = vmax.f32 %v1610_v46, %v3984_v18  ;;  %v2978_v24 = vmax.f32 %v1611_v16, %v3985_v39  ;;  %v2979_v47 = vmax.f32 %v1612_v54, %v3986_v27  ;;  %v5877_v6 = vld [vmem:[#allocation7_spill] sm:$0xff] }
 0x279   : > { %v2905_v37 = vmax.f32 %v1556_v61, %v3912_v8  ;;  %v2906_v55 = vmax.f32 %v1557_v63, %v3913_v42  ;;  %v2907_v23 = vmax.f32 %v1558_v10, %v3914_v0  ;;  %v3120_v2 = vmax.f32 %v5650_v25, %v2976_v1  ;;  %v893_v25 = vpop.f32.mrf.mxu1 }
 0x27a   : > { %v3084_v58 = vmax.f32 %v5648_v33, %v2904_v43  ;;  %v3121_v50 = vmax.f32 %v5652_v19, %v2977_v35  ;;  %v3122_v29 = vmax.f32 %v5660_v34, %v2978_v24  ;;  %v3123_v33 = vmax.f32 %v5670_v40, %v2979_v47 }
 0x27b   : > { %v3085_v3 = vmax.f32 %v5664_v20, %v2905_v37  ;;  %v3086_v59 = vmax.f32 %v5666_v7, %v2906_v55  ;;  %v3087_v53 = vmax.f32 %v5668_v36, %v2907_v23  ;;  %v3408_v22 = vperm.slane %v3120_v2, 0  ;;  %v1126_v20 = vpop.f32.mrf.mxu2 }
 0x27c   : > { %v3372_v19 = vperm.slane %v3084_v58, 0  ;;  %v3409_v34 = vperm.slane %v3121_v50, 0  ;;  %v3410_v11 = vperm.slane %v3122_v29, 0  ;;  %v3509_v32 = vsel %vm3420_vm3, %v3371_v62, %v3508_v45 }
 0x27d   : > { %v3373_v48 = vperm.slane %v3085_v3, 0  ;;  %v3374_v41 = vperm.slane %v3086_v59, 0  ;;  %v3411_v4 = vperm.slane %v3123_v33, 0  ;;  %v894_v40 = vadd.f32 %v893_v25, %v5711_v14 }
 0x27e   : > { %v3510_v7 = vsel %vm3422_vm4, %v3372_v19, %v3509_v32  ;;  %v3542_v36 = vsel %vm3416_vm1, %v3409_v34, %v3408_v22  ;;  %v1181_v46 = vadd.f32 %v1180_v17, %v5877_v6  ;;  %v3906_v16 = vrot.slane %v1552_v60, 9 }
 0x27f   : > { %v3375_v56 = vperm.slane %v3087_v53, 0  ;;  %v3511_v49 = vsel %vm3424_vm5, %v3373_v48, %v3510_v7  ;;  %v3543_v54 = vsel %vm3418_vm2, %v3410_v11, %v3542_v36  ;;  %v1127_v61 = vadd.f32 %v1126_v20, %v894_v40 }
 0x280   : > { %v3512_v38 = vsel %vm3426_vm6, %v3374_v41, %v3511_v49  ;;  %v5751_v62 = vsel %vm3420_vm3, %v3411_v4, %v3543_v54  ;;  %1255 = vst.msk [vmem:[%s4593_s6 + $0x238] sm:$0xff] %vm1183_vm0, %v1181_v46  ;;  %v1327_v14 = vmax.f32 %v1181_v46, 0.0  ;;  %v2896_v63 = vmax.f32 %v5656_v9, %v3903_v51 }
 0x281   : > { %v2970_v10 = vmax.f32 %v1605_v52, %v5678_v21  ;;  %v2971_v45 = vmax.f32 %v1606_v26, %v5682_v44  ;;  %v3513_v5 = vsel %vm3428_vm7, %v3375_v56, %v3512_v38  ;;  %v1309_v18 = vmax.f32 %v1127_v61, 0.0  ;;  %1237 = vst.msk [vmem:[%s4593_s6 + $0x1a8] sm:$0xff] %vm1183_vm0, %v1127_v61 }
 0x282   : > { %3579 = vst.msk [vmem:[%s4680_s20 + $0x60] sm:$0xff] %vm1183_vm0, %v3513_v5  ;;  %v1613_v39 = vrot.slane %v1327_v14, 2  ;;  %v1614_v8 = vrot.slane %v1327_v14, 4  ;;  %v1615_v42 = vrot.slane %v1327_v14, 6  ;;  %v2897_v51 = vmax.f32 %v1550_v57, %v5686_v12 }
 0x283   : > { %v2899_v52 = vmax.f32 %v1552_v60, %v3906_v16  ;;  %v3987_v26 = vrot.slane %v1327_v14, 9  ;;  %v1559_v21 = vrot.slane %v1309_v18, 2  ;;  %v1560_v44 = vrot.slane %v1309_v18, 4 }
 0x284   : > { %v1561_v0 = vrot.slane %v1309_v18, 6  ;;  %v3915_v27 = vrot.slane %v1309_v18, 9 }
 0x285   : > { %4117 = shalt.err (!%p4114_p4)
}
 0x286   : > { %s4154_s5 = smov 128   ;;  %s4155_s11 = smov 8   ;;  %v3988_v9 = vrot.slane %v1613_v39, 9  ;;  %v3989_v57 = vrot.slane %v1614_v8, 9  ;;  %v3990_v28 = vrot.slane %v1615_v42, 9  ;;  %v2980_v60 = vmax.f32 %v1327_v14, %v3987_v26  ;;  %v5878_v20 = vld [vmem:[#allocation8_spill] sm:$0xff] }
 0x287   : > { %4045 = dma.vmem_to_hbm [thread:$0]  (%p4219_p5), %s5755_s8, 9216, %s5757_s9, %s3586_s10, %s4154_s5, %s4154_s5, %s4155_s11   ;;  %v3916_v12 = vrot.slane %v1559_v21, 9  ;;  %v3917_v15 = vrot.slane %v1560_v44, 9  ;;  %v3918_v43 = vrot.slane %v1561_v0, 9  ;;  %v2908_v1 = vmax.f32 %v1309_v18, %v3915_v27  ;;  %v5879_v7 = vld [vmem:[#allocation12_spill] sm:$0xff]  ;;  %v5881_v16 = vld [vmem:[#allocation9_spill] sm:$0xff] }
 0x288   : > { %v2981_v35 = vmax.f32 %v1613_v39, %v3988_v9  ;;  %v2982_v24 = vmax.f32 %v1614_v8, %v3989_v57  ;;  %v2983_v37 = vmax.f32 %v1615_v42, %v3990_v28  ;;  %v3124_v55 = vmax.f32 %v5689_v13, %v2980_v60  ;;  %v5882_v56 = vld [vmem:[#allocation13_spill] sm:$0xff]  ;;  %v5885_v61 = vld [vmem:[#allocation14_spill] sm:$0xff]  ;;  %v5888_v5 = vld [vmem:[#allocation15_spill] sm:$0xff] }
 0x289   : > { %v2909_v23 = vmax.f32 %v1559_v21, %v3916_v12  ;;  %v2910_v47 = vmax.f32 %v1560_v44, %v3917_v15  ;;  %v2911_v58 = vmax.f32 %v1561_v0, %v3918_v43  ;;  %v3088_v2 = vmax.f32 %v2896_v63, %v2908_v1 }
 0x28a   : > { %v3125_v50 = vmax.f32 %v5691_v31, %v2981_v35  ;;  %v3126_v29 = vmax.f32 %v2970_v10, %v2982_v24  ;;  %v3127_v3 = vmax.f32 %v2971_v45, %v2983_v37  ;;  %v3412_v59 = vperm.slane %v3124_v55, 0  ;;  %v5887_v45 = vld [vmem:[#allocation11_spill] sm:$0xff] }
 0x28b   : > { %v3089_v53 = vmax.f32 %v2897_v51, %v2909_v23  ;;  %v3090_v33 = vmax.f32 %v2898_v30, %v2910_v47  ;;  %v3091_v25 = vmax.f32 %v2899_v52, %v2911_v58  ;;  %v3376_v34 = vperm.slane %v3088_v2, 0 }
 0x28c   : > { %v3413_v17 = vperm.slane %v3125_v50, 0  ;;  %v3414_v19 = vperm.slane %v3126_v29, 0  ;;  %v3545_v22 = vsel %vm3422_vm4, %v3412_v59, %v5751_v62  ;;  %v3415_v32 = vperm.slane %v3127_v3, 0  ;;  %v5884_v62 = vld [vmem:[#allocation10_spill] sm:$0xff] }
 0x28d   : > { %v3377_v13 = vperm.slane %v3089_v53, 0  ;;  %v3378_v11 = vperm.slane %v3090_v33, 0  ;;  %v3379_v31 = vperm.slane %v3091_v25, 0  ;;  %v5880_v36 = vmax.f32 %v5878_v20, %v5879_v7 }
 0x28e   : > { %v3546_v48 = vsel %vm3424_vm5, %v3413_v17, %v3545_v22  ;;  %v5883_v49 = vmax.f32 %v5881_v16, %v5882_v56  ;;  %v5886_v14 = vmax.f32 %v5884_v62, %v5885_v61  ;;  %v5889_v18 = vmax.f32 %v5887_v45, %v5888_v5 }
 0x28f   : > { %v3514_v41 = vsel %vm3416_vm1, %v3377_v13, %v3376_v34  ;;  %v3547_v4 = vsel %vm3426_vm6, %v3414_v19, %v3546_v48  ;;  %v3380_v40 = vperm.slane %v5880_v36, 0 }
 0x290   : > { %v3515_v6 = vsel %vm3418_vm2, %v3378_v11, %v3514_v41  ;;  %v3548_v46 = vsel %vm3428_vm7, %v3415_v32, %v3547_v4  ;;  %v3381_v54 = vperm.slane %v5883_v49, 0  ;;  %v3382_v63 = vperm.slane %v5886_v14, 0 }
 0x291   : > { %v3516_v38 = vsel %vm3420_vm3, %v3379_v31, %v3515_v6  ;;  %3584 = vst.msk [vmem:[%s4680_s20 + $0x88] sm:$0xff] %vm1183_vm0, %v3548_v46  ;;  %v3383_v39 = vperm.slane %v5889_v18, 0 }
 0x292   : > { %v3517_v10 = vsel %vm3422_vm4, %v3380_v40, %v3516_v38 }
 0x293   : > { %v3518_v8 = vsel %vm3424_vm5, %v3381_v54, %v3517_v10 }
 0x294   : > { %v3519_v42 = vsel %vm3426_vm6, %v3382_v63, %v3518_v8 }
 0x295   : > { %v3520_v51 = vsel %vm3428_vm7, %v3383_v39, %v3519_v42 }
 0x296   : > { %3580 = vst.msk [vmem:[%s4680_s20 + $0x68] sm:$0xff] %vm1183_vm0, %v3520_v51 }
 0x297 PF: > { %p4051_p5 = scmp.ge.s32.totalorder %s4152_s18, 2  ;;  %s3624_s25 = sand.u32 1, %s4140_s15  }
 0x298   : > { %s3625_s28 = scalar_lea.sflag [#allocation3], %s3624_s25 }
 0x299   : > { %p4048_p7 = pnand %p4051_p5, %p4223_p6 }
 0x29b   : > { %p4049_p8 = pneg %p4048_p7 }
 0x29d   : > { %4135 = dma.done.wait (%p4049_p8), %s3625_s28, 9216  }
 0x29e   : > { %4137 = vsyncadd (%p4049_p8), %s3625_s28, 4294958080  ;;  %p15_p9 = scmp.ge.s32.totalorder %s4206_s21, 4   ;;  %s5890_s15 = smov %s4144_s16 }
 0x29f   : > { %s5891_s16 = smov %s4148_s17  ;;  %s5892_s17 = smov %s4217_s24 }
 0x2a0   : > { %s5893_s18 = smov %s4206_s21  ;;  %17 = sbr.rel (!%p15_p9) target bundleno = 3 (0x3), region = 79 }
 0x2a5   :  { %3639 = vsyncpa [#allocation3], 1 }
 0x2a6   :  { %3641 = vsyncpa [#allocation3 + $0x1], 1 }

</bundles_post_ra>
